<compile_context>
chip_gen: v7x
topology: tpu7x:2x2x1
jax: 0.10.0
libtpu: 0.0.40
codegen_flags: <defaults>
</compile_context>

<pallas_src>
import functools

import jax
import jax.numpy as jnp
from jax.experimental import pallas as pl
from jax.experimental.pallas import tpu as pltpu

INIT_STDDEV = 0.02       # TODO(synk): init_weight_normal_stddev is undefined in the reference.
LRELU_SLOPE = 0.2
IMAGE_CHANNELS = 3       # the undefined global `image_channels` used in forward()


# --------------------------------------------------------------------------
# Pallas kernels
# --------------------------------------------------------------------------
def _mapping_kernel(z_ref, fcw_ref, fcb_ref, sw_ref, sb_ref, w_out_ref, s_out_ref, *, n_fc):
    """PixelNorm + n_fc (FC + LeakyReLU) layers + all style projections, fused."""
    x = z_ref[...].astype(jnp.float32)
    x = x * jax.lax.rsqrt(jnp.mean(x * x, axis=-1, keepdims=True) + 1e-8)
    for l in range(n_fc):
        x = jnp.dot(x, fcw_ref[l].astype(jnp.float32),
                    preferred_element_type=jnp.float32)
        x = x + fcb_ref[l].astype(jnp.float32)
        x = jnp.where(x >= 0.0, x, LRELU_SLOPE * x)
    w_out_ref[...] = x.astype(w_out_ref.dtype)
    s = jnp.dot(x, sw_ref[...].astype(jnp.float32),
                preferred_element_type=jnp.float32)
    s = s + sb_ref[...].astype(jnp.float32)
    s_out_ref[...] = s.astype(s_out_ref.dtype)


def mapping_and_styles(z, fc_params, sw_cat, sb_cat):
    n, d = z.shape
    n_fc = len(fc_params)
    fcw = jnp.stack([p["w"] for p in fc_params], axis=0)                 # (n_fc, d, d)
    fcb = jnp.stack([p["b"].reshape(1, d) for p in fc_params], axis=0)   # (n_fc, 1, d)
    s_total = sw_cat.shape[1]
    sb2 = sb_cat.reshape(1, s_total)
    return pl.pallas_call(
        functools.partial(_mapping_kernel, n_fc=n_fc),
        grid=(1,),
        in_specs=[
            pl.BlockSpec((n, d), lambda i: (0, 0)),
            pl.BlockSpec((n_fc, d, d), lambda i: (0, 0, 0)),
            pl.BlockSpec((n_fc, 1, d), lambda i: (0, 0, 0)),
            pl.BlockSpec((d, s_total), lambda i: (0, 0)),
            pl.BlockSpec((1, s_total), lambda i: (0, 0)),
        ],
        out_specs=(pl.BlockSpec((n, d), lambda i: (0, 0)),
                   pl.BlockSpec((n, s_total), lambda i: (0, 0))),
        out_shape=(jax.ShapeDtypeStruct((n, d), jnp.float32),
                   jax.ShapeDtypeStruct((n, s_total), jnp.float32)),
        compiler_params=pltpu.CompilerParams(dimension_semantics=("arbitrary",)),
    )(z.astype(jnp.float32), fcw, fcb, sw_cat, sb2)


def _block_kernel(*refs, act, has_skip, has_noise):
    """Fused StyleUpSkipBlock (per sample):

    2x nearest upsample (sub-pixel / parity decomposition) + modulated/demodulated
    3x3 conv + noise + bias + LeakyReLU + modulated 1x1 toRGB + RGB skip add.

    Outputs (parity-packed, re-interleaved for free in the wrapper):
      feat: (1, h, 2, w, 2*cout)   rgb: (1, h, 2, w, 2*3)
    """
    (x_ref, cs_ref, dm_ref, rs_ref, wc_ref, cb_ref, rw_ref, rb_ref) = refs[:8]
    k = 8
    skip_ref = nz_ref = nw_ref = None
    if has_skip:
        skip_ref = refs[k]; k += 1
    if has_noise:
        nz_ref, nw_ref = refs[k], refs[k + 1]; k += 2
    feat_ref, rgb_ref = refs[k], refs[k + 1]

    f32 = jnp.float32
    h, w, cin = x_ref.shape[1], x_ref.shape[2], x_ref.shape[3]
    cout = cb_ref.shape[1]

    # Input modulation at LOW resolution (commutes with nearest upsample + conv).
    xm = x_ref[0].astype(f32) * cs_ref[0].astype(f32)                 # (h, w, cin)

    # 1-pixel zero halo built in VMEM (no HBM pad).
    zc = jnp.zeros((h, 1, cin), f32)
    xp = jnp.concatenate([zc, xm, zc], axis=1)                        # (h, w+2, cin)
    zr = jnp.zeros((1, w + 2, cin), f32)
    xp = jnp.concatenate([zr, xp, zr], axis=0)                        # (h+2, w+2, cin)

    demod = dm_ref[0].astype(f32)                                     # (1, cout)
    cbias = cb_ref[...].astype(f32)                                   # (1, cout)
    rstyle = rs_ref[0].astype(f32)                                    # (1, cout)
    rw = rw_ref[...]                                                  # (cout, 3) bf16
    rbias = rb_ref[...].astype(f32)                                   # (1, 3)
    skip = skip_ref[0].astype(f32) if has_skip else None              # (h, w, 3)
    nw = nw_ref[0] if has_noise else None                             # SMEM scalar

    def to2d(v):   # (h, w, c) -> (h*w, c)
        c = v.shape[-1]
        if w % 8 == 0:
            return v.reshape(h * w, c)
        return jnp.concatenate([v[r] for r in range(h)], axis=0)

    def to3d(v):   # (h*w, c) -> (h, w, c)
        c = v.shape[-1]
        if w % 8 == 0:
            return v.reshape(h, w, c)
        return jnp.stack([v[r * w:(r + 1) * w] for r in range(h)], axis=0)

    feat_rows, rgb_rows = [], []
    for a in (0, 1):            # output row parity
        feat_cols, rgb_cols = [], []
        for b in (0, 1):        # output column parity
            # 4 collapsed taps concatenated along channels -> K = 4*cin.
            taps = [xp[a + p:a + p + h, b + q:b + q + w, :]
                    for p in (0, 1) for q in (0, 1)]
            patch = to2d(jnp.concatenate(taps, axis=-1))              # (h*w, 4*cin)
            y = jnp.dot(patch.astype(jnp.bfloat16), wc_ref[a, b],
                        preferred_element_type=f32)                   # (h*w, cout)
            y = y * demod + cbias                                     # demod hoisted
            if has_noise:
                nz = to2d(nz_ref[0, 2 * a + b])                       # (h*w, 1)
                y = y + nz * nw
            if act:
                y = jnp.where(y >= 0.0, y, LRELU_SLOPE * y)
            # Fused toRGB: modulated 1x1 conv (no demod) + bias (+ skip below).
            rgbv = jnp.dot((y * rstyle).astype(jnp.bfloat16), rw,
                           preferred_element_type=f32) + rbias        # (h*w, 3)
            feat_cols.append(to3d(y))
            rv = to3d(rgbv)
            if has_skip:
                rv = rv + skip          # nearest-upsampled skip == skip in parity space
            rgb_cols.append(rv)
        feat_rows.append(jnp.concatenate(feat_cols, axis=-1))          # (h, w, 2*cout)
        rgb_rows.append(jnp.concatenate(rgb_cols, axis=-1))            # (h, w, 6)
    feat_ref[0] = jnp.stack(feat_rows, axis=1).astype(feat_ref.dtype)  # (h, 2, w, 2*cout)
    rgb_ref[0] = jnp.stack(rgb_rows, axis=1).astype(rgb_ref.dtype)     # (h, 2, w, 6)


def style_up_skip_block(x, cstyle, demod, rstyle, wc, conv_b, rgb_w, rgb_b,
                        *, skip=None, noise=None, noise_w=None, act=True):
    """x: (N, h, w, cin) NHWC low-res feature.  Returns (feat (N,2h,2w,cout), rgb (N,2h,2w,3))."""
    n, h, w, cin = x.shape
    cout = conv_b.shape[0]
    has_skip = skip is not None
    has_noise = noise is not None

    inputs = [
        x.astype(jnp.bfloat16),
        cstyle.reshape(n, 1, cin).astype(jnp.float32),
        demod.reshape(n, 1, cout).astype(jnp.float32),
        rstyle.reshape(n, 1, cout).astype(jnp.float32),
        wc.astype(jnp.bfloat16),                                   # (2, 2, 4*cin, cout)
        conv_b.reshape(1, cout).astype(jnp.float32),
        rgb_w.astype(jnp.bfloat16),                                # (cout, 3)
        rgb_b.reshape(1, IMAGE_CHANNELS).astype(jnp.float32),
    ]
    in_specs = [
        pl.BlockSpec((1, h, w, cin), lambda i: (i, 0, 0, 0)),
        pl.BlockSpec((1, 1, cin), lambda i: (i, 0, 0)),
        pl.BlockSpec((1, 1, cout), lambda i: (i, 0, 0)),
        pl.BlockSpec((1, 1, cout), lambda i: (i, 0, 0)),
        pl.BlockSpec((2, 2, 4 * cin, cout), lambda i: (0, 0, 0, 0)),
        pl.BlockSpec((1, cout), lambda i: (0, 0)),
        pl.BlockSpec((cout, IMAGE_CHANNELS), lambda i: (0, 0)),
        pl.BlockSpec((1, IMAGE_CHANNELS), lambda i: (0, 0)),
    ]
    if has_skip:
        inputs.append(skip.astype(jnp.float32))                    # (N, h, w, 3) low-res
        in_specs.append(pl.BlockSpec((1, h, w, IMAGE_CHANNELS), lambda i: (i, 0, 0, 0)))
    if has_noise:
        inputs.append(noise.astype(jnp.float32))                   # (N, 4, h, w, 1) parity-planar
        in_specs.append(pl.BlockSpec((1, 4, h, w, 1), lambda i: (i, 0, 0, 0, 0)))
        inputs.append(noise_w.reshape(1).astype(jnp.float32))      # scalar via SMEM
        in_specs.append(pl.BlockSpec(memory_space=pltpu.MemorySpace.SMEM))

    out_shape = (jax.ShapeDtypeStruct((n, h, 2, w, 2 * cout), jnp.bfloat16),
                 jax.ShapeDtypeStruct((n, h, 2, w, 2 * IMAGE_CHANNELS), jnp.float32))
    out_specs = (pl.BlockSpec((1, h, 2, w, 2 * cout), lambda i: (i, 0, 0, 0, 0)),
                 pl.BlockSpec((1, h, 2, w, 2 * IMAGE_CHANNELS), lambda i: (i, 0, 0, 0, 0)))

    feat_p, rgb_p = pl.pallas_call(
        functools.partial(_block_kernel, act=act, has_skip=has_skip, has_noise=has_noise),
        grid=(n,),
        in_specs=in_specs,
        out_specs=out_specs,
        out_shape=out_shape,
        compiler_params=pltpu.CompilerParams(
            dimension_semantics=("parallel",),
            vmem_limit_bytes=32 * 1024 * 1024),
    )(*inputs)

    # Free (bitcast) reshapes: (n, h, 2, w, 2*C) row-major == (n, 2h, 2w, C).
    feat = feat_p.reshape(n, 2 * h, 2 * w, cout)
    rgb = rgb_p.reshape(n, 2 * h, 2 * w, IMAGE_CHANNELS)
    return feat, rgb


# --------------------------------------------------------------------------
# Host-graph helpers (tiny, O(cin*cout); run in plain XLA under jit)
# --------------------------------------------------------------------------
def _collapse_conv_weight(w):
    """(3,3,cin,cout) -> (2,2, 4*cin, cout): per output parity (a,b), the 3x3-over-
    nearest-upsample collapses to a 2x2 conv over the low-res input."""
    def ycol(a):
        return (w[0], w[1] + w[2]) if a == 0 else (w[0] + w[1], w[2])   # each (3,cin,cout)
    rows = []
    for a in (0, 1):
        wy = ycol(a)
        cols = []
        for b in (0, 1):
            taps = []
            for p in (0, 1):
                wyp = wy[p]
                wx = (wyp[0], wyp[1] + wyp[2]) if b == 0 else (wyp[0] + wyp[1], wyp[2])
                taps += [wx[0], wx[1]]                                   # (p,q) order: (0,0),(0,1),(1,0),(1,1)
            cols.append(jnp.concatenate(taps, axis=0))                   # (4*cin, cout)
        rows.append(jnp.stack(cols, axis=0))
    return jnp.stack(rows, axis=0)                                       # (2,2,4*cin,cout)


# --------------------------------------------------------------------------
# Parameter init (deterministic, in-script)
# --------------------------------------------------------------------------
def init_sg2_params(key, image_size, img_channels, dim_latent, n_fc):
    if len(img_channels) < 2:
        raise ValueError("the length of the image channel list should be bigger than 1")
    keys = iter(jax.random.split(key, 256))

    def nrm(*shape):
        return jax.random.normal(next(keys), shape, jnp.float32) * INIT_STDDEV

    fc = [{"w": nrm(dim_latent, dim_latent),
           "b": jnp.zeros((dim_latent,), jnp.float32)} for _ in range(n_fc)]

    blocks = []
    for i in range(1, len(img_channels)):
        cin, cout = img_channels[i - 1], img_channels[i]
        blocks.append({
            "style_w": nrm(dim_latent, cin),
            "style_b": jnp.ones((cin,), jnp.float32),
            "conv_w": nrm(3, 3, cin, cout),
            "conv_b": jnp.zeros((cout,), jnp.float32),
            "noise_w": jnp.zeros((1, 1), jnp.float32),
            "rgb_style_w": nrm(dim_latent, cout),
            "rgb_style_b": jnp.ones((cout,), jnp.float32),
            "rgb_w": nrm(cout, IMAGE_CHANNELS),
            "rgb_b": jnp.zeros((IMAGE_CHANNELS,), jnp.float32),
        })

    n_blocks = len(img_channels) - 1
    base = image_size // (2 ** n_blocks)
    constant = nrm(1, img_channels[0], base, base)          # NCHW parameter, like PyTorch
    return {"fc": fc, "blocks": blocks, "constant": constant}


# --------------------------------------------------------------------------
# Forward pass
# --------------------------------------------------------------------------
def sg2_generator_forward(params, latent_z, noise=None, style_mix_steps=(),
                          return_dlatents=False):
    if not isinstance(latent_z, (list, tuple)):
        latent_z = [latent_z]
    blocks = params["blocks"]

    # All style / rgb-style projection weights concatenated -> single fused matmul.
    sw_cat = jnp.concatenate(
        [w for blk in blocks for w in (blk["style_w"], blk["rgb_style_w"])], axis=1)
    sb_cat = jnp.concatenate(
        [b for blk in blocks for b in (blk["style_b"], blk["rgb_style_b"])], axis=0)

    latent_w, styles = [], []
    for z in latent_z:
        wl, st = mapping_and_styles(z, params["fc"], sw_cat, sb_cat)
        latent_w.append(wl)
        styles.append(st)

    n = latent_z[0].shape[0]
    const_nhwc = jnp.transpose(params["constant"], (0, 2, 3, 1)).astype(jnp.bfloat16)
    out = jnp.broadcast_to(const_nhwc, (n,) + const_nhwc.shape[1:])     # .repeat(N,1,1,1)

    prev_rgb = None
    off = 0
    for i, blk in enumerate(blocks):
        cin, cout = blk["conv_w"].shape[2], blk["conv_w"].shape[3]
        st = styles[1] if i in style_mix_steps else styles[0]
        cstyle = st[:, off:off + cin]
        rstyle = st[:, off + cin:off + cin + cout]
        off += cin + cout

        # Demodulation hoisted out of the kernel's tap loop (tiny, (N, cout)).
        w2 = jnp.sum(jnp.square(blk["conv_w"].astype(jnp.float32)), axis=(0, 1))
        demod = jax.lax.rsqrt(jnp.dot(jnp.square(cstyle.astype(jnp.float32)), w2) + 1e-8)

        wc = _collapse_conv_weight(blk["conv_w"].astype(jnp.float32))

        h, w = out.shape[1], out.shape[2]
        nz_pp = None
        if noise is None:
            # TODO(synk): noise=None would draw random noise in StyleGAN2; omitted for determinism.
            pass
        else:
            nz = jnp.reshape(noise[i], (n, 2 * h, 2 * w))
            # Parity-planar noise (N, 4, h, w, 1): plane index = 2*row_parity + col_parity.
            nz_pp = nz.reshape(n, h, 2, w, 2).transpose(0, 2, 4, 1, 3)
            nz_pp = nz_pp.reshape(n, 4, h, w)[..., None]

        feat, rgb = style_up_skip_block(
            out, cstyle, demod, rstyle, wc, blk["conv_b"], blk["rgb_w"], blk["rgb_b"],
            skip=prev_rgb, noise=nz_pp,
            noise_w=blk["noise_w"] if noise is not None else None)

        if cout > IMAGE_CHANNELS:
            out, prev_rgb = feat, rgb
        else:
            prev_rgb = rgb
            break

    rgb_nchw = jnp.transpose(prev_rgb, (0, 3, 1, 2))        # back to PyTorch NCHW
    if return_dlatents:
        return rgb_nchw, latent_w
    return rgb_nchw


# --------------------------------------------------------------------------
if __name__ == "__main__":
    image_size = 16
    img_channels = [16, 8, 3]      # constant 4x4x16 -> 8x8x8 -> 16x16x3
    dim_latent = 32
    n_fc = 4
    batch = 2

    key = jax.random.PRNGKey(0)
    kp, kz, kn = jax.random.split(key, 3)
    params = init_sg2_params(kp, image_size, img_channels, dim_latent, n_fc)
    z = jax.random.normal(kz, (batch, dim_latent), jnp.float32)

    # 1) default path: no external noise (has_noise=False / has_skip both variants).
    fwd = jax.jit(lambda p, zz: sg2_generator_forward(p, zz))
    rgb = jax.block_until_ready(fwd(params, z))
    assert rgb.shape == (batch, IMAGE_CHANNELS, image_size, image_size), rgb.shape
    assert bool(jnp.all(jnp.isfinite(rgb)))

    # 2) explicit per-block noise (exercises the SMEM noise_w scalar + noise branch).
    n_blocks = len(img_channels) - 1
    nkeys = jax.random.split(kn, n_blocks)
    noise = []
    for i in range(n_blocks):
        res = image_size // (2 ** (n_blocks - 1 - i))
        noise.append(jax.random.normal(nkeys[i], (batch, 1, res, res), jnp.float32))
    fwd_n = jax.jit(lambda p, zz, nz: sg2_generator_forward(p, zz, noise=nz))
    rgb2 = jax.block_until_ready(fwd_n(params, z, noise))
    assert rgb2.shape == rgb.shape
    assert bool(jnp.all(jnp.isfinite(rgb2)))

    print("KERNEL_OK")
</pallas_src>

<mosaic_0001>
module attributes {stable_mosaic.version = 11 : i64} {
  func.func @_mapping_kernel(%arg0: i32, %arg1: memref<2x32xf32, #tpu.memory_space<vmem>>, %arg2: memref<4x32x32xf32, #tpu.memory_space<vmem>>, %arg3: memref<4x1x32xf32, #tpu.memory_space<vmem>>, %arg4: memref<32x35xf32, #tpu.memory_space<vmem>>, %arg5: memref<1x35xf32, #tpu.memory_space<vmem>>, %arg6: memref<2x32xf32, #tpu.memory_space<vmem>>, %arg7: memref<2x35xf32, #tpu.memory_space<vmem>>) attributes {dimension_semantics = [#tpu.dimension_semantics<arbitrary>], iteration_bounds = array<i64: 1>, scalar_prefetch = 0 : i64, scratch_operands = 0 : i64, tpu.core_type = #tpu.core_type<tc>, window_params = [{pipeline_mode = #tpu.pipeline_mode<synchronous>, transform_indices = @transform_0, window_bounds = array<i64: 2, 32>}, {pipeline_mode = #tpu.pipeline_mode<synchronous>, transform_indices = @transform_1, window_bounds = array<i64: 4, 32, 32>}, {pipeline_mode = #tpu.pipeline_mode<synchronous>, transform_indices = @transform_2, window_bounds = array<i64: 4, 1, 32>}, {pipeline_mode = #tpu.pipeline_mode<synchronous>, transform_indices = @transform_3, window_bounds = array<i64: 32, 35>}, {pipeline_mode = #tpu.pipeline_mode<synchronous>, transform_indices = @transform_4, window_bounds = array<i64: 1, 35>}, {pipeline_mode = #tpu.pipeline_mode<synchronous>, transform_indices = @transform_5, window_bounds = array<i64: 2, 32>}, {pipeline_mode = #tpu.pipeline_mode<synchronous>, transform_indices = @transform_6, window_bounds = array<i64: 2, 35>}]} {
    %c0 = arith.constant 0 : index
    %c0_0 = arith.constant 0 : index
    %0 = vector.load %arg1[%c0, %c0_0] : memref<2x32xf32, #tpu.memory_space<vmem>>, vector<2x32xf32>
    %1 = arith.mulf %0, %0 : vector<2x32xf32>
    %cst = arith.constant dense<0.000000e+00> : vector<2xf32>
    %2 = vector.multi_reduction <add>, %1, %cst [1] : vector<2x32xf32> to vector<2xf32>
    %3 = vector.shape_cast %2 : vector<2xf32> to vector<2x1xf32>
    %cst_1 = arith.constant 3.200000e+01 : f32
    %4 = vector.broadcast %cst_1 : f32 to vector<2x1xf32>
    %5 = arith.divf %3, %4 : vector<2x1xf32>
    %cst_2 = arith.constant 9.99999993E-9 : f32
    %6 = vector.broadcast %cst_2 : f32 to vector<2x1xf32>
    %7 = arith.addf %5, %6 : vector<2x1xf32>
    %8 = math.rsqrt %7 : vector<2x1xf32>
    %9 = vector.broadcast %8 : vector<2x1xf32> to vector<2x32xf32>
    %10 = arith.mulf %0, %9 : vector<2x32xf32>
    %c0_3 = arith.constant 0 : index
    %c0_4 = arith.constant 0 : index
    %c0_5 = arith.constant 0 : index
    %11 = vector.load %arg2[%c0_3, %c0_4, %c0_5] : memref<4x32x32xf32, #tpu.memory_space<vmem>>, vector<1x32x32xf32>
    %12 = vector.shape_cast %11 : vector<1x32x32xf32> to vector<32x32xf32>
    %cst_6 = arith.constant dense<0.000000e+00> : vector<2x32xf32>
    %13 = tpu.matmul %10, %12, %cst_6 {dimension_numbers = #tpu.dot_dimension_numbers<[1], [0], [0], [1], [0, 0, 1, 1], [], []>} : vector<2x32xf32>, vector<32x32xf32>, vector<2x32xf32> -> vector<2x32xf32>
    %c0_7 = arith.constant 0 : index
    %c0_8 = arith.constant 0 : index
    %c0_9 = arith.constant 0 : index
    %14 = vector.load %arg3[%c0_7, %c0_8, %c0_9] : memref<4x1x32xf32, #tpu.memory_space<vmem>>, vector<1x1x32xf32>
    %15 = vector.shape_cast %14 : vector<1x1x32xf32> to vector<1x32xf32>
    %16 = vector.broadcast %15 : vector<1x32xf32> to vector<2x32xf32>
    %17 = arith.addf %13, %16 : vector<2x32xf32>
    %cst_10 = arith.constant 0.000000e+00 : f32
    %18 = vector.broadcast %cst_10 : f32 to vector<2x32xf32>
    %19 = arith.cmpf oge, %17, %18 : vector<2x32xf32>
    %cst_11 = arith.constant 2.000000e-01 : f32
    %20 = vector.broadcast %cst_11 : f32 to vector<2x32xf32>
    %21 = arith.mulf %20, %17 : vector<2x32xf32>
    %22 = arith.select %19, %17, %21 : vector<2x32xi1>, vector<2x32xf32>
    %c1 = arith.constant 1 : index
    %c0_12 = arith.constant 0 : index
    %c0_13 = arith.constant 0 : index
    %23 = vector.load %arg2[%c1, %c0_12, %c0_13] : memref<4x32x32xf32, #tpu.memory_space<vmem>>, vector<1x32x32xf32>
    %24 = vector.shape_cast %23 : vector<1x32x32xf32> to vector<32x32xf32>
    %cst_14 = arith.constant dense<0.000000e+00> : vector<2x32xf32>
    %25 = tpu.matmul %22, %24, %cst_14 {dimension_numbers = #tpu.dot_dimension_numbers<[1], [0], [0], [1], [0, 0, 1, 1], [], []>} : vector<2x32xf32>, vector<32x32xf32>, vector<2x32xf32> -> vector<2x32xf32>
    %c1_15 = arith.constant 1 : index
    %c0_16 = arith.constant 0 : index
    %c0_17 = arith.constant 0 : index
    %26 = vector.load %arg3[%c1_15, %c0_16, %c0_17] : memref<4x1x32xf32, #tpu.memory_space<vmem>>, vector<1x1x32xf32>
    %27 = vector.shape_cast %26 : vector<1x1x32xf32> to vector<1x32xf32>
    %28 = vector.broadcast %27 : vector<1x32xf32> to vector<2x32xf32>
    %29 = arith.addf %25, %28 : vector<2x32xf32>
    %cst_18 = arith.constant 0.000000e+00 : f32
    %30 = vector.broadcast %cst_18 : f32 to vector<2x32xf32>
    %31 = arith.cmpf oge, %29, %30 : vector<2x32xf32>
    %cst_19 = arith.constant 2.000000e-01 : f32
    %32 = vector.broadcast %cst_19 : f32 to vector<2x32xf32>
    %33 = arith.mulf %32, %29 : vector<2x32xf32>
    %34 = arith.select %31, %29, %33 : vector<2x32xi1>, vector<2x32xf32>
    %c2 = arith.constant 2 : index
    %c0_20 = arith.constant 0 : index
    %c0_21 = arith.constant 0 : index
    %35 = vector.load %arg2[%c2, %c0_20, %c0_21] : memref<4x32x32xf32, #tpu.memory_space<vmem>>, vector<1x32x32xf32>
    %36 = vector.shape_cast %35 : vector<1x32x32xf32> to vector<32x32xf32>
    %cst_22 = arith.constant dense<0.000000e+00> : vector<2x32xf32>
    %37 = tpu.matmul %34, %36, %cst_22 {dimension_numbers = #tpu.dot_dimension_numbers<[1], [0], [0], [1], [0, 0, 1, 1], [], []>} : vector<2x32xf32>, vector<32x32xf32>, vector<2x32xf32> -> vector<2x32xf32>
    %c2_23 = arith.constant 2 : index
    %c0_24 = arith.constant 0 : index
    %c0_25 = arith.constant 0 : index
    %38 = vector.load %arg3[%c2_23, %c0_24, %c0_25] : memref<4x1x32xf32, #tpu.memory_space<vmem>>, vector<1x1x32xf32>
    %39 = vector.shape_cast %38 : vector<1x1x32xf32> to vector<1x32xf32>
    %40 = vector.broadcast %39 : vector<1x32xf32> to vector<2x32xf32>
    %41 = arith.addf %37, %40 : vector<2x32xf32>
    %cst_26 = arith.constant 0.000000e+00 : f32
    %42 = vector.broadcast %cst_26 : f32 to vector<2x32xf32>
    %43 = arith.cmpf oge, %41, %42 : vector<2x32xf32>
    %cst_27 = arith.constant 2.000000e-01 : f32
    %44 = vector.broadcast %cst_27 : f32 to vector<2x32xf32>
    %45 = arith.mulf %44, %41 : vector<2x32xf32>
    %46 = arith.select %43, %41, %45 : vector<2x32xi1>, vector<2x32xf32>
    %c3 = arith.constant 3 : index
    %c0_28 = arith.constant 0 : index
    %c0_29 = arith.constant 0 : index
    %47 = vector.load %arg2[%c3, %c0_28, %c0_29] : memref<4x32x32xf32, #tpu.memory_space<vmem>>, vector<1x32x32xf32>
    %48 = vector.shape_cast %47 : vector<1x32x32xf32> to vector<32x32xf32>
    %cst_30 = arith.constant dense<0.000000e+00> : vector<2x32xf32>
    %49 = tpu.matmul %46, %48, %cst_30 {dimension_numbers = #tpu.dot_dimension_numbers<[1], [0], [0], [1], [0, 0, 1, 1], [], []>} : vector<2x32xf32>, vector<32x32xf32>, vector<2x32xf32> -> vector<2x32xf32>
    %c3_31 = arith.constant 3 : index
    %c0_32 = arith.constant 0 : index
    %c0_33 = arith.constant 0 : index
    %50 = vector.load %arg3[%c3_31, %c0_32, %c0_33] : memref<4x1x32xf32, #tpu.memory_space<vmem>>, vector<1x1x32xf32>
    %51 = vector.shape_cast %50 : vector<1x1x32xf32> to vector<1x32xf32>
    %52 = vector.broadcast %51 : vector<1x32xf32> to vector<2x32xf32>
    %53 = arith.addf %49, %52 : vector<2x32xf32>
    %cst_34 = arith.constant 0.000000e+00 : f32
    %54 = vector.broadcast %cst_34 : f32 to vector<2x32xf32>
    %55 = arith.cmpf oge, %53, %54 : vector<2x32xf32>
    %cst_35 = arith.constant 2.000000e-01 : f32
    %56 = vector.broadcast %cst_35 : f32 to vector<2x32xf32>
    %57 = arith.mulf %56, %53 : vector<2x32xf32>
    %58 = arith.select %55, %53, %57 : vector<2x32xi1>, vector<2x32xf32>
    %c0_36 = arith.constant 0 : index
    %c0_37 = arith.constant 0 : index
    %59 = vector.load %arg6[%c0_36, %c0_37] : memref<2x32xf32, #tpu.memory_space<vmem>>, vector<2x32xf32>
    tpu.vector_store %arg6[%c0_36, %c0_37], %58 {strides = array<i32>} : memref<2x32xf32, #tpu.memory_space<vmem>>, vector<2x32xf32>,
    %c0_38 = arith.constant 0 : index
    %c0_39 = arith.constant 0 : index
    %60 = vector.load %arg4[%c0_38, %c0_39] : memref<32x35xf32, #tpu.memory_space<vmem>>, vector<32x35xf32>
    %cst_40 = arith.constant dense<0.000000e+00> : vector<2x35xf32>
    %61 = tpu.matmul %58, %60, %cst_40 {dimension_numbers = #tpu.dot_dimension_numbers<[1], [0], [0], [1], [0, 0, 1, 1], [], []>} : vector<2x32xf32>, vector<32x35xf32>, vector<2x35xf32> -> vector<2x35xf32>
    %c0_41 = arith.constant 0 : index
    %c0_42 = arith.constant 0 : index
    %62 = vector.load %arg5[%c0_41, %c0_42] : memref<1x35xf32, #tpu.memory_space<vmem>>, vector<1x35xf32>
    %63 = vector.broadcast %62 : vector<1x35xf32> to vector<2x35xf32>
    %64 = arith.addf %61, %63 : vector<2x35xf32>
    %c0_43 = arith.constant 0 : index
    %c0_44 = arith.constant 0 : index
    %65 = vector.load %arg7[%c0_43, %c0_44] : memref<2x35xf32, #tpu.memory_space<vmem>>, vector<2x35xf32>
    tpu.vector_store %arg7[%c0_43, %c0_44], %64 {strides = array<i32>} : memref<2x35xf32, #tpu.memory_space<vmem>>, vector<2x35xf32>,
    return
  }
  func.func @transform_0(%arg0: i32) -> (i32, i32) {
    %c0_i32 = arith.constant 0 : i32
    %c0_i32_0 = arith.constant 0 : i32
    %c0_i32_1 = arith.constant 0 : i32
    return %c0_i32, %c0_i32_0 : i32, i32
  }
  func.func @transform_1(%arg0: i32) -> (i32, i32, i32) {
    %c0_i32 = arith.constant 0 : i32
    %c0_i32_0 = arith.constant 0 : i32
    %c0_i32_1 = arith.constant 0 : i32
    %c0_i32_2 = arith.constant 0 : i32
    return %c0_i32, %c0_i32_0, %c0_i32_1 : i32, i32, i32
  }
  func.func @transform_2(%arg0: i32) -> (i32, i32, i32) {
    %c0_i32 = arith.constant 0 : i32
    %c0_i32_0 = arith.constant 0 : i32
    %c0_i32_1 = arith.constant 0 : i32
    %c0_i32_2 = arith.constant 0 : i32
    return %c0_i32, %c0_i32_0, %c0_i32_1 : i32, i32, i32
  }
  func.func @transform_3(%arg0: i32) -> (i32, i32) {
    %c0_i32 = arith.constant 0 : i32
    %c0_i32_0 = arith.constant 0 : i32
    %c0_i32_1 = arith.constant 0 : i32
    return %c0_i32, %c0_i32_0 : i32, i32
  }
  func.func @transform_4(%arg0: i32) -> (i32, i32) {
    %c0_i32 = arith.constant 0 : i32
    %c0_i32_0 = arith.constant 0 : i32
    %c0_i32_1 = arith.constant 0 : i32
    return %c0_i32, %c0_i32_0 : i32, i32
  }
  func.func @transform_5(%arg0: i32) -> (i32, i32) {
    %c0_i32 = arith.constant 0 : i32
    %c0_i32_0 = arith.constant 0 : i32
    %c0_i32_1 = arith.constant 0 : i32
    return %c0_i32, %c0_i32_0 : i32, i32
  }
  func.func @transform_6(%arg0: i32) -> (i32, i32) {
    %c0_i32 = arith.constant 0 : i32
    %c0_i32_0 = arith.constant 0 : i32
    %c0_i32_1 = arith.constant 0 : i32
    return %c0_i32, %c0_i32_0 : i32, i32
  }
}

module attributes {stable_mosaic.version = 11 : i64} {
  func.func @_block_kernel(%arg0: i32, %arg1: memref<1x4x4x16xbf16, #tpu.memory_space<vmem>>, %arg2: memref<1x1x16xf32, #tpu.memory_space<vmem>>, %arg3: memref<1x1x8xf32, #tpu.memory_space<vmem>>, %arg4: memref<1x1x8xf32, #tpu.memory_space<vmem>>, %arg5: memref<2x2x64x8xbf16, #tpu.memory_space<vmem>>, %arg6: memref<1x8xf32, #tpu.memory_space<vmem>>, %arg7: memref<8x3xbf16, #tpu.memory_space<vmem>>, %arg8: memref<1x3xf32, #tpu.memory_space<vmem>>, %arg9: memref<1x4x2x4x16xbf16, #tpu.memory_space<vmem>>, %arg10: memref<1x4x2x4x6xf32, #tpu.memory_space<vmem>>) attributes {dimension_semantics = [#tpu.dimension_semantics<parallel>], iteration_bounds = array<i64: 2>, scalar_prefetch = 0 : i64, scratch_operands = 0 : i64, tpu.core_type = #tpu.core_type<tc>, window_params = [{transform_indices = @transform_0, window_bounds = array<i64: 1, 4, 4, 16>}, {transform_indices = @transform_1, window_bounds = array<i64: 1, 1, 16>}, {transform_indices = @transform_2, window_bounds = array<i64: 1, 1, 8>}, {transform_indices = @transform_3, window_bounds = array<i64: 1, 1, 8>}, {pipeline_mode = #tpu.pipeline_mode<synchronous>, transform_indices = @transform_4, window_bounds = array<i64: 2, 2, 64, 8>}, {pipeline_mode = #tpu.pipeline_mode<synchronous>, transform_indices = @transform_5, window_bounds = array<i64: 1, 8>}, {pipeline_mode = #tpu.pipeline_mode<synchronous>, transform_indices = @transform_6, window_bounds = array<i64: 8, 3>}, {pipeline_mode = #tpu.pipeline_mode<synchronous>, transform_indices = @transform_7, window_bounds = array<i64: 1, 3>}, {transform_indices = @transform_8, window_bounds = array<i64: 1, 4, 2, 4, 16>}, {transform_indices = @transform_9, window_bounds = array<i64: 1, 4, 2, 4, 6>}]} {
    %c0 = arith.constant 0 : index
    %c0_0 = arith.constant 0 : index
    %c0_1 = arith.constant 0 : index
    %c0_2 = arith.constant 0 : index
    %0 = vector.load %arg1[%c0, %c0_0, %c0_1, %c0_2] : memref<1x4x4x16xbf16, #tpu.memory_space<vmem>>, vector<1x4x4x16xbf16>
    %1 = vector.shape_cast %0 : vector<1x4x4x16xbf16> to vector<4x4x16xbf16>
    %2 = arith.extf %1 : vector<4x4x16xbf16> to vector<4x4x16xf32>
    %c0_3 = arith.constant 0 : index
    %c0_4 = arith.constant 0 : index
    %c0_5 = arith.constant 0 : index
    %3 = vector.load %arg2[%c0_3, %c0_4, %c0_5] : memref<1x1x16xf32, #tpu.memory_space<vmem>>, vector<1x1x16xf32>
    %4 = vector.shape_cast %3 : vector<1x1x16xf32> to vector<1x16xf32>
    %5 = vector.shape_cast %4 : vector<1x16xf32> to vector<1x1x16xf32>
    %6 = vector.broadcast %5 : vector<1x1x16xf32> to vector<4x4x16xf32>
    %7 = arith.mulf %2, %6 : vector<4x4x16xf32>
    %cst = arith.constant 0.000000e+00 : f32
    %8 = vector.broadcast %cst : f32 to vector<4x1x16xf32>
    %9 = tpu.concatenate %8, %7, %8 in 1 : vector<4x1x16xf32>, vector<4x4x16xf32>, vector<4x1x16xf32> -> vector<4x6x16xf32>
    %cst_6 = arith.constant 0.000000e+00 : f32
    %10 = vector.broadcast %cst_6 : f32 to vector<1x6x16xf32>
    %11 = tpu.concatenate %10, %9, %10 in 0 : vector<1x6x16xf32>, vector<4x6x16xf32>, vector<1x6x16xf32> -> vector<6x6x16xf32>
    %c0_7 = arith.constant 0 : index
    %c0_8 = arith.constant 0 : index
    %c0_9 = arith.constant 0 : index
    %12 = vector.load %arg3[%c0_7, %c0_8, %c0_9] : memref<1x1x8xf32, #tpu.memory_space<vmem>>, vector<1x1x8xf32>
    %13 = vector.shape_cast %12 : vector<1x1x8xf32> to vector<1x8xf32>
    %c0_10 = arith.constant 0 : index
    %c0_11 = arith.constant 0 : index
    %14 = vector.load %arg6[%c0_10, %c0_11] : memref<1x8xf32, #tpu.memory_space<vmem>>, vector<1x8xf32>
    %c0_12 = arith.constant 0 : index
    %c0_13 = arith.constant 0 : index
    %c0_14 = arith.constant 0 : index
    %15 = vector.load %arg4[%c0_12, %c0_13, %c0_14] : memref<1x1x8xf32, #tpu.memory_space<vmem>>, vector<1x1x8xf32>
    %16 = vector.shape_cast %15 : vector<1x1x8xf32> to vector<1x8xf32>
    %c0_15 = arith.constant 0 : index
    %c0_16 = arith.constant 0 : index
    %17 = vector.load %arg7[%c0_15, %c0_16] : memref<8x3xbf16, #tpu.memory_space<vmem>>, vector<8x3xbf16>
    %c0_17 = arith.constant 0 : index
    %c0_18 = arith.constant 0 : index
    %18 = vector.load %arg8[%c0_17, %c0_18] : memref<1x3xf32, #tpu.memory_space<vmem>>, vector<1x3xf32>
    %19 = vector.extract_strided_slice %11 {offsets = [0, 0, 0], sizes = [4, 4, 16], strides = [1, 1, 1]} : vector<6x6x16xf32> to vector<4x4x16xf32>
    %20 = vector.extract_strided_slice %11 {offsets = [0, 1, 0], sizes = [4, 4, 16], strides = [1, 1, 1]} : vector<6x6x16xf32> to vector<4x4x16xf32>
    %21 = vector.extract_strided_slice %11 {offsets = [1, 0, 0], sizes = [4, 4, 16], strides = [1, 1, 1]} : vector<6x6x16xf32> to vector<4x4x16xf32>
    %22 = vector.extract_strided_slice %11 {offsets = [1, 1, 0], sizes = [4, 4, 16], strides = [1, 1, 1]} : vector<6x6x16xf32> to vector<4x4x16xf32>
    %23 = tpu.concatenate %19, %20, %21, %22 in 2 : vector<4x4x16xf32>, vector<4x4x16xf32>, vector<4x4x16xf32>, vector<4x4x16xf32> -> vector<4x4x64xf32>
    %24 = vector.extract_strided_slice %23 {offsets = [0, 0, 0], sizes = [1, 4, 64], strides = [1, 1, 1]} : vector<4x4x64xf32> to vector<1x4x64xf32>
    %25 = vector.shape_cast %24 : vector<1x4x64xf32> to vector<4x64xf32>
    %26 = vector.extract_strided_slice %23 {offsets = [1, 0, 0], sizes = [1, 4, 64], strides = [1, 1, 1]} : vector<4x4x64xf32> to vector<1x4x64xf32>
    %27 = vector.shape_cast %26 : vector<1x4x64xf32> to vector<4x64xf32>
    %28 = vector.extract_strided_slice %23 {offsets = [2, 0, 0], sizes = [1, 4, 64], strides = [1, 1, 1]} : vector<4x4x64xf32> to vector<1x4x64xf32>
    %29 = vector.shape_cast %28 : vector<1x4x64xf32> to vector<4x64xf32>
    %30 = vector.extract_strided_slice %23 {offsets = [3, 0, 0], sizes = [1, 4, 64], strides = [1, 1, 1]} : vector<4x4x64xf32> to vector<1x4x64xf32>
    %31 = vector.shape_cast %30 : vector<1x4x64xf32> to vector<4x64xf32>
    %32 = tpu.concatenate %25, %27, %29, %31 in 0 : vector<4x64xf32>, vector<4x64xf32>, vector<4x64xf32>, vector<4x64xf32> -> vector<16x64xf32>
    %33 = arith.truncf %32 : vector<16x64xf32> to vector<16x64xbf16>
    %c0_19 = arith.constant 0 : index
    %c0_20 = arith.constant 0 : index
    %c0_21 = arith.constant 0 : index
    %c0_22 = arith.constant 0 : index
    %34 = vector.load %arg5[%c0_19, %c0_20, %c0_21, %c0_22] : memref<2x2x64x8xbf16, #tpu.memory_space<vmem>>, vector<1x1x64x8xbf16>
    %35 = vector.shape_cast %34 : vector<1x1x64x8xbf16> to vector<64x8xbf16>
    %cst_23 = arith.constant dense<0.000000e+00> : vector<16x8xf32>
    %36 = tpu.matmul %33, %35, %cst_23 {dimension_numbers = #tpu.dot_dimension_numbers<[1], [0], [0], [1], [0, 0, 1, 1], [], []>} : vector<16x64xbf16>, vector<64x8xbf16>, vector<16x8xf32> -> vector<16x8xf32>
    %37 = vector.broadcast %13 : vector<1x8xf32> to vector<16x8xf32>
    %38 = arith.mulf %36, %37 : vector<16x8xf32>
    %39 = vector.broadcast %14 : vector<1x8xf32> to vector<16x8xf32>
    %40 = arith.addf %38, %39 : vector<16x8xf32>
    %cst_24 = arith.constant 0.000000e+00 : f32
    %41 = vector.broadcast %cst_24 : f32 to vector<16x8xf32>
    %42 = arith.cmpf oge, %40, %41 : vector<16x8xf32>
    %cst_25 = arith.constant 2.000000e-01 : f32
    %43 = vector.broadcast %cst_25 : f32 to vector<16x8xf32>
    %44 = arith.mulf %43, %40 : vector<16x8xf32>
    %45 = arith.select %42, %40, %44 : vector<16x8xi1>, vector<16x8xf32>
    %46 = vector.broadcast %16 : vector<1x8xf32> to vector<16x8xf32>
    %47 = arith.mulf %45, %46 : vector<16x8xf32>
    %48 = arith.truncf %47 : vector<16x8xf32> to vector<16x8xbf16>
    %cst_26 = arith.constant dense<0.000000e+00> : vector<16x3xf32>
    %49 = tpu.matmul %48, %17, %cst_26 {dimension_numbers = #tpu.dot_dimension_numbers<[1], [0], [0], [1], [0, 0, 1, 1], [], []>} : vector<16x8xbf16>, vector<8x3xbf16>, vector<16x3xf32> -> vector<16x3xf32>
    %50 = vector.broadcast %18 : vector<1x3xf32> to vector<16x3xf32>
    %51 = arith.addf %49, %50 : vector<16x3xf32>
    %52 = vector.extract_strided_slice %45 {offsets = [0, 0], sizes = [4, 8], strides = [1, 1]} : vector<16x8xf32> to vector<4x8xf32>
    %53 = vector.extract_strided_slice %45 {offsets = [4, 0], sizes = [4, 8], strides = [1, 1]} : vector<16x8xf32> to vector<4x8xf32>
    %54 = vector.extract_strided_slice %45 {offsets = [8, 0], sizes = [4, 8], strides = [1, 1]} : vector<16x8xf32> to vector<4x8xf32>
    %55 = vector.extract_strided_slice %45 {offsets = [12, 0], sizes = [4, 8], strides = [1, 1]} : vector<16x8xf32> to vector<4x8xf32>
    %56 = vector.shape_cast %52 : vector<4x8xf32> to vector<1x4x8xf32>
    %57 = vector.shape_cast %53 : vector<4x8xf32> to vector<1x4x8xf32>
    %58 = vector.shape_cast %54 : vector<4x8xf32> to vector<1x4x8xf32>
    %59 = vector.shape_cast %55 : vector<4x8xf32> to vector<1x4x8xf32>
    %60 = tpu.concatenate %56, %57, %58, %59 in 0 : vector<1x4x8xf32>, vector<1x4x8xf32>, vector<1x4x8xf32>, vector<1x4x8xf32> -> vector<4x4x8xf32>
    %61 = vector.extract_strided_slice %51 {offsets = [0, 0], sizes = [4, 3], strides = [1, 1]} : vector<16x3xf32> to vector<4x3xf32>
    %62 = vector.extract_strided_slice %51 {offsets = [4, 0], sizes = [4, 3], strides = [1, 1]} : vector<16x3xf32> to vector<4x3xf32>
    %63 = vector.extract_strided_slice %51 {offsets = [8, 0], sizes = [4, 3], strides = [1, 1]} : vector<16x3xf32> to vector<4x3xf32>
    %64 = vector.extract_strided_slice %51 {offsets = [12, 0], sizes = [4, 3], strides = [1, 1]} : vector<16x3xf32> to vector<4x3xf32>
    %65 = vector.shape_cast %61 : vector<4x3xf32> to vector<1x4x3xf32>
    %66 = vector.shape_cast %62 : vector<4x3xf32> to vector<1x4x3xf32>
    %67 = vector.shape_cast %63 : vector<4x3xf32> to vector<1x4x3xf32>
    %68 = vector.shape_cast %64 : vector<4x3xf32> to vector<1x4x3xf32>
    %69 = tpu.concatenate %65, %66, %67, %68 in 0 : vector<1x4x3xf32>, vector<1x4x3xf32>, vector<1x4x3xf32>, vector<1x4x3xf32> -> vector<4x4x3xf32>
    %70 = vector.extract_strided_slice %11 {offsets = [0, 1, 0], sizes = [4, 4, 16], strides = [1, 1, 1]} : vector<6x6x16xf32> to vector<4x4x16xf32>
    %71 = vector.extract_strided_slice %11 {offsets = [0, 2, 0], sizes = [4, 4, 16], strides = [1, 1, 1]} : vector<6x6x16xf32> to vector<4x4x16xf32>
    %72 = vector.extract_strided_slice %11 {offsets = [1, 1, 0], sizes = [4, 4, 16], strides = [1, 1, 1]} : vector<6x6x16xf32> to vector<4x4x16xf32>
    %73 = vector.extract_strided_slice %11 {offsets = [1, 2, 0], sizes = [4, 4, 16], strides = [1, 1, 1]} : vector<6x6x16xf32> to vector<4x4x16xf32>
    %74 = tpu.concatenate %70, %71, %72, %73 in 2 : vector<4x4x16xf32>, vector<4x4x16xf32>, vector<4x4x16xf32>, vector<4x4x16xf32> -> vector<4x4x64xf32>
    %75 = vector.extract_strided_slice %74 {offsets = [0, 0, 0], sizes = [1, 4, 64], strides = [1, 1, 1]} : vector<4x4x64xf32> to vector<1x4x64xf32>
    %76 = vector.shape_cast %75 : vector<1x4x64xf32> to vector<4x64xf32>
    %77 = vector.extract_strided_slice %74 {offsets = [1, 0, 0], sizes = [1, 4, 64], strides = [1, 1, 1]} : vector<4x4x64xf32> to vector<1x4x64xf32>
    %78 = vector.shape_cast %77 : vector<1x4x64xf32> to vector<4x64xf32>
    %79 = vector.extract_strided_slice %74 {offsets = [2, 0, 0], sizes = [1, 4, 64], strides = [1, 1, 1]} : vector<4x4x64xf32> to vector<1x4x64xf32>
    %80 = vector.shape_cast %79 : vector<1x4x64xf32> to vector<4x64xf32>
    %81 = vector.extract_strided_slice %74 {offsets = [3, 0, 0], sizes = [1, 4, 64], strides = [1, 1, 1]} : vector<4x4x64xf32> to vector<1x4x64xf32>
    %82 = vector.shape_cast %81 : vector<1x4x64xf32> to vector<4x64xf32>
    %83 = tpu.concatenate %76, %78, %80, %82 in 0 : vector<4x64xf32>, vector<4x64xf32>, vector<4x64xf32>, vector<4x64xf32> -> vector<16x64xf32>
    %84 = arith.truncf %83 : vector<16x64xf32> to vector<16x64xbf16>
    %c0_27 = arith.constant 0 : index
    %c1 = arith.constant 1 : index
    %c0_28 = arith.constant 0 : index
    %c0_29 = arith.constant 0 : index
    %85 = vector.load %arg5[%c0_27, %c1, %c0_28, %c0_29] : memref<2x2x64x8xbf16, #tpu.memory_space<vmem>>, vector<1x1x64x8xbf16>
    %86 = vector.shape_cast %85 : vector<1x1x64x8xbf16> to vector<64x8xbf16>
    %cst_30 = arith.constant dense<0.000000e+00> : vector<16x8xf32>
    %87 = tpu.matmul %84, %86, %cst_30 {dimension_numbers = #tpu.dot_dimension_numbers<[1], [0], [0], [1], [0, 0, 1, 1], [], []>} : vector<16x64xbf16>, vector<64x8xbf16>, vector<16x8xf32> -> vector<16x8xf32>
    %88 = vector.broadcast %13 : vector<1x8xf32> to vector<16x8xf32>
    %89 = arith.mulf %87, %88 : vector<16x8xf32>
    %90 = vector.broadcast %14 : vector<1x8xf32> to vector<16x8xf32>
    %91 = arith.addf %89, %90 : vector<16x8xf32>
    %cst_31 = arith.constant 0.000000e+00 : f32
    %92 = vector.broadcast %cst_31 : f32 to vector<16x8xf32>
    %93 = arith.cmpf oge, %91, %92 : vector<16x8xf32>
    %cst_32 = arith.constant 2.000000e-01 : f32
    %94 = vector.broadcast %cst_32 : f32 to vector<16x8xf32>
    %95 = arith.mulf %94, %91 : vector<16x8xf32>
    %96 = arith.select %93, %91, %95 : vector<16x8xi1>, vector<16x8xf32>
    %97 = vector.broadcast %16 : vector<1x8xf32> to vector<16x8xf32>
    %98 = arith.mulf %96, %97 : vector<16x8xf32>
    %99 = arith.truncf %98 : vector<16x8xf32> to vector<16x8xbf16>
    %cst_33 = arith.constant dense<0.000000e+00> : vector<16x3xf32>
    %100 = tpu.matmul %99, %17, %cst_33 {dimension_numbers = #tpu.dot_dimension_numbers<[1], [0], [0], [1], [0, 0, 1, 1], [], []>} : vector<16x8xbf16>, vector<8x3xbf16>, vector<16x3xf32> -> vector<16x3xf32>
    %101 = vector.broadcast %18 : vector<1x3xf32> to vector<16x3xf32>
    %102 = arith.addf %100, %101 : vector<16x3xf32>
    %103 = vector.extract_strided_slice %96 {offsets = [0, 0], sizes = [4, 8], strides = [1, 1]} : vector<16x8xf32> to vector<4x8xf32>
    %104 = vector.extract_strided_slice %96 {offsets = [4, 0], sizes = [4, 8], strides = [1, 1]} : vector<16x8xf32> to vector<4x8xf32>
    %105 = vector.extract_strided_slice %96 {offsets = [8, 0], sizes = [4, 8], strides = [1, 1]} : vector<16x8xf32> to vector<4x8xf32>
    %106 = vector.extract_strided_slice %96 {offsets = [12, 0], sizes = [4, 8], strides = [1, 1]} : vector<16x8xf32> to vector<4x8xf32>
    %107 = vector.shape_cast %103 : vector<4x8xf32> to vector<1x4x8xf32>
    %108 = vector.shape_cast %104 : vector<4x8xf32> to vector<1x4x8xf32>
    %109 = vector.shape_cast %105 : vector<4x8xf32> to vector<1x4x8xf32>
    %110 = vector.shape_cast %106 : vector<4x8xf32> to vector<1x4x8xf32>
    %111 = tpu.concatenate %107, %108, %109, %110 in 0 : vector<1x4x8xf32>, vector<1x4x8xf32>, vector<1x4x8xf32>, vector<1x4x8xf32> -> vector<4x4x8xf32>
    %112 = vector.extract_strided_slice %102 {offsets = [0, 0], sizes = [4, 3], strides = [1, 1]} : vector<16x3xf32> to vector<4x3xf32>
    %113 = vector.extract_strided_slice %102 {offsets = [4, 0], sizes = [4, 3], strides = [1, 1]} : vector<16x3xf32> to vector<4x3xf32>
    %114 = vector.extract_strided_slice %102 {offsets = [8, 0], sizes = [4, 3], strides = [1, 1]} : vector<16x3xf32> to vector<4x3xf32>
    %115 = vector.extract_strided_slice %102 {offsets = [12, 0], sizes = [4, 3], strides = [1, 1]} : vector<16x3xf32> to vector<4x3xf32>
    %116 = vector.shape_cast %112 : vector<4x3xf32> to vector<1x4x3xf32>
    %117 = vector.shape_cast %113 : vector<4x3xf32> to vector<1x4x3xf32>
    %118 = vector.shape_cast %114 : vector<4x3xf32> to vector<1x4x3xf32>
    %119 = vector.shape_cast %115 : vector<4x3xf32> to vector<1x4x3xf32>
    %120 = tpu.concatenate %116, %117, %118, %119 in 0 : vector<1x4x3xf32>, vector<1x4x3xf32>, vector<1x4x3xf32>, vector<1x4x3xf32> -> vector<4x4x3xf32>
    %121 = tpu.concatenate %60, %111 in 2 : vector<4x4x8xf32>, vector<4x4x8xf32> -> vector<4x4x16xf32>
    %122 = tpu.concatenate %69, %120 in 2 : vector<4x4x3xf32>, vector<4x4x3xf32> -> vector<4x4x6xf32>
    %123 = vector.extract_strided_slice %11 {offsets = [1, 0, 0], sizes = [4, 4, 16], strides = [1, 1, 1]} : vector<6x6x16xf32> to vector<4x4x16xf32>
    %124 = vector.extract_strided_slice %11 {offsets = [1, 1, 0], sizes = [4, 4, 16], strides = [1, 1, 1]} : vector<6x6x16xf32> to vector<4x4x16xf32>
    %125 = vector.extract_strided_slice %11 {offsets = [2, 0, 0], sizes = [4, 4, 16], strides = [1, 1, 1]} : vector<6x6x16xf32> to vector<4x4x16xf32>
    %126 = vector.extract_strided_slice %11 {offsets = [2, 1, 0], sizes = [4, 4, 16], strides = [1, 1, 1]} : vector<6x6x16xf32> to vector<4x4x16xf32>
    %127 = tpu.concatenate %123, %124, %125, %126 in 2 : vector<4x4x16xf32>, vector<4x4x16xf32>, vector<4x4x16xf32>, vector<4x4x16xf32> -> vector<4x4x64xf32>
    %128 = vector.extract_strided_slice %127 {offsets = [0, 0, 0], sizes = [1, 4, 64], strides = [1, 1, 1]} : vector<4x4x64xf32> to vector<1x4x64xf32>
    %129 = vector.shape_cast %128 : vector<1x4x64xf32> to vector<4x64xf32>
    %130 = vector.extract_strided_slice %127 {offsets = [1, 0, 0], sizes = [1, 4, 64], strides = [1, 1, 1]} : vector<4x4x64xf32> to vector<1x4x64xf32>
    %131 = vector.shape_cast %130 : vector<1x4x64xf32> to vector<4x64xf32>
    %132 = vector.extract_strided_slice %127 {offsets = [2, 0, 0], sizes = [1, 4, 64], strides = [1, 1, 1]} : vector<4x4x64xf32> to vector<1x4x64xf32>
    %133 = vector.shape_cast %132 : vector<1x4x64xf32> to vector<4x64xf32>
    %134 = vector.extract_strided_slice %127 {offsets = [3, 0, 0], sizes = [1, 4, 64], strides = [1, 1, 1]} : vector<4x4x64xf32> to vector<1x4x64xf32>
    %135 = vector.shape_cast %134 : vector<1x4x64xf32> to vector<4x64xf32>
    %136 = tpu.concatenate %129, %131, %133, %135 in 0 : vector<4x64xf32>, vector<4x64xf32>, vector<4x64xf32>, vector<4x64xf32> -> vector<16x64xf32>
    %137 = arith.truncf %136 : vector<16x64xf32> to vector<16x64xbf16>
    %c1_34 = arith.constant 1 : index
    %c0_35 = arith.constant 0 : index
    %c0_36 = arith.constant 0 : index
    %c0_37 = arith.constant 0 : index
    %138 = vector.load %arg5[%c1_34, %c0_35, %c0_36, %c0_37] : memref<2x2x64x8xbf16, #tpu.memory_space<vmem>>, vector<1x1x64x8xbf16>
    %139 = vector.shape_cast %138 : vector<1x1x64x8xbf16> to vector<64x8xbf16>
    %cst_38 = arith.constant dense<0.000000e+00> : vector<16x8xf32>
    %140 = tpu.matmul %137, %139, %cst_38 {dimension_numbers = #tpu.dot_dimension_numbers<[1], [0], [0], [1], [0, 0, 1, 1], [], []>} : vector<16x64xbf16>, vector<64x8xbf16>, vector<16x8xf32> -> vector<16x8xf32>
    %141 = vector.broadcast %13 : vector<1x8xf32> to vector<16x8xf32>
    %142 = arith.mulf %140, %141 : vector<16x8xf32>
    %143 = vector.broadcast %14 : vector<1x8xf32> to vector<16x8xf32>
    %144 = arith.addf %142, %143 : vector<16x8xf32>
    %cst_39 = arith.constant 0.000000e+00 : f32
    %145 = vector.broadcast %cst_39 : f32 to vector<16x8xf32>
    %146 = arith.cmpf oge, %144, %145 : vector<16x8xf32>
    %cst_40 = arith.constant 2.000000e-01 : f32
    %147 = vector.broadcast %cst_40 : f32 to vector<16x8xf32>
    %148 = arith.mulf %147, %144 : vector<16x8xf32>
    %149 = arith.select %146, %144, %148 : vector<16x8xi1>, vector<16x8xf32>
    %150 = vector.broadcast %16 : vector<1x8xf32> to vector<16x8xf32>
    %151 = arith.mulf %149, %150 : vector<16x8xf32>
    %152 = arith.truncf %151 : vector<16x8xf32> to vector<16x8xbf16>
    %cst_41 = arith.constant dense<0.000000e+00> : vector<16x3xf32>
    %153 = tpu.matmul %152, %17, %cst_41 {dimension_numbers = #tpu.dot_dimension_numbers<[1], [0], [0], [1], [0, 0, 1, 1], [], []>} : vector<16x8xbf16>, vector<8x3xbf16>, vector<16x3xf32> -> vector<16x3xf32>
    %154 = vector.broadcast %18 : vector<1x3xf32> to vector<16x3xf32>
    %155 = arith.addf %153, %154 : vector<16x3xf32>
    %156 = vector.extract_strided_slice %149 {offsets = [0, 0], sizes = [4, 8], strides = [1, 1]} : vector<16x8xf32> to vector<4x8xf32>
    %157 = vector.extract_strided_slice %149 {offsets = [4, 0], sizes = [4, 8], strides = [1, 1]} : vector<16x8xf32> to vector<4x8xf32>
    %158 = vector.extract_strided_slice %149 {offsets = [8, 0], sizes = [4, 8], strides = [1, 1]} : vector<16x8xf32> to vector<4x8xf32>
    %159 = vector.extract_strided_slice %149 {offsets = [12, 0], sizes = [4, 8], strides = [1, 1]} : vector<16x8xf32> to vector<4x8xf32>
    %160 = vector.shape_cast %156 : vector<4x8xf32> to vector<1x4x8xf32>
    %161 = vector.shape_cast %157 : vector<4x8xf32> to vector<1x4x8xf32>
    %162 = vector.shape_cast %158 : vector<4x8xf32> to vector<1x4x8xf32>
    %163 = vector.shape_cast %159 : vector<4x8xf32> to vector<1x4x8xf32>
    %164 = tpu.concatenate %160, %161, %162, %163 in 0 : vector<1x4x8xf32>, vector<1x4x8xf32>, vector<1x4x8xf32>, vector<1x4x8xf32> -> vector<4x4x8xf32>
    %165 = vector.extract_strided_slice %155 {offsets = [0, 0], sizes = [4, 3], strides = [1, 1]} : vector<16x3xf32> to vector<4x3xf32>
    %166 = vector.extract_strided_slice %155 {offsets = [4, 0], sizes = [4, 3], strides = [1, 1]} : vector<16x3xf32> to vector<4x3xf32>
    %167 = vector.extract_strided_slice %155 {offsets = [8, 0], sizes = [4, 3], strides = [1, 1]} : vector<16x3xf32> to vector<4x3xf32>
    %168 = vector.extract_strided_slice %155 {offsets = [12, 0], sizes = [4, 3], strides = [1, 1]} : vector<16x3xf32> to vector<4x3xf32>
    %169 = vector.shape_cast %165 : vector<4x3xf32> to vector<1x4x3xf32>
    %170 = vector.shape_cast %166 : vector<4x3xf32> to vector<1x4x3xf32>
    %171 = vector.shape_cast %167 : vector<4x3xf32> to vector<1x4x3xf32>
    %172 = vector.shape_cast %168 : vector<4x3xf32> to vector<1x4x3xf32>
    %173 = tpu.concatenate %169, %170, %171, %172 in 0 : vector<1x4x3xf32>, vector<1x4x3xf32>, vector<1x4x3xf32>, vector<1x4x3xf32> -> vector<4x4x3xf32>
    %174 = vector.extract_strided_slice %11 {offsets = [1, 1, 0], sizes = [4, 4, 16], strides = [1, 1, 1]} : vector<6x6x16xf32> to vector<4x4x16xf32>
    %175 = vector.extract_strided_slice %11 {offsets = [1, 2, 0], sizes = [4, 4, 16], strides = [1, 1, 1]} : vector<6x6x16xf32> to vector<4x4x16xf32>
    %176 = vector.extract_strided_slice %11 {offsets = [2, 1, 0], sizes = [4, 4, 16], strides = [1, 1, 1]} : vector<6x6x16xf32> to vector<4x4x16xf32>
    %177 = vector.extract_strided_slice %11 {offsets = [2, 2, 0], sizes = [4, 4, 16], strides = [1, 1, 1]} : vector<6x6x16xf32> to vector<4x4x16xf32>
    %178 = tpu.concatenate %174, %175, %176, %177 in 2 : vector<4x4x16xf32>, vector<4x4x16xf32>, vector<4x4x16xf32>, vector<4x4x16xf32> -> vector<4x4x64xf32>
    %179 = vector.extract_strided_slice %178 {offsets = [0, 0, 0], sizes = [1, 4, 64], strides = [1, 1, 1]} : vector<4x4x64xf32> to vector<1x4x64xf32>
    %180 = vector.shape_cast %179 : vector<1x4x64xf32> to vector<4x64xf32>
    %181 = vector.extract_strided_slice %178 {offsets = [1, 0, 0], sizes = [1, 4, 64], strides = [1, 1, 1]} : vector<4x4x64xf32> to vector<1x4x64xf32>
    %182 = vector.shape_cast %181 : vector<1x4x64xf32> to vector<4x64xf32>
    %183 = vector.extract_strided_slice %178 {offsets = [2, 0, 0], sizes = [1, 4, 64], strides = [1, 1, 1]} : vector<4x4x64xf32> to vector<1x4x64xf32>
    %184 = vector.shape_cast %183 : vector<1x4x64xf32> to vector<4x64xf32>
    %185 = vector.extract_strided_slice %178 {offsets = [3, 0, 0], sizes = [1, 4, 64], strides = [1, 1, 1]} : vector<4x4x64xf32> to vector<1x4x64xf32>
    %186 = vector.shape_cast %185 : vector<1x4x64xf32> to vector<4x64xf32>
    %187 = tpu.concatenate %180, %182, %184, %186 in 0 : vector<4x64xf32>, vector<4x64xf32>, vector<4x64xf32>, vector<4x64xf32> -> vector<16x64xf32>
    %188 = arith.truncf %187 : vector<16x64xf32> to vector<16x64xbf16>
    %c1_42 = arith.constant 1 : index
    %c1_43 = arith.constant 1 : index
    %c0_44 = arith.constant 0 : index
    %c0_45 = arith.constant 0 : index
    %189 = vector.load %arg5[%c1_42, %c1_43, %c0_44, %c0_45] : memref<2x2x64x8xbf16, #tpu.memory_space<vmem>>, vector<1x1x64x8xbf16>
    %190 = vector.shape_cast %189 : vector<1x1x64x8xbf16> to vector<64x8xbf16>
    %cst_46 = arith.constant dense<0.000000e+00> : vector<16x8xf32>
    %191 = tpu.matmul %188, %190, %cst_46 {dimension_numbers = #tpu.dot_dimension_numbers<[1], [0], [0], [1], [0, 0, 1, 1], [], []>} : vector<16x64xbf16>, vector<64x8xbf16>, vector<16x8xf32> -> vector<16x8xf32>
    %192 = vector.broadcast %13 : vector<1x8xf32> to vector<16x8xf32>
    %193 = arith.mulf %191, %192 : vector<16x8xf32>
    %194 = vector.broadcast %14 : vector<1x8xf32> to vector<16x8xf32>
    %195 = arith.addf %193, %194 : vector<16x8xf32>
    %cst_47 = arith.constant 0.000000e+00 : f32
    %196 = vector.broadcast %cst_47 : f32 to vector<16x8xf32>
    %197 = arith.cmpf oge, %195, %196 : vector<16x8xf32>
    %cst_48 = arith.constant 2.000000e-01 : f32
    %198 = vector.broadcast %cst_48 : f32 to vector<16x8xf32>
    %199 = arith.mulf %198, %195 : vector<16x8xf32>
    %200 = arith.select %197, %195, %199 : vector<16x8xi1>, vector<16x8xf32>
    %201 = vector.broadcast %16 : vector<1x8xf32> to vector<16x8xf32>
    %202 = arith.mulf %200, %201 : vector<16x8xf32>
    %203 = arith.truncf %202 : vector<16x8xf32> to vector<16x8xbf16>
    %cst_49 = arith.constant dense<0.000000e+00> : vector<16x3xf32>
    %204 = tpu.matmul %203, %17, %cst_49 {dimension_numbers = #tpu.dot_dimension_numbers<[1], [0], [0], [1], [0, 0, 1, 1], [], []>} : vector<16x8xbf16>, vector<8x3xbf16>, vector<16x3xf32> -> vector<16x3xf32>
    %205 = vector.broadcast %18 : vector<1x3xf32> to vector<16x3xf32>
    %206 = arith.addf %204, %205 : vector<16x3xf32>
    %207 = vector.extract_strided_slice %200 {offsets = [0, 0], sizes = [4, 8], strides = [1, 1]} : vector<16x8xf32> to vector<4x8xf32>
    %208 = vector.extract_strided_slice %200 {offsets = [4, 0], sizes = [4, 8], strides = [1, 1]} : vector<16x8xf32> to vector<4x8xf32>
    %209 = vector.extract_strided_slice %200 {offsets = [8, 0], sizes = [4, 8], strides = [1, 1]} : vector<16x8xf32> to vector<4x8xf32>
    %210 = vector.extract_strided_slice %200 {offsets = [12, 0], sizes = [4, 8], strides = [1, 1]} : vector<16x8xf32> to vector<4x8xf32>
    %211 = vector.shape_cast %207 : vector<4x8xf32> to vector<1x4x8xf32>
    %212 = vector.shape_cast %208 : vector<4x8xf32> to vector<1x4x8xf32>
    %213 = vector.shape_cast %209 : vector<4x8xf32> to vector<1x4x8xf32>
    %214 = vector.shape_cast %210 : vector<4x8xf32> to vector<1x4x8xf32>
    %215 = tpu.concatenate %211, %212, %213, %214 in 0 : vector<1x4x8xf32>, vector<1x4x8xf32>, vector<1x4x8xf32>, vector<1x4x8xf32> -> vector<4x4x8xf32>
    %216 = vector.extract_strided_slice %206 {offsets = [0, 0], sizes = [4, 3], strides = [1, 1]} : vector<16x3xf32> to vector<4x3xf32>
    %217 = vector.extract_strided_slice %206 {offsets = [4, 0], sizes = [4, 3], strides = [1, 1]} : vector<16x3xf32> to vector<4x3xf32>
    %218 = vector.extract_strided_slice %206 {offsets = [8, 0], sizes = [4, 3], strides = [1, 1]} : vector<16x3xf32> to vector<4x3xf32>
    %219 = vector.extract_strided_slice %206 {offsets = [12, 0], sizes = [4, 3], strides = [1, 1]} : vector<16x3xf32> to vector<4x3xf32>
    %220 = vector.shape_cast %216 : vector<4x3xf32> to vector<1x4x3xf32>
    %221 = vector.shape_cast %217 : vector<4x3xf32> to vector<1x4x3xf32>
    %222 = vector.shape_cast %218 : vector<4x3xf32> to vector<1x4x3xf32>
    %223 = vector.shape_cast %219 : vector<4x3xf32> to vector<1x4x3xf32>
    %224 = tpu.concatenate %220, %221, %222, %223 in 0 : vector<1x4x3xf32>, vector<1x4x3xf32>, vector<1x4x3xf32>, vector<1x4x3xf32> -> vector<4x4x3xf32>
    %225 = tpu.concatenate %164, %215 in 2 : vector<4x4x8xf32>, vector<4x4x8xf32> -> vector<4x4x16xf32>
    %226 = tpu.concatenate %173, %224 in 2 : vector<4x4x3xf32>, vector<4x4x3xf32> -> vector<4x4x6xf32>
    %227 = vector.shape_cast %121 : vector<4x4x16xf32> to vector<4x1x4x16xf32>
    %228 = vector.shape_cast %225 : vector<4x4x16xf32> to vector<4x1x4x16xf32>
    %229 = tpu.concatenate %227, %228 in 1 : vector<4x1x4x16xf32>, vector<4x1x4x16xf32> -> vector<4x2x4x16xf32>
    %230 = arith.truncf %229 : vector<4x2x4x16xf32> to vector<4x2x4x16xbf16>
    %c0_50 = arith.constant 0 : index
    %c0_51 = arith.constant 0 : index
    %c0_52 = arith.constant 0 : index
    %c0_53 = arith.constant 0 : index
    %c0_54 = arith.constant 0 : index
    %231 = vector.load %arg9[%c0_50, %c0_51, %c0_52, %c0_53, %c0_54] : memref<1x4x2x4x16xbf16, #tpu.memory_space<vmem>>, vector<1x4x2x4x16xbf16>
    %232 = vector.shape_cast %231 : vector<1x4x2x4x16xbf16> to vector<4x2x4x16xbf16>
    %233 = vector.shape_cast %230 : vector<4x2x4x16xbf16> to vector<1x4x2x4x16xbf16>
    tpu.vector_store %arg9[%c0_50, %c0_51, %c0_52, %c0_53, %c0_54], %233 {strides = array<i32>} : memref<1x4x2x4x16xbf16, #tpu.memory_space<vmem>>, vector<1x4x2x4x16xbf16>,
    %234 = vector.shape_cast %122 : vector<4x4x6xf32> to vector<4x1x4x6xf32>
    %235 = vector.shape_cast %226 : vector<4x4x6xf32> to vector<4x1x4x6xf32>
    %236 = tpu.concatenate %234, %235 in 1 : vector<4x1x4x6xf32>, vector<4x1x4x6xf32> -> vector<4x2x4x6xf32>
    %c0_55 = arith.constant 0 : index
    %c0_56 = arith.constant 0 : index
    %c0_57 = arith.constant 0 : index
    %c0_58 = arith.constant 0 : index
    %c0_59 = arith.constant 0 : index
    %237 = vector.load %arg10[%c0_55, %c0_56, %c0_57, %c0_58, %c0_59] : memref<1x4x2x4x6xf32, #tpu.memory_space<vmem>>, vector<1x4x2x4x6xf32>
    %238 = vector.shape_cast %237 : vector<1x4x2x4x6xf32> to vector<4x2x4x6xf32>
    %239 = vector.shape_cast %236 : vector<4x2x4x6xf32> to vector<1x4x2x4x6xf32>
    tpu.vector_store %arg10[%c0_55, %c0_56, %c0_57, %c0_58, %c0_59], %239 {strides = array<i32>} : memref<1x4x2x4x6xf32, #tpu.memory_space<vmem>>, vector<1x4x2x4x6xf32>,
    return
  }
  func.func @transform_0(%arg0: i32) -> (i32, i32, i32, i32) {
    %c0_i32 = arith.constant 0 : i32
    %c0_i32_0 = arith.constant 0 : i32
    %c0_i32_1 = arith.constant 0 : i32
    %c0_i32_2 = arith.constant 0 : i32
    return %arg0, %c0_i32, %c0_i32_0, %c0_i32_1 : i32, i32, i32, i32
  }
  func.func @transform_1(%arg0: i32) -> (i32, i32, i32) {
    %c0_i32 = arith.constant 0 : i32
    %c0_i32_0 = arith.constant 0 : i32
    %c0_i32_1 = arith.constant 0 : i32
    return %arg0, %c0_i32, %c0_i32_0 : i32, i32, i32
  }
  func.func @transform_2(%arg0: i32) -> (i32, i32, i32) {
    %c0_i32 = arith.constant 0 : i32
    %c0_i32_0 = arith.constant 0 : i32
    %c0_i32_1 = arith.constant 0 : i32
    return %arg0, %c0_i32, %c0_i32_0 : i32, i32, i32
  }
  func.func @transform_3(%arg0: i32) -> (i32, i32, i32) {
    %c0_i32 = arith.constant 0 : i32
    %c0_i32_0 = arith.constant 0 : i32
    %c0_i32_1 = arith.constant 0 : i32
    return %arg0, %c0_i32, %c0_i32_0 : i32, i32, i32
  }
  func.func @transform_4(%arg0: i32) -> (i32, i32, i32, i32) {
    %c0_i32 = arith.constant 0 : i32
    %c0_i32_0 = arith.constant 0 : i32
    %c0_i32_1 = arith.constant 0 : i32
    %c0_i32_2 = arith.constant 0 : i32
    %c0_i32_3 = arith.constant 0 : i32
    return %c0_i32, %c0_i32_0, %c0_i32_1, %c0_i32_2 : i32, i32, i32, i32
  }
  func.func @transform_5(%arg0: i32) -> (i32, i32) {
    %c0_i32 = arith.constant 0 : i32
    %c0_i32_0 = arith.constant 0 : i32
    %c0_i32_1 = arith.constant 0 : i32
    return %c0_i32, %c0_i32_0 : i32, i32
  }
  func.func @transform_6(%arg0: i32) -> (i32, i32) {
    %c0_i32 = arith.constant 0 : i32
    %c0_i32_0 = arith.constant 0 : i32
    %c0_i32_1 = arith.constant 0 : i32
    return %c0_i32, %c0_i32_0 : i32, i32
  }
  func.func @transform_7(%arg0: i32) -> (i32, i32) {
    %c0_i32 = arith.constant 0 : i32
    %c0_i32_0 = arith.constant 0 : i32
    %c0_i32_1 = arith.constant 0 : i32
    return %c0_i32, %c0_i32_0 : i32, i32
  }
  func.func @transform_8(%arg0: i32) -> (i32, i32, i32, i32, i32) {
    %c0_i32 = arith.constant 0 : i32
    %c0_i32_0 = arith.constant 0 : i32
    %c0_i32_1 = arith.constant 0 : i32
    %c0_i32_2 = arith.constant 0 : i32
    %c0_i32_3 = arith.constant 0 : i32
    return %arg0, %c0_i32, %c0_i32_0, %c0_i32_1, %c0_i32_2 : i32, i32, i32, i32, i32
  }
  func.func @transform_9(%arg0: i32) -> (i32, i32, i32, i32, i32) {
    %c0_i32 = arith.constant 0 : i32
    %c0_i32_0 = arith.constant 0 : i32
    %c0_i32_1 = arith.constant 0 : i32
    %c0_i32_2 = arith.constant 0 : i32
    %c0_i32_3 = arith.constant 0 : i32
    return %arg0, %c0_i32, %c0_i32_0, %c0_i32_1, %c0_i32_2 : i32, i32, i32, i32, i32
  }
}

module attributes {stable_mosaic.version = 11 : i64} {
  func.func @_block_kernel(%arg0: i32, %arg1: memref<1x8x8x8xbf16, #tpu.memory_space<vmem>>, %arg2: memref<1x1x8xf32, #tpu.memory_space<vmem>>, %arg3: memref<1x1x3xf32, #tpu.memory_space<vmem>>, %arg4: memref<1x1x3xf32, #tpu.memory_space<vmem>>, %arg5: memref<2x2x32x3xbf16, #tpu.memory_space<vmem>>, %arg6: memref<1x3xf32, #tpu.memory_space<vmem>>, %arg7: memref<3x3xbf16, #tpu.memory_space<vmem>>, %arg8: memref<1x3xf32, #tpu.memory_space<vmem>>, %arg9: memref<1x8x8x3xf32, #tpu.memory_space<vmem>>, %arg10: memref<1x8x2x8x6xbf16, #tpu.memory_space<vmem>>, %arg11: memref<1x8x2x8x6xf32, #tpu.memory_space<vmem>>) attributes {dimension_semantics = [#tpu.dimension_semantics<parallel>], iteration_bounds = array<i64: 2>, scalar_prefetch = 0 : i64, scratch_operands = 0 : i64, tpu.core_type = #tpu.core_type<tc>, window_params = [{transform_indices = @transform_0, window_bounds = array<i64: 1, 8, 8, 8>}, {transform_indices = @transform_1, window_bounds = array<i64: 1, 1, 8>}, {transform_indices = @transform_2, window_bounds = array<i64: 1, 1, 3>}, {transform_indices = @transform_3, window_bounds = array<i64: 1, 1, 3>}, {pipeline_mode = #tpu.pipeline_mode<synchronous>, transform_indices = @transform_4, window_bounds = array<i64: 2, 2, 32, 3>}, {pipeline_mode = #tpu.pipeline_mode<synchronous>, transform_indices = @transform_5, window_bounds = array<i64: 1, 3>}, {pipeline_mode = #tpu.pipeline_mode<synchronous>, transform_indices = @transform_6, window_bounds = array<i64: 3, 3>}, {pipeline_mode = #tpu.pipeline_mode<synchronous>, transform_indices = @transform_7, window_bounds = array<i64: 1, 3>}, {transform_indices = @transform_8, window_bounds = array<i64: 1, 8, 8, 3>}, {transform_indices = @transform_9, window_bounds = array<i64: 1, 8, 2, 8, 6>}, {transform_indices = @transform_10, window_bounds = array<i64: 1, 8, 2, 8, 6>}]} {
    %c0 = arith.constant 0 : index
    %c0_0 = arith.constant 0 : index
    %c0_1 = arith.constant 0 : index
    %c0_2 = arith.constant 0 : index
    %0 = vector.load %arg1[%c0, %c0_0, %c0_1, %c0_2] : memref<1x8x8x8xbf16, #tpu.memory_space<vmem>>, vector<1x8x8x8xbf16>
    %1 = vector.shape_cast %0 : vector<1x8x8x8xbf16> to vector<8x8x8xbf16>
    %2 = arith.extf %1 : vector<8x8x8xbf16> to vector<8x8x8xf32>
    %c0_3 = arith.constant 0 : index
    %c0_4 = arith.constant 0 : index
    %c0_5 = arith.constant 0 : index
    %3 = vector.load %arg2[%c0_3, %c0_4, %c0_5] : memref<1x1x8xf32, #tpu.memory_space<vmem>>, vector<1x1x8xf32>
    %4 = vector.shape_cast %3 : vector<1x1x8xf32> to vector<1x8xf32>
    %5 = vector.shape_cast %4 : vector<1x8xf32> to vector<1x1x8xf32>
    %6 = vector.broadcast %5 : vector<1x1x8xf32> to vector<8x8x8xf32>
    %7 = arith.mulf %2, %6 : vector<8x8x8xf32>
    %cst = arith.constant 0.000000e+00 : f32
    %8 = vector.broadcast %cst : f32 to vector<8x1x8xf32>
    %9 = tpu.concatenate %8, %7, %8 in 1 : vector<8x1x8xf32>, vector<8x8x8xf32>, vector<8x1x8xf32> -> vector<8x10x8xf32>
    %cst_6 = arith.constant 0.000000e+00 : f32
    %10 = vector.broadcast %cst_6 : f32 to vector<1x10x8xf32>
    %11 = tpu.concatenate %10, %9, %10 in 0 : vector<1x10x8xf32>, vector<8x10x8xf32>, vector<1x10x8xf32> -> vector<10x10x8xf32>
    %c0_7 = arith.constant 0 : index
    %c0_8 = arith.constant 0 : index
    %c0_9 = arith.constant 0 : index
    %12 = vector.load %arg3[%c0_7, %c0_8, %c0_9] : memref<1x1x3xf32, #tpu.memory_space<vmem>>, vector<1x1x3xf32>
    %13 = vector.shape_cast %12 : vector<1x1x3xf32> to vector<1x3xf32>
    %c0_10 = arith.constant 0 : index
    %c0_11 = arith.constant 0 : index
    %14 = vector.load %arg6[%c0_10, %c0_11] : memref<1x3xf32, #tpu.memory_space<vmem>>, vector<1x3xf32>
    %c0_12 = arith.constant 0 : index
    %c0_13 = arith.constant 0 : index
    %c0_14 = arith.constant 0 : index
    %15 = vector.load %arg4[%c0_12, %c0_13, %c0_14] : memref<1x1x3xf32, #tpu.memory_space<vmem>>, vector<1x1x3xf32>
    %16 = vector.shape_cast %15 : vector<1x1x3xf32> to vector<1x3xf32>
    %c0_15 = arith.constant 0 : index
    %c0_16 = arith.constant 0 : index
    %17 = vector.load %arg7[%c0_15, %c0_16] : memref<3x3xbf16, #tpu.memory_space<vmem>>, vector<3x3xbf16>
    %c0_17 = arith.constant 0 : index
    %c0_18 = arith.constant 0 : index
    %18 = vector.load %arg8[%c0_17, %c0_18] : memref<1x3xf32, #tpu.memory_space<vmem>>, vector<1x3xf32>
    %c0_19 = arith.constant 0 : index
    %c0_20 = arith.constant 0 : index
    %c0_21 = arith.constant 0 : index
    %c0_22 = arith.constant 0 : index
    %19 = vector.load %arg9[%c0_19, %c0_20, %c0_21, %c0_22] : memref<1x8x8x3xf32, #tpu.memory_space<vmem>>, vector<1x8x8x3xf32>
    %20 = vector.shape_cast %19 : vector<1x8x8x3xf32> to vector<8x8x3xf32>
    %21 = vector.extract_strided_slice %11 {offsets = [0, 0, 0], sizes = [8, 8, 8], strides = [1, 1, 1]} : vector<10x10x8xf32> to vector<8x8x8xf32>
    %22 = vector.extract_strided_slice %11 {offsets = [0, 1, 0], sizes = [8, 8, 8], strides = [1, 1, 1]} : vector<10x10x8xf32> to vector<8x8x8xf32>
    %23 = vector.extract_strided_slice %11 {offsets = [1, 0, 0], sizes = [8, 8, 8], strides = [1, 1, 1]} : vector<10x10x8xf32> to vector<8x8x8xf32>
    %24 = vector.extract_strided_slice %11 {offsets = [1, 1, 0], sizes = [8, 8, 8], strides = [1, 1, 1]} : vector<10x10x8xf32> to vector<8x8x8xf32>
    %25 = tpu.concatenate %21, %22, %23, %24 in 2 : vector<8x8x8xf32>, vector<8x8x8xf32>, vector<8x8x8xf32>, vector<8x8x8xf32> -> vector<8x8x32xf32>
    %26 = vector.shape_cast %25 : vector<8x8x32xf32> to vector<64x32xf32>
    %27 = arith.truncf %26 : vector<64x32xf32> to vector<64x32xbf16>
    %c0_23 = arith.constant 0 : index
    %c0_24 = arith.constant 0 : index
    %c0_25 = arith.constant 0 : index
    %c0_26 = arith.constant 0 : index
    %28 = vector.load %arg5[%c0_23, %c0_24, %c0_25, %c0_26] : memref<2x2x32x3xbf16, #tpu.memory_space<vmem>>, vector<1x1x32x3xbf16>
    %29 = vector.shape_cast %28 : vector<1x1x32x3xbf16> to vector<32x3xbf16>
    %cst_27 = arith.constant dense<0.000000e+00> : vector<64x3xf32>
    %30 = tpu.matmul %27, %29, %cst_27 {dimension_numbers = #tpu.dot_dimension_numbers<[1], [0], [0], [1], [0, 0, 1, 1], [], []>} : vector<64x32xbf16>, vector<32x3xbf16>, vector<64x3xf32> -> vector<64x3xf32>
    %31 = vector.broadcast %13 : vector<1x3xf32> to vector<64x3xf32>
    %32 = arith.mulf %30, %31 : vector<64x3xf32>
    %33 = vector.broadcast %14 : vector<1x3xf32> to vector<64x3xf32>
    %34 = arith.addf %32, %33 : vector<64x3xf32>
    %cst_28 = arith.constant 0.000000e+00 : f32
    %35 = vector.broadcast %cst_28 : f32 to vector<64x3xf32>
    %36 = arith.cmpf oge, %34, %35 : vector<64x3xf32>
    %cst_29 = arith.constant 2.000000e-01 : f32
    %37 = vector.broadcast %cst_29 : f32 to vector<64x3xf32>
    %38 = arith.mulf %37, %34 : vector<64x3xf32>
    %39 = arith.select %36, %34, %38 : vector<64x3xi1>, vector<64x3xf32>
    %40 = vector.broadcast %16 : vector<1x3xf32> to vector<64x3xf32>
    %41 = arith.mulf %39, %40 : vector<64x3xf32>
    %42 = arith.truncf %41 : vector<64x3xf32> to vector<64x3xbf16>
    %cst_30 = arith.constant dense<0.000000e+00> : vector<64x3xf32>
    %43 = tpu.matmul %42, %17, %cst_30 {dimension_numbers = #tpu.dot_dimension_numbers<[1], [0], [0], [1], [0, 0, 1, 1], [], []>} : vector<64x3xbf16>, vector<3x3xbf16>, vector<64x3xf32> -> vector<64x3xf32>
    %44 = vector.broadcast %18 : vector<1x3xf32> to vector<64x3xf32>
    %45 = arith.addf %43, %44 : vector<64x3xf32>
    %46 = vector.shape_cast %39 : vector<64x3xf32> to vector<8x8x3xf32>
    %47 = vector.shape_cast %45 : vector<64x3xf32> to vector<8x8x3xf32>
    %48 = arith.addf %47, %20 : vector<8x8x3xf32>
    %49 = vector.extract_strided_slice %11 {offsets = [0, 1, 0], sizes = [8, 8, 8], strides = [1, 1, 1]} : vector<10x10x8xf32> to vector<8x8x8xf32>
    %50 = vector.extract_strided_slice %11 {offsets = [0, 2, 0], sizes = [8, 8, 8], strides = [1, 1, 1]} : vector<10x10x8xf32> to vector<8x8x8xf32>
    %51 = vector.extract_strided_slice %11 {offsets = [1, 1, 0], sizes = [8, 8, 8], strides = [1, 1, 1]} : vector<10x10x8xf32> to vector<8x8x8xf32>
    %52 = vector.extract_strided_slice %11 {offsets = [1, 2, 0], sizes = [8, 8, 8], strides = [1, 1, 1]} : vector<10x10x8xf32> to vector<8x8x8xf32>
    %53 = tpu.concatenate %49, %50, %51, %52 in 2 : vector<8x8x8xf32>, vector<8x8x8xf32>, vector<8x8x8xf32>, vector<8x8x8xf32> -> vector<8x8x32xf32>
    %54 = vector.shape_cast %53 : vector<8x8x32xf32> to vector<64x32xf32>
    %55 = arith.truncf %54 : vector<64x32xf32> to vector<64x32xbf16>
    %c0_31 = arith.constant 0 : index
    %c1 = arith.constant 1 : index
    %c0_32 = arith.constant 0 : index
    %c0_33 = arith.constant 0 : index
    %56 = vector.load %arg5[%c0_31, %c1, %c0_32, %c0_33] : memref<2x2x32x3xbf16, #tpu.memory_space<vmem>>, vector<1x1x32x3xbf16>
    %57 = vector.shape_cast %56 : vector<1x1x32x3xbf16> to vector<32x3xbf16>
    %cst_34 = arith.constant dense<0.000000e+00> : vector<64x3xf32>
    %58 = tpu.matmul %55, %57, %cst_34 {dimension_numbers = #tpu.dot_dimension_numbers<[1], [0], [0], [1], [0, 0, 1, 1], [], []>} : vector<64x32xbf16>, vector<32x3xbf16>, vector<64x3xf32> -> vector<64x3xf32>
    %59 = vector.broadcast %13 : vector<1x3xf32> to vector<64x3xf32>
    %60 = arith.mulf %58, %59 : vector<64x3xf32>
    %61 = vector.broadcast %14 : vector<1x3xf32> to vector<64x3xf32>
    %62 = arith.addf %60, %61 : vector<64x3xf32>
    %cst_35 = arith.constant 0.000000e+00 : f32
    %63 = vector.broadcast %cst_35 : f32 to vector<64x3xf32>
    %64 = arith.cmpf oge, %62, %63 : vector<64x3xf32>
    %cst_36 = arith.constant 2.000000e-01 : f32
    %65 = vector.broadcast %cst_36 : f32 to vector<64x3xf32>
    %66 = arith.mulf %65, %62 : vector<64x3xf32>
    %67 = arith.select %64, %62, %66 : vector<64x3xi1>, vector<64x3xf32>
    %68 = vector.broadcast %16 : vector<1x3xf32> to vector<64x3xf32>
    %69 = arith.mulf %67, %68 : vector<64x3xf32>
    %70 = arith.truncf %69 : vector<64x3xf32> to vector<64x3xbf16>
    %cst_37 = arith.constant dense<0.000000e+00> : vector<64x3xf32>
    %71 = tpu.matmul %70, %17, %cst_37 {dimension_numbers = #tpu.dot_dimension_numbers<[1], [0], [0], [1], [0, 0, 1, 1], [], []>} : vector<64x3xbf16>, vector<3x3xbf16>, vector<64x3xf32> -> vector<64x3xf32>
    %72 = vector.broadcast %18 : vector<1x3xf32> to vector<64x3xf32>
    %73 = arith.addf %71, %72 : vector<64x3xf32>
    %74 = vector.shape_cast %67 : vector<64x3xf32> to vector<8x8x3xf32>
    %75 = vector.shape_cast %73 : vector<64x3xf32> to vector<8x8x3xf32>
    %76 = arith.addf %75, %20 : vector<8x8x3xf32>
    %77 = tpu.concatenate %46, %74 in 2 : vector<8x8x3xf32>, vector<8x8x3xf32> -> vector<8x8x6xf32>
    %78 = tpu.concatenate %48, %76 in 2 : vector<8x8x3xf32>, vector<8x8x3xf32> -> vector<8x8x6xf32>
    %79 = vector.extract_strided_slice %11 {offsets = [1, 0, 0], sizes = [8, 8, 8], strides = [1, 1, 1]} : vector<10x10x8xf32> to vector<8x8x8xf32>
    %80 = vector.extract_strided_slice %11 {offsets = [1, 1, 0], sizes = [8, 8, 8], strides = [1, 1, 1]} : vector<10x10x8xf32> to vector<8x8x8xf32>
    %81 = vector.extract_strided_slice %11 {offsets = [2, 0, 0], sizes = [8, 8, 8], strides = [1, 1, 1]} : vector<10x10x8xf32> to vector<8x8x8xf32>
    %82 = vector.extract_strided_slice %11 {offsets = [2, 1, 0], sizes = [8, 8, 8], strides = [1, 1, 1]} : vector<10x10x8xf32> to vector<8x8x8xf32>
    %83 = tpu.concatenate %79, %80, %81, %82 in 2 : vector<8x8x8xf32>, vector<8x8x8xf32>, vector<8x8x8xf32>, vector<8x8x8xf32> -> vector<8x8x32xf32>
    %84 = vector.shape_cast %83 : vector<8x8x32xf32> to vector<64x32xf32>
    %85 = arith.truncf %84 : vector<64x32xf32> to vector<64x32xbf16>
    %c1_38 = arith.constant 1 : index
    %c0_39 = arith.constant 0 : index
    %c0_40 = arith.constant 0 : index
    %c0_41 = arith.constant 0 : index
    %86 = vector.load %arg5[%c1_38, %c0_39, %c0_40, %c0_41] : memref<2x2x32x3xbf16, #tpu.memory_space<vmem>>, vector<1x1x32x3xbf16>
    %87 = vector.shape_cast %86 : vector<1x1x32x3xbf16> to vector<32x3xbf16>
    %cst_42 = arith.constant dense<0.000000e+00> : vector<64x3xf32>
    %88 = tpu.matmul %85, %87, %cst_42 {dimension_numbers = #tpu.dot_dimension_numbers<[1], [0], [0], [1], [0, 0, 1, 1], [], []>} : vector<64x32xbf16>, vector<32x3xbf16>, vector<64x3xf32> -> vector<64x3xf32>
    %89 = vector.broadcast %13 : vector<1x3xf32> to vector<64x3xf32>
    %90 = arith.mulf %88, %89 : vector<64x3xf32>
    %91 = vector.broadcast %14 : vector<1x3xf32> to vector<64x3xf32>
    %92 = arith.addf %90, %91 : vector<64x3xf32>
    %cst_43 = arith.constant 0.000000e+00 : f32
    %93 = vector.broadcast %cst_43 : f32 to vector<64x3xf32>
    %94 = arith.cmpf oge, %92, %93 : vector<64x3xf32>
    %cst_44 = arith.constant 2.000000e-01 : f32
    %95 = vector.broadcast %cst_44 : f32 to vector<64x3xf32>
    %96 = arith.mulf %95, %92 : vector<64x3xf32>
    %97 = arith.select %94, %92, %96 : vector<64x3xi1>, vector<64x3xf32>
    %98 = vector.broadcast %16 : vector<1x3xf32> to vector<64x3xf32>
    %99 = arith.mulf %97, %98 : vector<64x3xf32>
    %100 = arith.truncf %99 : vector<64x3xf32> to vector<64x3xbf16>
    %cst_45 = arith.constant dense<0.000000e+00> : vector<64x3xf32>
    %101 = tpu.matmul %100, %17, %cst_45 {dimension_numbers = #tpu.dot_dimension_numbers<[1], [0], [0], [1], [0, 0, 1, 1], [], []>} : vector<64x3xbf16>, vector<3x3xbf16>, vector<64x3xf32> -> vector<64x3xf32>
    %102 = vector.broadcast %18 : vector<1x3xf32> to vector<64x3xf32>
    %103 = arith.addf %101, %102 : vector<64x3xf32>
    %104 = vector.shape_cast %97 : vector<64x3xf32> to vector<8x8x3xf32>
    %105 = vector.shape_cast %103 : vector<64x3xf32> to vector<8x8x3xf32>
    %106 = arith.addf %105, %20 : vector<8x8x3xf32>
    %107 = vector.extract_strided_slice %11 {offsets = [1, 1, 0], sizes = [8, 8, 8], strides = [1, 1, 1]} : vector<10x10x8xf32> to vector<8x8x8xf32>
    %108 = vector.extract_strided_slice %11 {offsets = [1, 2, 0], sizes = [8, 8, 8], strides = [1, 1, 1]} : vector<10x10x8xf32> to vector<8x8x8xf32>
    %109 = vector.extract_strided_slice %11 {offsets = [2, 1, 0], sizes = [8, 8, 8], strides = [1, 1, 1]} : vector<10x10x8xf32> to vector<8x8x8xf32>
    %110 = vector.extract_strided_slice %11 {offsets = [2, 2, 0], sizes = [8, 8, 8], strides = [1, 1, 1]} : vector<10x10x8xf32> to vector<8x8x8xf32>
    %111 = tpu.concatenate %107, %108, %109, %110 in 2 : vector<8x8x8xf32>, vector<8x8x8xf32>, vector<8x8x8xf32>, vector<8x8x8xf32> -> vector<8x8x32xf32>
    %112 = vector.shape_cast %111 : vector<8x8x32xf32> to vector<64x32xf32>
    %113 = arith.truncf %112 : vector<64x32xf32> to vector<64x32xbf16>
    %c1_46 = arith.constant 1 : index
    %c1_47 = arith.constant 1 : index
    %c0_48 = arith.constant 0 : index
    %c0_49 = arith.constant 0 : index
    %114 = vector.load %arg5[%c1_46, %c1_47, %c0_48, %c0_49] : memref<2x2x32x3xbf16, #tpu.memory_space<vmem>>, vector<1x1x32x3xbf16>
    %115 = vector.shape_cast %114 : vector<1x1x32x3xbf16> to vector<32x3xbf16>
    %cst_50 = arith.constant dense<0.000000e+00> : vector<64x3xf32>
    %116 = tpu.matmul %113, %115, %cst_50 {dimension_numbers = #tpu.dot_dimension_numbers<[1], [0], [0], [1], [0, 0, 1, 1], [], []>} : vector<64x32xbf16>, vector<32x3xbf16>, vector<64x3xf32> -> vector<64x3xf32>
    %117 = vector.broadcast %13 : vector<1x3xf32> to vector<64x3xf32>
    %118 = arith.mulf %116, %117 : vector<64x3xf32>
    %119 = vector.broadcast %14 : vector<1x3xf32> to vector<64x3xf32>
    %120 = arith.addf %118, %119 : vector<64x3xf32>
    %cst_51 = arith.constant 0.000000e+00 : f32
    %121 = vector.broadcast %cst_51 : f32 to vector<64x3xf32>
    %122 = arith.cmpf oge, %120, %121 : vector<64x3xf32>
    %cst_52 = arith.constant 2.000000e-01 : f32
    %123 = vector.broadcast %cst_52 : f32 to vector<64x3xf32>
    %124 = arith.mulf %123, %120 : vector<64x3xf32>
    %125 = arith.select %122, %120, %124 : vector<64x3xi1>, vector<64x3xf32>
    %126 = vector.broadcast %16 : vector<1x3xf32> to vector<64x3xf32>
    %127 = arith.mulf %125, %126 : vector<64x3xf32>
    %128 = arith.truncf %127 : vector<64x3xf32> to vector<64x3xbf16>
    %cst_53 = arith.constant dense<0.000000e+00> : vector<64x3xf32>
    %129 = tpu.matmul %128, %17, %cst_53 {dimension_numbers = #tpu.dot_dimension_numbers<[1], [0], [0], [1], [0, 0, 1, 1], [], []>} : vector<64x3xbf16>, vector<3x3xbf16>, vector<64x3xf32> -> vector<64x3xf32>
    %130 = vector.broadcast %18 : vector<1x3xf32> to vector<64x3xf32>
    %131 = arith.addf %129, %130 : vector<64x3xf32>
    %132 = vector.shape_cast %125 : vector<64x3xf32> to vector<8x8x3xf32>
    %133 = vector.shape_cast %131 : vector<64x3xf32> to vector<8x8x3xf32>
    %134 = arith.addf %133, %20 : vector<8x8x3xf32>
    %135 = tpu.concatenate %104, %132 in 2 : vector<8x8x3xf32>, vector<8x8x3xf32> -> vector<8x8x6xf32>
    %136 = tpu.concatenate %106, %134 in 2 : vector<8x8x3xf32>, vector<8x8x3xf32> -> vector<8x8x6xf32>
    %137 = vector.shape_cast %77 : vector<8x8x6xf32> to vector<8x1x8x6xf32>
    %138 = vector.shape_cast %135 : vector<8x8x6xf32> to vector<8x1x8x6xf32>
    %139 = tpu.concatenate %137, %138 in 1 : vector<8x1x8x6xf32>, vector<8x1x8x6xf32> -> vector<8x2x8x6xf32>
    %140 = arith.truncf %139 : vector<8x2x8x6xf32> to vector<8x2x8x6xbf16>
    %c0_54 = arith.constant 0 : index
    %c0_55 = arith.constant 0 : index
    %c0_56 = arith.constant 0 : index
    %c0_57 = arith.constant 0 : index
    %c0_58 = arith.constant 0 : index
    %141 = vector.load %arg10[%c0_54, %c0_55, %c0_56, %c0_57, %c0_58] : memref<1x8x2x8x6xbf16, #tpu.memory_space<vmem>>, vector<1x8x2x8x6xbf16>
    %142 = vector.shape_cast %141 : vector<1x8x2x8x6xbf16> to vector<8x2x8x6xbf16>
    %143 = vector.shape_cast %140 : vector<8x2x8x6xbf16> to vector<1x8x2x8x6xbf16>
    tpu.vector_store %arg10[%c0_54, %c0_55, %c0_56, %c0_57, %c0_58], %143 {strides = array<i32>} : memref<1x8x2x8x6xbf16, #tpu.memory_space<vmem>>, vector<1x8x2x8x6xbf16>,
    %144 = vector.shape_cast %78 : vector<8x8x6xf32> to vector<8x1x8x6xf32>
    %145 = vector.shape_cast %136 : vector<8x8x6xf32> to vector<8x1x8x6xf32>
    %146 = tpu.concatenate %144, %145 in 1 : vector<8x1x8x6xf32>, vector<8x1x8x6xf32> -> vector<8x2x8x6xf32>
    %c0_59 = arith.constant 0 : index
    %c0_60 = arith.constant 0 : index
    %c0_61 = arith.constant 0 : index
    %c0_62 = arith.constant 0 : index
    %c0_63 = arith.constant 0 : index
    %147 = vector.load %arg11[%c0_59, %c0_60, %c0_61, %c0_62, %c0_63] : memref<1x8x2x8x6xf32, #tpu.memory_space<vmem>>, vector<1x8x2x8x6xf32>
    %148 = vector.shape_cast %147 : vector<1x8x2x8x6xf32> to vector<8x2x8x6xf32>
    %149 = vector.shape_cast %146 : vector<8x2x8x6xf32> to vector<1x8x2x8x6xf32>
    tpu.vector_store %arg11[%c0_59, %c0_60, %c0_61, %c0_62, %c0_63], %149 {strides = array<i32>} : memref<1x8x2x8x6xf32, #tpu.memory_space<vmem>>, vector<1x8x2x8x6xf32>,
    return
  }
  func.func @transform_0(%arg0: i32) -> (i32, i32, i32, i32) {
    %c0_i32 = arith.constant 0 : i32
    %c0_i32_0 = arith.constant 0 : i32
    %c0_i32_1 = arith.constant 0 : i32
    %c0_i32_2 = arith.constant 0 : i32
    return %arg0, %c0_i32, %c0_i32_0, %c0_i32_1 : i32, i32, i32, i32
  }
  func.func @transform_1(%arg0: i32) -> (i32, i32, i32) {
    %c0_i32 = arith.constant 0 : i32
    %c0_i32_0 = arith.constant 0 : i32
    %c0_i32_1 = arith.constant 0 : i32
    return %arg0, %c0_i32, %c0_i32_0 : i32, i32, i32
  }
  func.func @transform_2(%arg0: i32) -> (i32, i32, i32) {
    %c0_i32 = arith.constant 0 : i32
    %c0_i32_0 = arith.constant 0 : i32
    %c0_i32_1 = arith.constant 0 : i32
    return %arg0, %c0_i32, %c0_i32_0 : i32, i32, i32
  }
  func.func @transform_3(%arg0: i32) -> (i32, i32, i32) {
    %c0_i32 = arith.constant 0 : i32
    %c0_i32_0 = arith.constant 0 : i32
    %c0_i32_1 = arith.constant 0 : i32
    return %arg0, %c0_i32, %c0_i32_0 : i32, i32, i32
  }
  func.func @transform_4(%arg0: i32) -> (i32, i32, i32, i32) {
    %c0_i32 = arith.constant 0 : i32
    %c0_i32_0 = arith.constant 0 : i32
    %c0_i32_1 = arith.constant 0 : i32
    %c0_i32_2 = arith.constant 0 : i32
    %c0_i32_3 = arith.constant 0 : i32
    return %c0_i32, %c0_i32_0, %c0_i32_1, %c0_i32_2 : i32, i32, i32, i32
  }
  func.func @transform_5(%arg0: i32) -> (i32, i32) {
    %c0_i32 = arith.constant 0 : i32
    %c0_i32_0 = arith.constant 0 : i32
    %c0_i32_1 = arith.constant 0 : i32
    return %c0_i32, %c0_i32_0 : i32, i32
  }
  func.func @transform_6(%arg0: i32) -> (i32, i32) {
    %c0_i32 = arith.constant 0 : i32
    %c0_i32_0 = arith.constant 0 : i32
    %c0_i32_1 = arith.constant 0 : i32
    return %c0_i32, %c0_i32_0 : i32, i32
  }
  func.func @transform_7(%arg0: i32) -> (i32, i32) {
    %c0_i32 = arith.constant 0 : i32
    %c0_i32_0 = arith.constant 0 : i32
    %c0_i32_1 = arith.constant 0 : i32
    return %c0_i32, %c0_i32_0 : i32, i32
  }
  func.func @transform_8(%arg0: i32) -> (i32, i32, i32, i32) {
    %c0_i32 = arith.constant 0 : i32
    %c0_i32_0 = arith.constant 0 : i32
    %c0_i32_1 = arith.constant 0 : i32
    %c0_i32_2 = arith.constant 0 : i32
    return %arg0, %c0_i32, %c0_i32_0, %c0_i32_1 : i32, i32, i32, i32
  }
  func.func @transform_9(%arg0: i32) -> (i32, i32, i32, i32, i32) {
    %c0_i32 = arith.constant 0 : i32
    %c0_i32_0 = arith.constant 0 : i32
    %c0_i32_1 = arith.constant 0 : i32
    %c0_i32_2 = arith.constant 0 : i32
    %c0_i32_3 = arith.constant 0 : i32
    return %arg0, %c0_i32, %c0_i32_0, %c0_i32_1, %c0_i32_2 : i32, i32, i32, i32, i32
  }
  func.func @transform_10(%arg0: i32) -> (i32, i32, i32, i32, i32) {
    %c0_i32 = arith.constant 0 : i32
    %c0_i32_0 = arith.constant 0 : i32
    %c0_i32_1 = arith.constant 0 : i32
    %c0_i32_2 = arith.constant 0 : i32
    %c0_i32_3 = arith.constant 0 : i32
    return %arg0, %c0_i32, %c0_i32_0, %c0_i32_1, %c0_i32_2 : i32, i32, i32, i32, i32
  }
}

</mosaic_0001>

<bundles_post_ra>
// kernel: _lambda_.3
= control target key start
LH: loop header
LB: loop body
LE: loop exit
PB: predicated region body
PF: predicated region fallthrough
CT: control target
= control target key end

     0   :  { %vm25_vm0 = vcmask 254976   ;;  %s813_s0 = inlined_call_operand.vmem [shape: f32[2,32], index: 0, kind: input, shape index: {}]   ;;  %s814_s1 = inlined_call_operand.vmem [shape: f32[4,32,32], index: 1, kind: input, shape index: {}]   ;;  %s815_s2 = inlined_call_operand.vmem [shape: f32[4,1,32], index: 2, kind: input, shape index: {}]   ;;  %s816_s3 = inlined_call_operand.vmem [shape: f32[32,35], index: 3, kind: input, shape index: {}]   ;;  %s817_s4 = inlined_call_operand.vmem [shape: f32[1,35], index: 4, kind: input, shape index: {}]   ;;  %s818_s5 = inlined_call_operand.hbm [shape: f32[2,32], index: 5, kind: output, shape index: {0}]   ;;  %s819_s6 = inlined_call_operand.vmem [shape: f32[2,35], index: 6, kind: output, shape index: {1}]  }
   0x1   :  { %v23_v0 = vld [vmem:[%s813_s0] sm:$0x3] }
   0x2   :  { %12 = vsyncpa [#allocation3], 0  ;;  %v24_v1 = vmul.f32 %v23_v0, %v23_v0  ;;  %v34_v3 = vld [vmem:[%s814_s1] sm:$0xff]  ;;  %v35_v4 = vld [vmem:[%s814_s1 + $0x8] sm:$0xff]  ;;  %v659_v6 = vmov 0.0|0.0   ;;  %vm660_vm1 = vmmov 0  }
   0x3   :  { %v36_v5 = vld [vmem:[%s814_s1 + $0x10] sm:$0xff]  ;;  %599 = vmatprep.subr.bf16.mxu0 %v659_v6  ;;  %v600_v7 = vpack.c.bf16 %v35_v4, %v34_v3  ;;  %v37_v8 = vld [vmem:[%s814_s1 + $0x18] sm:$0xff]  ;;  %v661_v9 = vmov 0.0   ;;  %605 = vmatprep.subr.bf16.mxu1 %v659_v6  ;;  %v496_v11 = vld [vmem:[%s814_s1 + $0x20] sm:$0xff]  ;;  %vm45_vm2 = vcmask 261120   ;;  %s662_s20 = smov [#allocation2]  }
   0x4   :  { %v26_v2 = vsel %vm25_vm0, %v24_v1, 0.0  ;;  %552 = vmatprep.mubr.msk.f32.mxu0 %vm660_vm1, %v661_v9  ;;  %563 = vmatprep.mubr.msk.f32.mxu1 %vm660_vm1, %v661_v9  ;;  %v603_v10 = vpack.c.bf16 %v37_v8, %v36_v5  ;;  %v497_v12 = vld [vmem:[%s814_s1 + $0x28] sm:$0xff]  ;;  %v498_v19 = vld [vmem:[%s814_s1 + $0x30] sm:$0xff]  ;;  %v499_v20 = vld [vmem:[%s814_s1 + $0x38] sm:$0xff]  ;;  %s482_s21 = sshll.u32 %s662_s20, 4  ;;  %s483_s21 = int_to_ptr.vmem [resolvable:$true] %s482_s21 }
   0x5   :  { %27 = vadd.xlane.f32.xlu0 %v26_v2  ;;  %601 = vmatpush3.bf16.msra.mxu0 %v600_v7  ;;  %v606_v13 = vpack.c.bf16 %v497_v12, %v496_v11  ;;  %v609_v21 = vpack.c.bf16 %v499_v20, %v498_v19  ;;  %v503_v22 = vld [vmem:[%s814_s1 + $0x40] sm:$0xff]  ;;  %v504_v23 = vld [vmem:[%s814_s1 + $0x48] sm:$0xff]  ;;  %v505_v31 = vld [vmem:[%s814_s1 + $0x50] sm:$0xff]  ;;  %p640_p1 = scmp.lt.s32.totalorder %s483_s21, %s483_s21 }
   0x6   :  { %602 = vmatprep.subr.bf16.mxu0 %v659_v6  ;;  %v612_v24 = vpack.c.bf16 %v504_v23, %v503_v22  ;;  %v494_v25 = vld [vmem:[%s815_s2] ss:$0 sm:$0xff]  ;;  %v506_v32 = vld [vmem:[%s814_s1 + $0x58] sm:$0xff]  ;;  %v511_v35 = vld [vmem:[%s814_s1 + $0x68] sm:$0xff] }
   0x7   :  { %607 = vmatpush3.bf16.msra.mxu1 %v606_v13  ;;  %v615_v33 = vpack.c.bf16 %v506_v32, %v505_v31  ;;  %v510_v34 = vld [vmem:[%s814_s1 + $0x60] sm:$0xff]  ;;  %v512_v43 = vld [vmem:[%s814_s1 + $0x70] sm:$0xff]  ;;  %v513_v44 = vld [vmem:[%s814_s1 + $0x78] sm:$0xff] }
   0x8   :  { %608 = vmatprep.subr.bf16.mxu1 %v659_v6  ;;  %v618_v36 = vpack.c.bf16 %v511_v35, %v510_v34  ;;  %v501_v37 = vld [vmem:[%s815_s2 + $0x1] ss:$0 sm:$0xff]  ;;  %v621_v45 = vpack.c.bf16 %v513_v44, %v512_v43  ;;  %v391_v47 = vld [vmem:[%s816_s3 + $0x8] sm:$0xff]  ;;  %v508_v49 = vld [vmem:[%s815_s2 + $0x2] ss:$0 sm:$0xff] }
   0x9   :  { %604 = vmatpush3.bf16.msra.mxu0 %v603_v10  ;;  %v390_v46 = vld [vmem:[%s816_s3] sm:$0xff]  ;;  %v392_v55 = vld [vmem:[%s816_s3 + $0x10] sm:$0xff]  ;;  %v393_v56 = vld [vmem:[%s816_s3 + $0x18] sm:$0xff]  ;;  %s635_s3 = scalar_lea.vmem %s483_s21, 32 }
   0xa   :  { %611 = vmatprep.subr.bf16.mxu0 %v659_v6  ;;  %v624_v48 = vpack.c.bf16 %v391_v47, %v390_v46  ;;  %v627_v57 = vpack.c.bf16 %v393_v56, %v392_v55  ;;  %v515_v58 = vld [vmem:[%s815_s2 + $0x3] ss:$0 sm:$0xff]  ;;  %p636_p0 = scmp.ne.s32.totalorder %s483_s21, %s635_s3  ;;  %p641_p2 = scmp.lt.s32.totalorder %s635_s3, %s635_s3 }
   0xb   :  { %610 = vmatpush3.bf16.msra.mxu1 %v609_v21 }
   0xc   :  { %617 = vmatprep.subr.bf16.mxu1 %v659_v6  ;;  %p642_p3 = por %p641_p2, %p640_p1 }
   0xe   :  { %p643_p4 = pnand %p642_p3, %p636_p0 }
  0x92   :  { %v28_v14 = vpop.xlane.xlu0 %27 }
  0x93   :  { %v30_v15 = vmul.f32 0.03125, %v28_v14 }
  0x95   :  { %v31_v16 = vadd.f32 1e-08, %v30_v15 }
  0x97   :  { %633 = vrsqrt.f32 %v31_v16 }
  0xa1   :  { %v634_v17 = vpop.eup %633 }
  0xa2   :  { %v33_v18 = vmul.f32 %v634_v17, %v23_v0 }
  0xa4   :  { %553 = vmatmul.mubr.msk.f32.vlgmr.msra.gmra.mrb[0].mxu0 %vm45_vm2, %v33_v18 }
  0xa5   :  { %574 = vmatprep.mubr.msk.f32.mxu0 %vm660_vm1, %v661_v9  ;;  %613 = vmatpush3.bf16.msra.mxu0 %v612_v24 }
  0xa6   :  { %614 = vmatprep.subr.bf16.mxu0 %v659_v6 }
  0xa9   :  { %616 = vmatpush3.bf16.msra.mxu0 %v615_v33 }
  0xaa   :  { %623 = vmatprep.subr.bf16.mxu0 %v659_v6 }
 0x177   :  { %v115_v26 = vpop.f32.mrb[0].mxu0 }
 0x178   :  { %v116_v27 = vadd.f32 %v494_v25, %v115_v26  ;;  %v554_v28 = vpop.f32.mrb[1].mxu0 }
 0x17a   :  { %vm119_vm3 = vcmp.ge.f32.partialorder %v116_v27, 0.0  ;;  %v120_v29 = vmul.f32 0.2, %v116_v27 }
 0x17c   :  { %v121_v30 = vsel %vm119_vm3, %v116_v27, %v120_v29 }
 0x17d   :  { %564 = vmatmul.mubr.msk.f32.vlgmr.msra.gmra.mrb[0].mxu1 %vm45_vm2, %v121_v30 }
 0x17e   :  { %585 = vmatprep.mubr.msk.f32.mxu1 %vm660_vm1, %v661_v9  ;;  %619 = vmatpush3.bf16.msra.mxu1 %v618_v36 }
 0x17f   :  { %620 = vmatprep.subr.bf16.mxu1 %v659_v6 }
 0x182   :  { %622 = vmatpush3.bf16.msra.mxu1 %v621_v45 }
 0x250   :  { %v204_v38 = vpop.f32.mrb[0].mxu1 }
 0x251   :  { %v205_v39 = vadd.f32 %v501_v37, %v204_v38  ;;  %v565_v40 = vpop.f32.mrb[1].mxu1 }
 0x253   :  { %vm208_vm4 = vcmp.ge.f32.partialorder %v205_v39, 0.0  ;;  %v209_v41 = vmul.f32 0.2, %v205_v39 }
 0x255   :  { %v210_v42 = vsel %vm208_vm4, %v205_v39, %v209_v41 }
 0x256   :  { %575 = vmatmul.mubr.msk.f32.vlgmr.msra.gmra.mrb[2].mxu0 %vm45_vm2, %v210_v42 }
 0x257   :  { %596 = vmatprep.mubr.msk.f32.mxu0 %vm660_vm1, %v661_v9  ;;  %625 = vmatpush3.bf16.msra.mxu0 %v624_v48 }
 0x258   :  { %626 = vmatprep.subr.bf16.mxu0 %v659_v6 }
 0x25b   :  { %628 = vmatpush3.bf16.msra.mxu0 %v627_v57 }
 0x329   :  { %v293_v50 = vpop.f32.mrb[2].mxu0 }
 0x32a   :  { %v294_v51 = vadd.f32 %v508_v49, %v293_v50  ;;  %v576_v52 = vpop.f32.mrb[3].mxu0 }
 0x32c   :  { %vm297_vm5 = vcmp.ge.f32.partialorder %v294_v51, 0.0  ;;  %v298_v53 = vmul.f32 0.2, %v294_v51 }
 0x32e   :  { %v299_v54 = vsel %vm297_vm5, %v294_v51, %v298_v53 }
 0x32f   :  { %586 = vmatmul.mubr.msk.f32.vlgmr.msra.gmra.mrb[2].mxu1 %vm45_vm2, %v299_v54 }
 0x402   :  { %v382_v59 = vpop.f32.mrb[2].mxu1 }
 0x403   :  { %v383_v60 = vadd.f32 %v515_v58, %v382_v59  ;;  %v587_v61 = vpop.f32.mrb[3].mxu1 }
 0x405   :  { %vm386_vm6 = vcmp.ge.f32.partialorder %v383_v60, 0.0  ;;  %v387_v62 = vmul.f32 0.2, %v383_v60 }
 0x407   :  { %v388_v63 = vsel %vm386_vm6, %v383_v60, %v387_v62 }
 0x408   :  { %389 = vst.msk [vmem:[#allocation2] sm:$0x3] %vm25_vm0, %v388_v63  ;;  %597 = vmatmul.mubr.msk.f32.vlgmr.msra.gmra.mrb[4].mxu0 %vm45_vm2, %v388_v63 }
 0x409   :  { %646 = shalt.err (!%p643_p4)
}
 0x40a   :  { %s647_s23 = scalar_lea.hbm %s818_s5, 32 }
 0x40b   :  { %p648_p5 = scmp.ne.s32.totalorder %s818_s5, %s647_s23  ;;  %p651_p6 = scmp.lt.u32.totalorder %s647_s23, %s818_s5 }
 0x40d   :  { %p653_p7 = pnand %p651_p6, %p648_p5 }
 0x40f   :  { %656 = shalt.err (!%p653_p7)
}
 0x410   :  { %485 = dma.vmem_to_hbm [thread:$0]  %s483_s21, 32, %s818_s5, [#allocation3]   ;;  %v517_v0 = vld [vmem:[%s817_s4] ss:$0 sm:$0xff]  ;;  %vm474_vm7 = vcmask 279552  }
 0x4db   :  { %v470_v1 = vpop.f32.mrb[4].mxu0 }
 0x4dc   :  { %v471_v2 = vadd.f32 %v517_v0, %v470_v1  ;;  %v598_v3 = vpop.f32.mrb[5].mxu0 }
 0x4de   :  { %475 = vst.msk [vmem:[%s819_s6] sm:$0x3] %vm474_vm7, %v471_v2 }
 0x4df   :  { %657 = dma.done.wait [#allocation3], 32  }
 0x4e0   :  { %658 = vsyncadd [#allocation3], 4294967264 }
 0x4e1   :  { %493 = vsyncpa [#allocation3], 1 }

// kernel: _lambda_.4
= control target key start
LH: loop header
LB: loop body
LE: loop exit
PB: predicated region body
PF: predicated region fallthrough
CT: control target
= control target key end

     0   :  { %s1675_s30 = smov 0   ;;  %s2005_s0 = inlined_call_operand.vmem [shape: bf16[2,4,4,16], index: 0, kind: input, shape index: {}]   ;;  %s2006_s1 = inlined_call_operand.vmem [shape: f32[2,1,16], index: 1, kind: input, shape index: {}]   ;;  %s2007_s2 = inlined_call_operand.vmem [shape: f32[2,1,8], index: 2, kind: input, shape index: {}]   ;;  %s2008_s3 = inlined_call_operand.vmem [shape: f32[2,1,8], index: 3, kind: input, shape index: {}]   ;;  %s2009_s4 = inlined_call_operand.vmem [shape: bf16[2,2,64,8], index: 4, kind: input, shape index: {}]   ;;  %s2010_s5 = inlined_call_operand.vmem [shape: f32[1,8], index: 5, kind: input, shape index: {}]   ;;  %s2011_s6 = inlined_call_operand.vmem [shape: bf16[8,3], index: 6, kind: input, shape index: {}]   ;;  %s2012_s7 = inlined_call_operand.vmem [shape: f32[1,3], index: 7, kind: input, shape index: {}]   ;;  %s2013_s8 = inlined_call_operand.vmem [shape: bf16[2,4,2,4,16], index: 8, kind: output, shape index: {0}]   ;;  %s2014_s9 = inlined_call_operand.vmem [shape: f32[2,4,2,4,6], index: 9, kind: output, shape index: {1}]  }
   0x1 LB: > { %s1360_s10 = sadd.s32 4294967295, %s1616_s30   ;;  %p1364_p0 = scmp.ge.s32.totalorder %s1616_s30, 1  ;;  %s1616_s30 = sphi %s1675_s30, %s20_s30  }
   0x2   : > { %p314_p1 = scmp.lt.s32.totalorder %s1616_s30, 3 }
   0x4   : > { %p315_p2 = pnand %p1364_p0, %p314_p1 }
   0x5   : > { %p364_p3 = scmp.lt.s32.totalorder (!%p315_p2), %s1360_s10, 1  ;;  %v1618_v0 = vmov (!%p315_p2), 0.0   ;;  %v1594_v1 = vld [vmem:[%s2009_s4] sm:$0xff] (!%p315_p2)   ;;  %v1595_v10 = vld [vmem:[%s2009_s4 + $0x8] sm:$0xff] (!%p315_p2)   ;;  %vm420_vm0 = vcmask (!%p315_p2), 1040384   ;;  %vm425_vm1 = vcmask (!%p315_p2), 1044480  }
   0x6   : > { %318 = sbr.rel (%p315_p2) target bundleno = 1219 (0x4c3), region = 52  ;;  %1457 = vmatprep.subr.bf16.mxu0 (!%p315_p2), %v1618_v0  ;;  %1469 = vmatprep.subr.bf16.mxu1 (!%p315_p2), %v1618_v0  ;;  %v1596_v20 = vld [vmem:[%s2009_s4 + $0x10] sm:$0xff] (!%p315_p2)   ;;  %v439_v23 = vrot.slane (!%p315_p2), %v1618_v0, 1  ;;  %v1597_v35 = vld [vmem:[%s2009_s4 + $0x18] sm:$0xff] (!%p315_p2)   ;;  %s1619_s26 = smov (!%p315_p2), 32   ;;  %vm1621_vm2 = vmmov (!%p315_p2), 0  }
   0x7   : > { %1458 = vmatpush3.bf16.msra.mxu0 (!%p315_p2), %v1594_v1  ;;  %s1620_s27 = smov (!%p315_p2), 16   ;;  %1465 = vmatprep.mubr.msk.bf16.mxu0 (!%p315_p2), %vm1621_vm2, %v1618_v0  ;;  %s1622_s28 = smov (!%p315_p2), 48   ;;  %vm481_vm3 = vcmask (!%p315_p2), 130048   ;;  %vm486_vm4 = vcmask (!%p315_p2), 261120   ;;  %vm491_vm5 = vcmask (!%p315_p2), 392192   ;;  %vm502_vm6 = vcmask (!%p315_p2), 1043456  }
   0x8   : > { %1459 = vmatprep.subr.bf16.mxu0 (!%p315_p2), %v1618_v0  ;;  %1471 = vmatprep.mubr.msk.bf16.mxu1 (!%p315_p2), %vm1621_vm2, %v1618_v0  ;;  %vm538_vm7 = vcmask (!%p315_p2), 523264   ;;  %vm620_vm10 = vcmask (!%p315_p2), 64512   ;;  %s1623_s17 = smov (!%p315_p2), 8   ;;  %vm1227_vm15 = vcmask (!%p315_p2), 123904  }
   0xb   : > { %1460 = vmatpush3.bf16.msra.mxu0 (!%p315_p2), %v1595_v10 }
   0xc   : > { %1461 = vmatprep.subr.bf16.mxu0 (!%p315_p2), %v1618_v0 }
   0xd   : > { %s2016_s10 = smov (!%p364_p3, %s1360_s10), 1 }
   0xe   : > { %s1426_s13 = sshll.u32 %s2016_s10, 3  ;;  %s371_s16 = scalar_lea.vmem %s2006_s1, %s2016_s10 }
   0xf   : > { %s368_s19 = scalar_lea.vmem %s2005_s0, %s1426_s13  ;;  %v1371_v2 = vld [vmem:[%s371_s16] ss:$0 sm:$0xff]  ;;  %1462 = vmatpush3.bf16.msra.mxu0 %v1596_v20  ;;  %s374_s14 = scalar_lea.vmem %s2007_s2, %s2016_s10 }
  0x10   : > { %v390_v3 = vld [vmem:[%s368_s19 + $0x2] sm:$0x3]  ;;  %v392_v4 = vld [vmem:[%s368_s19 + $0x6] sm:$0x3]  ;;  %v389_v5 = vld [vmem:[%s368_s19] sm:$0x3]  ;;  %1463 = vmatprep.subr.bf16.mxu0 %v1618_v0 }
  0x11   : > { %v394_v6 = vunpack.c.l.bf16 %v390_v3  ;;  %v396_v7 = vunpack.c.l.bf16 %v392_v4  ;;  %v391_v8 = vld [vmem:[%s368_s19 + $0x4] sm:$0x3]  ;;  %v393_v9 = vunpack.c.l.bf16 %v389_v5  ;;  %s377_s19 = scalar_lea.vmem %s2008_s3, %s2016_s10  ;;  %s1624_s13 = smov 3  }
  0x12   : > { %v395_v11 = vunpack.c.l.bf16 %v391_v8 }
  0x13   : > { %v405_v12 = vmul.f32 %v1371_v2, %v394_v6  ;;  %v407_v13 = vmul.f32 %v1371_v2, %v396_v7  ;;  %v404_v14 = vmul.f32 %v1371_v2, %v393_v9  ;;  %1464 = vmatpush3.bf16.msra.mxu0 %v1597_v35 }
  0x14   : > { %v406_v15 = vmul.f32 %v1371_v2, %v395_v11  ;;  %1487 = vmatprep.subr.bf16.mxu0 %v1618_v0 }
  0x15   : > { %v413_v16 = vrot.slane %v405_v12, 7  ;;  %v415_v17 = vrot.slane %v407_v13, 7  ;;  %v412_v18 = vrot.slane %v404_v14, 7 }
  0x16   : > { %v414_v19 = vrot.slane %v406_v15, 7 }
  0x17   : > { %v422_v21 = vsel %vm420_vm0, 0.0, %v413_v16  ;;  %v424_v22 = vsel %vm420_vm0, 0.0, %v415_v17  ;;  %v421_v24 = vsel %vm420_vm0, 0.0, %v412_v18 }
  0x18   : > { %v427_v25 = vsel %vm425_vm1, %v422_v21, 0.0  ;;  %v1709_v26 = vsel %vm425_vm1, %v424_v22, 0.0  ;;  %v423_v27 = vsel %vm420_vm0, 0.0, %v414_v19  ;;  %v426_v28 = vsel %vm425_vm1, %v421_v24, 0.0 }
  0x19   : > { %v1544_v29 = vpack.i.bf16 %v1709_v26, %v427_v25  ;;  %v441_v30 = vrot.slane %v427_v25, 1  ;;  %v428_v31 = vsel %vm425_vm1, %v423_v27, 0.0  ;;  %v440_v32 = vrot.slane %v426_v28, 1 }
  0x1a   : > { %v442_v33 = vrot.slane %v428_v31, 1  ;;  %v468_v34 = vrot.slane %v1709_v26, 1  ;;  %v1554_v39 = vpack.i.bf16 %v428_v31, %v426_v28 }
  0x1b   : > { %1545 = vrot.lane.b32.xlu0 %v1544_v29, %s1619_s26  ;;  %v1559_v36 = vpack.i.bf16 %v441_v30, %v439_v23 }
  0x1c   : > { %v1549_v37 = vpack.i.bf16 %v442_v33, %v440_v32  ;;  %v1564_v38 = vpack.i.bf16 %v468_v34, %v441_v30 }
  0x1d   : > { %1560 = vrot.lane.b32.xlu1 %v1559_v36, %s1620_s27 }
  0x1f   : > { %1550 = vrot.lane.b32.xlu0 %v1549_v37, %s1620_s27 }
  0x21   : > { %1565 = vrot.lane.b32.xlu1 %v1564_v38, %s1622_s28 }
  0x23   : > { %1555 = vrot.lane.b32.xlu0 %v1554_v39, %s1619_s26  ;;  %v1778_v39 = vld [vmem:[%s374_s14] ss:$0 sm:$0xff]  ;;  %s1428_s14 = sshll.u32 %s2016_s10, 5 }
  0x24   : > { %s1948_s18 = scalar_lea.vmem %s2014_s9, %s1428_s14 }
  0x25   : > { %1570 = vrot.lane.b32.xlu1 %v1549_v37, %s1622_s28  ;;  %v433_v37 = vld [vmem:[%s2011_s6] sm:$0xf] }
  0x26   : > { %v1768_v38 = vsel %vm502_vm6, %v433_v37, 0 }
  0x27   : > { %868 = vrot.lane.b32.xlu0 %v468_v34, %s1620_s27  ;;  %1470 = vmatpush3.bf16.msra.mxu1 %v1768_v38 }
  0x28   : > { %1475 = vmatprep.subr.bf16.mxu1 %v1618_v0 }
  0x29   : > { %871 = vrot.lane.b32.xlu1 %v1618_v0, %s1619_s26  ;;  %s1427_s26 = sshll.u32 %s2016_s10, 4 }
  0x2a   : > { %s1902_s29 = scalar_lea.vmem %s2013_s8, %s1427_s26 }
  0x2b   : > { %874 = vrot.lane.b32.xlu0 %v439_v23, %s1622_s28 }
  0x8d   : > { %v1546_v40 = vpop.permute.xlu0 %1545 }
  0x8e   : > { %v1548_v45 = vunpack.i.h.bf16 %v1546_v40  ;;  %v1547_v46 = vunpack.i.l.bf16 %v1546_v40  ;;  %v1783_v40 = vld [vmem:[%s2010_s5] ss:$0 sm:$0xff] }
  0x8f   : > { %v1561_v41 = vpop.permute.xlu1 %1560 }
  0x90   : > { %v1563_v47 = vunpack.i.h.bf16 %v1561_v41  ;;  %v1562_v48 = vunpack.i.l.bf16 %v1561_v41 }
  0x91   : > { %v1551_v42 = vpop.permute.xlu0 %1550 }
  0x92   : > { %v1553_v43 = vunpack.i.h.bf16 %v1551_v42  ;;  %v1552_v44 = vunpack.i.l.bf16 %v1551_v42  ;;  %v484_v59 = vsel %vm481_vm3, %v427_v25, %v1563_v47  ;;  %v482_v60 = vsel %vm481_vm3, 0.0, %v1562_v48 }
  0x93   : > { %v1566_v49 = vpop.permute.xlu1 %1565 }
  0x94   : > { %v485_v50 = vsel %vm481_vm3, %v428_v31, %v1553_v43  ;;  %v483_v51 = vsel %vm481_vm3, %v426_v28, %v1552_v44  ;;  %v1568_v52 = vunpack.i.h.bf16 %v1566_v49  ;;  %v1567_v53 = vunpack.i.l.bf16 %v1566_v49 }
  0x95   : > { %v488_v54 = vsel %vm486_vm4, %v483_v51, %v1547_v46  ;;  %v490_v55 = vsel %vm486_vm4, %v485_v50, %v1548_v45  ;;  %v1556_v56 = vpop.permute.xlu0 %1555  ;;  %v1793_v50 = vld [vmem:[%s377_s19] ss:$0 sm:$0xff] }
  0x96   : > { %v1558_v57 = vunpack.i.h.bf16 %v1556_v56  ;;  %v1557_v58 = vunpack.i.l.bf16 %v1556_v56  ;;  %v493_v61 = vsel %vm491_vm5, %v488_v54, %v1567_v53  ;;  %v495_v62 = vsel %vm491_vm5, %v490_v55, %v1568_v52  ;;  %v1598_v56 = vld [vmem:[%s2009_s4 + $0x20] sm:$0xff]  }
  0x97   : > { %v1571_v63 = vpop.permute.xlu1 %1570  ;;  %v497_v6 = vrot.slane %v493_v61, 4  ;;  %v500_v7 = vrot.slane %v495_v62, 4  ;;  %v683_v8 = vrot.slane %v493_v61, 5  ;;  %v688_v10 = vrot.slane %v495_v62, 5 }
  0x98   : > { %v489_v1 = vsel %vm486_vm4, %v484_v59, %v1558_v57  ;;  %v487_v2 = vsel %vm486_vm4, %v482_v60, %v1557_v58  ;;  %v1573_v3 = vunpack.i.h.bf16 %v1571_v63  ;;  %v1572_v4 = vunpack.i.l.bf16 %v1571_v63  ;;  %v1599_v58 = vld [vmem:[%s2009_s4 + $0x28] sm:$0xff]   ;;  %v1600_v59 = vld [vmem:[%s2009_s4 + $0x30] sm:$0xff]   ;;  %v1601_v60 = vld [vmem:[%s2009_s4 + $0x38] sm:$0xff]  }
  0x99   : > { %v869_v5 = vpop.permute.xlu0 %868  ;;  %v1034_v11 = vrot.slane %v493_v61, 1  ;;  %v1038_v19 = vrot.slane %v495_v62, 1  ;;  %v1604_v63 = vld [vmem:[%s2009_s4 + $0x50] sm:$0xff]  }
  0x9a   : > { %v877_v9 = vsel %vm481_vm3, %v1709_v26, %v869_v5  ;;  %v492_v12 = vsel %vm491_vm5, %v487_v2, %v1572_v4  ;;  %v494_v13 = vsel %vm491_vm5, %v489_v1, %v1573_v3  ;;  %v1605_v1 = vld [vmem:[%s2009_s4 + $0x58] sm:$0xff]   ;;  %vm1236_vm3 = vcmask 44032  }
  0x9b   : > { %v872_v14 = vpop.permute.xlu1 %871  ;;  %v681_v15 = vrot.slane %v492_v12, 1  ;;  %v686_v16 = vrot.slane %v494_v13, 1  ;;  %v880_v17 = vrot.slane %v494_v13, 4  ;;  %v1036_v18 = vrot.slane %v494_v13, 5 }
  0x9c   : > { %v878_v20 = vsel %vm486_vm4, %v877_v9, %v872_v14  ;;  %v503_v22 = vsel %vm502_vm6, %v492_v12, %v497_v6  ;;  %v504_v23 = vsel %vm502_vm6, %v494_v13, %v500_v7 }
  0x9d   : > { %v875_v21 = vpop.permute.xlu0 %874  ;;  %v690_v24 = vsel %vm502_vm6, %v681_v15, %v683_v8  ;;  %v1745_v26 = vsel %vm502_vm6, %v493_v61, %v880_v17  ;;  %v1748_v27 = vsel %vm502_vm6, %v1034_v11, %v1036_v18  ;;  %v505_v30 = vpack.c.bf16 %v504_v23, %v503_v22  ;;  %v1602_v61 = vld [vmem:[%s2009_s4 + $0x40] sm:$0xff]  }
  0x9e   : > { %v879_v25 = vsel %vm491_vm5, %v878_v20, %v875_v21  ;;  %v691_v31 = vsel %vm502_vm6, %v686_v16, %v688_v10 }
  0x9f   : > { %v883_v28 = vrot.slane %v879_v25, 4  ;;  %v1040_v29 = vrot.slane %v879_v25, 5  ;;  %v692_v32 = vpack.c.bf16 %v691_v31, %v690_v24  ;;  %1466 = vmatmul.mubr.msk.bf16.vlgmr.msra.gmra.mrb[0].mxu0 %vm538_vm7, %v505_v30 }
  0xa0   : > { %1489 = vmatprep.mubr.msk.bf16.mxu0 %vm1621_vm2, %v1618_v0  ;;  %1488 = vmatpush3.bf16.msra.mxu0 %v1768_v38 }
  0xa1   : > { %v1752_v33 = vsel %vm502_vm6, %v495_v62, %v883_v28  ;;  %v1755_v34 = vsel %vm502_vm6, %v1038_v19, %v1040_v29  ;;  %1505 = vmatprep.subr.bf16.mxu0 %v1618_v0  ;;  %v1603_v62 = vld [vmem:[%s2009_s4 + $0x48] sm:$0xff]  }
  0xa2   : > { %v887_v35 = vpack.c.bf16 %v1752_v33, %v1745_v26  ;;  %v1044_v36 = vpack.c.bf16 %v1755_v34, %v1748_v27 }
 0x172   : > { %v576_v41 = vpop.f32.mrb[0].mxu0 }
 0x173   : > { %v589_v42 = vmul.f32 %v1778_v39, %v576_v41  ;;  %v1467_v43 = vpop.f32.mrb[1].mxu0 }
 0x174   : > { %v579_v44 = vpop.f32.mrb[2].mxu0 }
 0x175   : > { %v597_v45 = vadd.f32 %v1783_v40, %v589_v42  ;;  %v590_v46 = vmul.f32 %v1778_v39, %v579_v44  ;;  %v1468_v47 = vpop.f32.mrb[3].mxu0  ;;  %v1606_v44 = vld [vmem:[%s2009_s4 + $0x60] sm:$0xff]  }
 0x176   : > { %v1608_v47 = vld [vmem:[%s2009_s4 + $0x70] sm:$0xff]  }
 0x177   : > { %vm599_vm8 = vcmp.ge.f32.partialorder %v597_v45, 0.0  ;;  %v601_v48 = vmul.f32 0.2, %v597_v45  ;;  %v598_v49 = vadd.f32 %v1783_v40, %v590_v46  ;;  %v1607_v46 = vld [vmem:[%s2009_s4 + $0x68] sm:$0xff]  }
 0x179   : > { %v1795_v51 = vsel %vm599_vm8, %v597_v45, %v601_v48  ;;  %vm600_vm9 = vcmp.ge.f32.partialorder %v598_v49, 0.0  ;;  %v602_v52 = vmul.f32 0.2, %v598_v49  ;;  %v1609_v48 = vld [vmem:[%s2009_s4 + $0x78] sm:$0xff]  }
 0x17a   : > { %v611_v54 = vmul.f32 %v1793_v50, %v1795_v51 }
 0x17b   : > { %v1797_v53 = vsel %vm600_vm9, %v598_v49, %v602_v52  ;;  %v669_v52 = vrot.slane %v1795_v51, 4 }
 0x17c   : > { %v612_v55 = vmul.f32 %v1793_v50, %v1797_v53 }
 0x17e   : > { %v613_v57 = vpack.c.bf16 %v612_v55, %v611_v54 }
 0x180   : > { %1472 = vmatmul.mubr.msk.bf16.vlgmr.msra.gmra.mrb[0].mxu1 %vm620_vm10, %v613_v57 }
 0x181   : > { %1476 = vmatpush3.bf16.msra.mxu1 %v1598_v56  ;;  %1483 = vmatprep.mubr.msk.bf16.mxu1 %vm1621_vm2, %v1618_v0  ;;  %v672_v56 = vrot.slane %v1797_v53, 4 }
 0x182   : > { %1477 = vmatprep.subr.bf16.mxu1 %v1618_v0 }
 0x185   : > { %1478 = vmatpush3.bf16.msra.mxu1 %v1599_v58 }
 0x186   : > { %1479 = vmatprep.subr.bf16.mxu1 %v1618_v0 }
 0x189   : > { %1480 = vmatpush3.bf16.msra.mxu1 %v1600_v59 }
 0x18a   : > { %1481 = vmatprep.subr.bf16.mxu1 %v1618_v0 }
 0x18d   : > { %1482 = vmatpush3.bf16.msra.mxu1 %v1601_v60 }
 0x18e   : > { %1493 = vmatprep.subr.bf16.mxu1 %v1618_v0 }
 0x190   : > { %1484 = vmatmul.mubr.msk.bf16.vlgmr.msra.gmra.mrb[4].mxu1 %vm538_vm7, %v692_v32 }
 0x191   : > { %1494 = vmatpush3.bf16.msra.mxu1 %v1602_v61  ;;  %1501 = vmatprep.mubr.msk.bf16.mxu1 %vm1621_vm2, %v1618_v0 }
 0x192   : > { %1495 = vmatprep.subr.bf16.mxu1 %v1618_v0 }
 0x195   : > { %1496 = vmatpush3.bf16.msra.mxu1 %v1603_v62 }
 0x196   : > { %1497 = vmatprep.subr.bf16.mxu1 %v1618_v0 }
 0x199   : > { %1498 = vmatpush3.bf16.msra.mxu1 %v1604_v63 }
 0x19a   : > { %1499 = vmatprep.subr.bf16.mxu1 %v1618_v0 }
 0x19d   : > { %1500 = vmatpush3.bf16.msra.mxu1 %v1605_v1 }
 0x19e   : > { %1523 = vmatprep.subr.bf16.mxu1 %v1618_v0 }
 0x1a0   : > { %1502 = vmatmul.mubr.msk.bf16.vlgmr.msra.gmra.mrb[8].mxu1 %vm538_vm7, %v887_v35 }
 0x1a1   : > { %1524 = vmatpush3.bf16.msra.mxu1 %v1768_v38  ;;  %1525 = vmatprep.mubr.msk.bf16.mxu1 %vm1621_vm2, %v1618_v0 }
 0x253   : > { %v1845_v2 = vpop.f32.mrb[0].mxu1 }
 0x254   : > { %v1473_v3 = vpop.f32.mrb[1].mxu1 }
 0x255   : > { %v1847_v4 = vpop.f32.mrb[2].mxu1 }
 0x256   : > { %v1474_v5 = vpop.f32.mrb[3].mxu1 }
 0x263   : > { %v763_v6 = vpop.f32.mrb[4].mxu1 }
 0x264   : > { %v770_v7 = vmul.f32 %v1778_v39, %v763_v6  ;;  %v1485_v8 = vpop.f32.mrb[5].mxu1 }
 0x265   : > { %v766_v9 = vpop.f32.mrb[6].mxu1 }
 0x266   : > { %v772_v10 = vadd.f32 %v1783_v40, %v770_v7  ;;  %v771_v11 = vmul.f32 %v1778_v39, %v766_v9  ;;  %v1486_v12 = vpop.f32.mrb[7].mxu1 }
 0x268   : > { %vm774_vm11 = vcmp.ge.f32.partialorder %v772_v10, 0.0  ;;  %v776_v13 = vmul.f32 0.2, %v772_v10  ;;  %v773_v14 = vadd.f32 %v1783_v40, %v771_v11 }
 0x26a   : > { %vm775_vm12 = vcmp.ge.f32.partialorder %v773_v14, 0.0  ;;  %v777_v15 = vmul.f32 0.2, %v773_v14  ;;  %v778_v16 = vsel %vm774_vm11, %v772_v10, %v776_v13 }
 0x26b   : > { %v828_v17 = vrot.slane %v778_v16, 4  ;;  %v780_v20 = vmul.f32 %v1793_v50, %v778_v16 }
 0x26c   : > { %v779_v18 = vsel %vm775_vm12, %v773_v14, %v777_v15 }
 0x26d   : > { %v1574_v19 = vpack.i.bf16 %v828_v17, %v778_v16  ;;  %v830_v21 = vrot.slane %v779_v18, 4  ;;  %v781_v22 = vmul.f32 %v1793_v50, %v779_v18 }
 0x26f   : > { %1575 = vrot.lane.b32.xlu1 %v1574_v19, %s1623_s17  ;;  %v1579_v23 = vpack.i.bf16 %v830_v21, %v779_v18  ;;  %v782_v24 = vpack.c.bf16 %v781_v22, %v780_v20 }
 0x271   : > { %1580 = vrot.lane.b32.xlu0 %v1579_v23, %s1623_s17  ;;  %1490 = vmatmul.mubr.msk.bf16.vlgmr.msra.gmra.mrb[4].mxu0 %vm620_vm10, %v782_v24 }
 0x272   : > { %1506 = vmatpush3.bf16.msra.mxu0 %v1768_v38  ;;  %1507 = vmatprep.mubr.msk.bf16.mxu0 %vm1621_vm2, %v1618_v0 }
 0x273   : > { %v958_v25 = vpop.f32.mrb[8].mxu1  ;;  %1511 = vmatprep.subr.bf16.mxu0 %v1618_v0 }
 0x274   : > { %v965_v26 = vmul.f32 %v1778_v39, %v958_v25  ;;  %v1503_v28 = vpop.f32.mrb[9].mxu1 }
 0x275   : > { %v961_v29 = vpop.f32.mrb[10].mxu1 }
 0x276   : > { %v967_v30 = vadd.f32 %v1783_v40, %v965_v26  ;;  %v966_v31 = vmul.f32 %v1778_v39, %v961_v29  ;;  %v1504_v32 = vpop.f32.mrb[11].mxu1 }
 0x278   : > { %vm969_vm13 = vcmp.ge.f32.partialorder %v967_v30, 0.0  ;;  %v971_v33 = vmul.f32 0.2, %v967_v30  ;;  %v968_v35 = vadd.f32 %v1783_v40, %v966_v31 }
 0x27a   : > { %v1866_v37 = vsel %vm969_vm13, %v967_v30, %v971_v33  ;;  %vm970_vm14 = vcmp.ge.f32.partialorder %v968_v35, 0.0  ;;  %v972_v38 = vmul.f32 0.2, %v968_v35 }
 0x27b   : > { %v975_v42 = vmul.f32 %v1793_v50, %v1866_v37 }
 0x27c   : > { %v1868_v41 = vsel %vm970_vm14, %v968_v35, %v972_v38 }
 0x27d   : > { %v976_v43 = vmul.f32 %v1793_v50, %v1868_v41 }
 0x27f   : > { %v977_v45 = vpack.c.bf16 %v976_v43, %v975_v42 }
 0x281   : > { %1508 = vmatmul.mubr.msk.bf16.vlgmr.msra.gmra.mrb[8].mxu0 %vm620_vm10, %v977_v45 }
 0x282   : > { %1512 = vmatpush3.bf16.msra.mxu0 %v1606_v44  ;;  %1519 = vmatprep.mubr.msk.bf16.mxu0 %vm1621_vm2, %v1618_v0  ;;  %vm863_vm2 = vcmask 23552  }
 0x283   : > { %1513 = vmatprep.subr.bf16.mxu0 %v1618_v0 }
 0x286   : > { %1514 = vmatpush3.bf16.msra.mxu0 %v1607_v46 }
 0x287   : > { %1515 = vmatprep.subr.bf16.mxu0 %v1618_v0 }
 0x28a   : > { %1516 = vmatpush3.bf16.msra.mxu0 %v1608_v47 }
 0x28b   : > { %1517 = vmatprep.subr.bf16.mxu0 %v1618_v0 }
 0x28e   : > { %1518 = vmatpush3.bf16.msra.mxu0 %v1609_v48  ;;  %v1023_v48 = vrot.slane %v1866_v37, 4 }
 0x291   : > { %1520 = vmatmul.mubr.msk.bf16.vlgmr.msra.gmra.mrb[12].mxu0 %vm538_vm7, %v1044_v36 }
 0x2e1   : > { %v1576_v49 = vpop.permute.xlu1 %1575 }
 0x2e2   : > { %v1578_v54 = vunpack.i.h.bf16 %v1576_v49  ;;  %v1577_v55 = vunpack.i.l.bf16 %v1576_v49 }
 0x2e3   : > { %v1581_v57 = vpop.permute.xlu0 %1580 }
 0x2e4   : > { %v848_v0 = vsel %vm620_vm10, %v669_v52, %v1578_v54  ;;  %v847_v27 = vsel %vm620_vm10, %v1795_v51, %v1577_v55  ;;  %v1583_v34 = vunpack.i.h.bf16 %v1581_v57  ;;  %v1582_v36 = vunpack.i.l.bf16 %v1581_v57  ;;  %v1921_v51 = vld [vmem:[%s2012_s7] ss:$0 sm:$0xff] }
 0x2e5   : > { %v1221_v58 = vpack.c.bf16 %v848_v0, %v848_v0  ;;  %v1219_v59 = vpack.c.bf16 %v847_v27, %v847_v27  ;;  %v665_v35 = vadd.f32 %v1921_v51, %v1847_v4  ;;  %v1026_v54 = vrot.slane %v1868_v41, 4 }
 0x2e6   : > { %v850_v60 = vsel %vm620_vm10, %v672_v56, %v1583_v34  ;;  %v849_v61 = vsel %vm620_vm10, %v1797_v53, %v1582_v36 }
 0x2e7   : > { %1230 = vst.msk [vmem:[%s1902_s29 + $0x4] sm:$0x3] %vm1227_vm15, %v1221_v58  ;;  %1228 = vst.msk [vmem:[%s1902_s29] sm:$0x3] %vm1227_vm15, %v1219_v59  ;;  %v1225_v62 = vpack.c.bf16 %v850_v60, %v850_v60  ;;  %v1223_v63 = vpack.c.bf16 %v849_v61, %v849_v61  ;;  %v678_v44 = vrot.slane %v665_v35, 4 }
 0x2e9   : > { %1234 = vst.msk [vmem:[%s1902_s29 + $0xc] sm:$0x3] %vm1227_vm15, %v1225_v62  ;;  %1232 = vst.msk [vmem:[%s1902_s29 + $0x8] sm:$0x3] %vm1227_vm15, %v1223_v63 }
 0x344   : > { %v820_v1 = vpop.f32.mrb[4].mxu0 }
 0x345   : > { %v821_v3 = vadd.f32 %v1921_v51, %v820_v1  ;;  %v1491_v5 = vpop.f32.mrb[5].mxu0 }
 0x346   : > { %v823_v53 = vpop.f32.mrb[6].mxu0 }
 0x347   : > { %v832_v6 = vrot.slane %v821_v3, 4  ;;  %v824_v7 = vadd.f32 %v1921_v51, %v823_v53  ;;  %851 = vrot.lane.b32.xlu1 %v821_v3, %s1624_s13  ;;  %v1492_v8 = vpop.f32.mrb[7].mxu0 }
 0x349   : > { %853 = vrot.lane.b32.xlu0 %v832_v6, %s1624_s13  ;;  %v834_v9 = vrot.slane %v824_v7, 4 }
 0x34b   : > { %855 = vrot.lane.b32.xlu1 %v824_v7, %s1624_s13 }
 0x34d   : > { %857 = vrot.lane.b32.xlu0 %v834_v9, %s1624_s13 }
 0x354   : > { %v1929_v10 = vpop.f32.mrb[8].mxu0 }
 0x355   : > { %v1509_v11 = vpop.f32.mrb[9].mxu0  ;;  %v1016_v6 = vadd.f32 %v1921_v51, %v1929_v10 }
 0x356   : > { %v1931_v12 = vpop.f32.mrb[10].mxu0 }
 0x357   : > { %v1510_v13 = vpop.f32.mrb[11].mxu0  ;;  %v1029_v8 = vrot.slane %v1016_v6, 4  ;;  %v1019_v9 = vadd.f32 %v1921_v51, %v1931_v12 }
 0x364   : > { %v1115_v14 = vpop.f32.mrb[12].mxu0 }
 0x365   : > { %v1122_v15 = vmul.f32 %v1778_v39, %v1115_v14  ;;  %v1521_v16 = vpop.f32.mrb[13].mxu0 }
 0x366   : > { %v1118_v17 = vpop.f32.mrb[14].mxu0  ;;  %v1032_v16 = vrot.slane %v1019_v9, 4 }
 0x367   : > { %v1124_v18 = vadd.f32 %v1783_v40, %v1122_v15  ;;  %v1123_v19 = vmul.f32 %v1778_v39, %v1118_v17  ;;  %v1522_v20 = vpop.f32.mrb[15].mxu0 }
 0x369   : > { %vm1126_vm0 = vcmp.ge.f32.partialorder %v1124_v18, 0.0  ;;  %v1128_v21 = vmul.f32 0.2, %v1124_v18  ;;  %v1125_v22 = vadd.f32 %v1783_v40, %v1123_v19  ;;  %v662_v40 = vadd.f32 %v1921_v51, %v1845_v2 }
 0x36b   : > { %vm1127_vm1 = vcmp.ge.f32.partialorder %v1125_v22, 0.0  ;;  %v1129_v23 = vmul.f32 0.2, %v1125_v22  ;;  %v1130_v24 = vsel %vm1126_vm0, %v1124_v18, %v1128_v21  ;;  %v675_v33 = vrot.slane %v662_v40, 4 }
 0x36c   : > { %v1180_v25 = vrot.slane %v1130_v24, 4  ;;  %v1132_v29 = vmul.f32 %v1793_v50, %v1130_v24 }
 0x36d   : > { %v1131_v26 = vsel %vm1127_vm1, %v1125_v22, %v1129_v23 }
 0x36e   : > { %v1584_v28 = vpack.i.bf16 %v1180_v25, %v1130_v24  ;;  %v1182_v30 = vrot.slane %v1131_v26, 4  ;;  %v1133_v31 = vmul.f32 %v1793_v50, %v1131_v26 }
 0x370   : > { %1585 = vrot.lane.b32.xlu1 %v1584_v28, %s1623_s17  ;;  %v1589_v39 = vpack.i.bf16 %v1182_v30, %v1131_v26  ;;  %v1134_v32 = vpack.c.bf16 %v1133_v31, %v1132_v29 }
 0x372   : > { %1590 = vrot.lane.b32.xlu0 %v1589_v39, %s1623_s17  ;;  %1526 = vmatmul.mubr.msk.bf16.vlgmr.msra.gmra.mrb[12].mxu1 %vm620_vm10, %v1134_v32 }
 0x3b9   : > { %v852_v50 = vpop.permute.xlu1 %851 }
 0x3ba   : > { %v864_v38 = vsel %vm863_vm2, %v662_v40, %v852_v50 }
 0x3bb   : > { %1237 = vst.msk [vmem:[%s1948_s18] sm:$0xf] %vm1236_vm3, %v864_v38  ;;  %v854_v2 = vpop.permute.xlu0 %853 }
 0x3bc   : > { %v865_v42 = vsel %vm863_vm2, %v675_v33, %v854_v2 }
 0x3bd   : > { %1239 = vst.msk [vmem:[%s1948_s18 + $0x8] sm:$0xf] %vm1236_vm3, %v865_v42  ;;  %v856_v43 = vpop.permute.xlu1 %855 }
 0x3be   : > { %v866_v45 = vsel %vm863_vm2, %v665_v35, %v856_v43 }
 0x3bf   : > { %1241 = vst.msk [vmem:[%s1948_s18 + $0x10] sm:$0xf] %vm1236_vm3, %v866_v45  ;;  %v858_v46 = vpop.permute.xlu0 %857 }
 0x3c0   : > { %v867_v47 = vsel %vm863_vm2, %v678_v44, %v858_v46 }
 0x3c1   : > { %1243 = vst.msk [vmem:[%s1948_s18 + $0x18] sm:$0xf] %vm1236_vm3, %v867_v47 }
 0x3e2   : > { %v1586_v4 = vpop.permute.xlu1 %1585 }
 0x3e3   : > { %v1588_v49 = vunpack.i.h.bf16 %v1586_v4  ;;  %v1587_v52 = vunpack.i.l.bf16 %v1586_v4 }
 0x3e4   : > { %v1591_v55 = vpop.permute.xlu0 %1590 }
 0x3e5   : > { %v1200_v56 = vsel %vm620_vm10, %v1023_v48, %v1588_v49  ;;  %v1199_v57 = vsel %vm620_vm10, %v1866_v37, %v1587_v52  ;;  %v1593_v0 = vunpack.i.h.bf16 %v1591_v55  ;;  %v1592_v27 = vunpack.i.l.bf16 %v1591_v55 }
 0x3e6   : > { %v1222_v34 = vpack.c.bf16 %v1200_v56, %v1200_v56  ;;  %v1220_v36 = vpack.c.bf16 %v1199_v57, %v1199_v57 }
 0x3e7   : > { %v1202_v58 = vsel %vm620_vm10, %v1026_v54, %v1593_v0  ;;  %v1201_v59 = vsel %vm620_vm10, %v1868_v41, %v1592_v27 }
 0x3e8   : > { %1231 = vst.msk [vmem:[%s1902_s29 + $0x6] sm:$0x3] %vm1227_vm15, %v1222_v34  ;;  %1229 = vst.msk [vmem:[%s1902_s29 + $0x2] sm:$0x3] %vm1227_vm15, %v1220_v36  ;;  %v1226_v60 = vpack.c.bf16 %v1202_v58, %v1202_v58  ;;  %v1224_v61 = vpack.c.bf16 %v1201_v59, %v1201_v59 }
 0x3ea   : > { %1235 = vst.msk [vmem:[%s1902_s29 + $0xe] sm:$0x3] %vm1227_vm15, %v1226_v60  ;;  %1233 = vst.msk [vmem:[%s1902_s29 + $0xa] sm:$0x3] %vm1227_vm15, %v1224_v61 }
 0x445   : > { %v1172_v37 = vpop.f32.mrb[12].mxu1 }
 0x446   : > { %v1173_v62 = vadd.f32 %v1921_v51, %v1172_v37  ;;  %v1527_v63 = vpop.f32.mrb[13].mxu1 }
 0x447   : > { %v1175_v1 = vpop.f32.mrb[14].mxu1 }
 0x448   : > { %v1184_v3 = vrot.slane %v1173_v62, 4  ;;  %v1176_v41 = vadd.f32 %v1921_v51, %v1175_v1  ;;  %1203 = vrot.lane.b32.xlu1 %v1173_v62, %s1624_s13  ;;  %v1528_v5 = vpop.f32.mrb[15].mxu1 }
 0x44a   : > { %1205 = vrot.lane.b32.xlu0 %v1184_v3, %s1624_s13  ;;  %v1186_v53 = vrot.slane %v1176_v41, 4 }
 0x44c   : > { %1207 = vrot.lane.b32.xlu1 %v1176_v41, %s1624_s13 }
 0x44e   : > { %1209 = vrot.lane.b32.xlu0 %v1186_v53, %s1624_s13 }
 0x4ba   : > { %v1204_v7 = vpop.permute.xlu1 %1203 }
 0x4bb   : > { %v1215_v11 = vsel %vm863_vm2, %v1016_v6, %v1204_v7 }
 0x4bc   : > { %1238 = vst.msk [vmem:[%s1948_s18 + $0x4] sm:$0xf] %vm1236_vm3, %v1215_v11  ;;  %v1206_v13 = vpop.permute.xlu0 %1205 }
 0x4bd   : > { %v1216_v14 = vsel %vm863_vm2, %v1029_v8, %v1206_v13 }
 0x4be   : > { %1240 = vst.msk [vmem:[%s1948_s18 + $0xc] sm:$0xf] %vm1236_vm3, %v1216_v14  ;;  %v1208_v15 = vpop.permute.xlu1 %1207 }
 0x4bf   : > { %v1217_v17 = vsel %vm863_vm2, %v1019_v9, %v1208_v15 }
 0x4c0   : > { %1242 = vst.msk [vmem:[%s1948_s18 + $0x14] sm:$0xf] %vm1236_vm3, %v1217_v17  ;;  %v1210_v10 = vpop.permute.xlu0 %1209 }
 0x4c1   : > { %v1218_v18 = vsel %vm863_vm2, %v1032_v16, %v1210_v10 }
 0x4c2   : > { %1244 = vst.msk [vmem:[%s1948_s18 + $0x1c] sm:$0xf] %vm1236_vm3, %v1218_v18 }
 0x4c3 PF: > { %s20_s30 = sadd.s32 1, %s1616_s30  }
 0x4c4   : > { %p17_p4 = scmp.ge.s32.totalorder %s20_s30, 4  }
 0x4c6   :  { %19 = sbr.rel (!%p17_p4) target bundleno = 1 (0x1), region = 106 }

// kernel: _lambda_.5
= control target key start
LH: loop header
LB: loop body
LE: loop exit
PB: predicated region body
PF: predicated region fallthrough
CT: control target
= control target key end

     0   :  { %16 = vsyncpa [#allocation3], 0  ;;  %s3703_s0 = inlined_call_operand.vmem [shape: bf16[2,8,8,8], index: 0, kind: input, shape index: {}]   ;;  %s3704_s1 = inlined_call_operand.vmem [shape: f32[2,1,8], index: 1, kind: input, shape index: {}]   ;;  %s3705_s2 = inlined_call_operand.vmem [shape: f32[2,1,3], index: 2, kind: input, shape index: {}]   ;;  %s3706_s3 = inlined_call_operand.vmem [shape: f32[2,1,3], index: 3, kind: input, shape index: {}]   ;;  %s3707_s4 = inlined_call_operand.vmem [shape: bf16[2,2,32,3], index: 4, kind: input, shape index: {}]   ;;  %s3708_s5 = inlined_call_operand.vmem [shape: f32[1,3], index: 5, kind: input, shape index: {}]   ;;  %s3709_s6 = inlined_call_operand.vmem [shape: bf16[3,3], index: 6, kind: input, shape index: {}]   ;;  %s3710_s7 = inlined_call_operand.vmem [shape: f32[1,3], index: 7, kind: input, shape index: {}]   ;;  %s3711_s8 = inlined_call_operand.vmem [shape: f32[2,8,8,3], index: 8, kind: input, shape index: {}]   ;;  %s3712_s9 = inlined_call_operand.hbm [shape: bf16[2,8,2,8,6], index: 9, kind: output, shape index: {0}]   ;;  %s3713_s10 = inlined_call_operand.vmem [shape: f32[2,8,2,8,6], index: 10, kind: output, shape index: {1}]  }
   0x1   :  { %18 = vsyncpa [#allocation3 + $0x1], 0  ;;  %s2733_s13 = smov 0   ;;  %s2735_s14 = smov 0  }
   0x2   :  { %s2737_s15 = smov 0   ;;  %s2739_s16 = smov 0  }
   0x3 LB: > { %s2754_s17 = sadd.s32 4294967295, %s2667_s16   ;;  %s2162_s18 = sadd.s32 4294967294, %s2667_s16   ;;  %s2667_s16 = sphi %s2739_s16, %s3722_s16   ;;  %s2663_s15 = sphi %s2737_s15, %s3721_s15   ;;  %s2659_s14 = sphi %s2735_s14, %s3720_s14   ;;  %s2655_s13 = sphi %s2733_s13, %s3719_s13  }
   0x4   : > { %s2758_s19 = sadd.s32 1, %s2667_s16   ;;  %s245_s20 = sadd.s32 1, %s2663_s15 }
   0x5   : > { %s242_s21 = ssub.s32 %s2667_s16, %s2758_s19  ;;  %p255_p0 = scmp.ne.s32.totalorder %s2663_s15, %s2659_s14 }
   0x6   : > { %p243_p1 = scmp.eq.s32.totalorder %s242_s21, 0  ;;  %p256_p2 = scmp.eq.s32.totalorder %s2754_s17, 1 }
   0x7   : > { %p261_p3 = scmp.ne.s32.totalorder %s2659_s14, %s2655_s13  ;;  %p262_p4 = scmp.eq.s32.totalorder %s2162_s18, 1 }
   0x8   : > { %s2769_s22 = scalar_select %p243_p1, %s2663_s15, %s245_s20  }
   0x9   : > { %p2771_p5 = por %p256_p2, %p255_p0  ;;  %p2775_p6 = por %p262_p4, %p261_p3 }
   0xa   : > { %p2165_p7 = scmp.ge.s32.totalorder %s2667_s16, 1  ;;  %p352_p8 = scmp.lt.s32.totalorder %s2667_s16, 3 }
   0xc   : > { %p353_p9 = pnand %p2165_p7, %p352_p8 }
   0xd   : > { %p409_p10 = scmp.lt.s32.totalorder (!%p353_p9), %s2754_s17, 1  ;;  %vm489_vm0 = vcmask (!%p353_p9), 1040384   ;;  %vm534_vm1 = vcmask (!%p353_p9), 1046528   ;;  %v2597_v31 = vld [vmem:[%s3707_s4] sm:$0xff] (!%p353_p9)   ;;  %s2669_s21 = smov (!%p353_p9), 16   ;;  %v2670_v43 = vmov (!%p353_p9), 0.0  }
   0xe   : > { %356 = sbr.rel (%p353_p9) target bundleno = 1034 (0x40a), region = 56  ;;  %2302 = vmatprep.subr.bf16.mxu0 (!%p353_p9), %v2597_v31  ;;  %v2834_v44 = vrot.slane (!%p353_p9), %v2670_v43, 1  ;;  %v2598_v49 = vld [vmem:[%s3707_s4 + $0x8] sm:$0xff] (!%p353_p9)   ;;  %s2671_s28 = smov (!%p353_p9), 8   ;;  %vm635_vm2 = vcmask (!%p353_p9), 64512   ;;  %vm644_vm3 = vcmask (!%p353_p9), 130048  }
   0xf   : > { %2303 = vmatpush3.bf16.msra.mxu0 (!%p353_p9), %v2597_v31  ;;  %vm653_vm4 = vcmask (!%p353_p9), 195584   ;;  %vm682_vm5 = vcmask (!%p353_p9), 261120   ;;  %vm849_vm6 = vcmask (!%p353_p9), 1041408   ;;  %vm836_vm11 = vcmask (!%p353_p9), 23552   ;;  %s399_s18 = sand.u32 (!%p353_p9), 1, %s2659_s14   ;;  %s2675_s30 = smov (!%p353_p9), [#allocation2]  }
  0x10   : > { %2304 = vmatprep.subr.bf16.mxu0 (!%p353_p9), %v2598_v49  ;;  %s2166_s20 = sshll.u32 (!%p353_p9), %s399_s18, 6 }
  0x13   : > { %2305 = vmatpush3.bf16.msra.mxu0 (!%p353_p9), %v2598_v49 }
  0x15   : > { %s2783_s25 = scalar_select %p409_p10, %s2754_s17, 1 }
  0x17   : > { %s2235_s26 = sshll.u32 %s2783_s25, 5  ;;  %s416_s29 = scalar_lea.vmem %s3704_s1, %s2783_s25 }
  0x18   : > { %s413_s12 = scalar_lea.vmem %s3703_s0, %s2235_s26  ;;  %v2173_v1 = vld [vmem:[%s416_s29] ss:$0 sm:$0xff]  ;;  %s2672_s29 = smov 24  }
  0x19   : > { %v2256_v0 = vld [vmem:[%s413_s12 + $0x10] sm:$0xff]   ;;  %v2240_v2 = vld [vmem:[%s413_s12] sm:$0xff]   ;;  %v2255_v7 = vld [vmem:[%s413_s12 + $0x8] sm:$0xff]   ;;  %s419_s26 = scalar_lea.vmem %s3705_s2, %s2783_s25  ;;  %s422_s11 = scalar_lea.vmem %s3706_s3, %s2783_s25 }
  0x1a   : > { %v2249_v3 = vunpack.c.l.bf16 %v2256_v0  ;;  %v2250_v4 = vunpack.c.h.bf16 %v2256_v0  ;;  %v2241_v5 = vunpack.c.l.bf16 %v2240_v2  ;;  %v2242_v6 = vunpack.c.h.bf16 %v2240_v2  ;;  %v2257_v8 = vld [vmem:[%s413_s12 + $0x18] sm:$0xff]   ;;  %s3714_s12 = smov 3  }
  0x1b   : > { %v2245_v9 = vunpack.c.l.bf16 %v2255_v7  ;;  %v2246_v10 = vunpack.c.h.bf16 %v2255_v7  ;;  %v2253_v11 = vunpack.c.l.bf16 %v2257_v8  ;;  %v2254_v12 = vunpack.c.h.bf16 %v2257_v8 }
  0x1c   : > { %v461_v13 = vmul.f32 %v2249_v3, %v2173_v1  ;;  %v462_v14 = vmul.f32 %v2250_v4, %v2173_v1  ;;  %v457_v15 = vmul.f32 %v2241_v5, %v2173_v1  ;;  %v458_v16 = vmul.f32 %v2242_v6, %v2173_v1 }
  0x1d   : > { %v459_v17 = vmul.f32 %v2245_v9, %v2173_v1  ;;  %v460_v18 = vmul.f32 %v2246_v10, %v2173_v1  ;;  %v463_v19 = vmul.f32 %v2253_v11, %v2173_v1  ;;  %v2793_v20 = vmul.f32 %v2254_v12, %v2173_v1 }
  0x1e   : > { %v477_v21 = vrot.slane %v461_v13, 7  ;;  %v478_v22 = vrot.slane %v462_v14, 7  ;;  %v473_v23 = vrot.slane %v457_v15, 7  ;;  %v474_v24 = vrot.slane %v458_v16, 7 }
  0x1f   : > { %v475_v25 = vrot.slane %v459_v17, 7  ;;  %v476_v26 = vrot.slane %v460_v18, 7  ;;  %v479_v34 = vrot.slane %v463_v19, 7  ;;  %v480_v35 = vrot.slane %v2793_v20, 7 }
  0x20   : > { %v2796_v27 = vsel %vm489_vm0, 0.0, %v477_v21  ;;  %v2799_v28 = vsel %vm489_vm0, 0.0, %v478_v22  ;;  %v2804_v30 = vsel %vm489_vm0, 0.0, %v473_v23  ;;  %v2810_v32 = vsel %vm489_vm0, 0.0, %v474_v24 }
  0x21   : > { %v2447_v29 = vpack.i.bf16 %v2799_v28, %v2796_v27  ;;  %v2813_v33 = vsel %vm489_vm0, %v473_v23, 0.0  ;;  %v2437_v36 = vpack.i.bf16 %v2810_v32, %v2804_v30  ;;  %v537_v37 = vrot.slane %v2804_v30, 1 }
  0x22   : > { %v2821_v38 = vsel %vm489_vm0, 0.0, %v475_v25  ;;  %v2824_v39 = vsel %vm489_vm0, 0.0, %v476_v26  ;;  %v2827_v40 = vsel %vm489_vm0, %v474_v24, 0.0  ;;  %v540_v41 = vrot.slane %v2810_v32, 1 }
  0x23   : > { %2448 = vrot.lane.b32.xlu0 %v2447_v29, %s2669_s21  ;;  %v2831_v42 = vsel %vm489_vm0, %v475_v25, 0.0  ;;  %2438 = vrot.lane.b32.xlu1 %v2437_v36, %s2669_s21  ;;  %v2838_v45 = vsel %vm489_vm0, %v476_v26, 0.0  ;;  %v2442_v46 = vpack.i.bf16 %v2824_v39, %v2821_v38  ;;  %v543_v47 = vrot.slane %v2821_v38, 1 }
  0x24   : > { %v2844_v48 = vrot.slane %v2813_v33, 1  ;;  %v2850_v50 = vsel %vm489_vm0, %v478_v22, 0.0  ;;  %v546_v51 = vrot.slane %v2824_v39, 1  ;;  %v2854_v52 = vsel %vm489_vm0, 0.0, %v479_v34 }
  0x25   : > { %v2857_v53 = vsel %vm489_vm0, 0.0, %v480_v35  ;;  %v2862_v55 = vsel %vm489_vm0, %v479_v34, 0.0  ;;  %v541_v56 = vrot.slane %v2827_v40, 1  ;;  %v544_v57 = vrot.slane %v2831_v42, 1 }
  0x26   : > { %v539_v54 = vsel %vm534_vm1, %v537_v37, %v2844_v48  ;;  %v2867_v58 = vsel %vm489_vm0, %v477_v21, 0.0  ;;  %v552_v59 = vrot.slane %v2799_v28, 1  ;;  %v547_v61 = vrot.slane %v2838_v45, 1 }
  0x27   : > { %v2457_v60 = vpack.i.bf16 %v539_v54, %v2834_v44  ;;  %2443 = vrot.lane.b32.xlu1 %v2442_v46, %s2669_s21  ;;  %v2452_v62 = vpack.i.bf16 %v2857_v53, %v2854_v52  ;;  %v555_v63 = vrot.slane %v2854_v52, 1  ;;  %v542_v0 = vsel %vm534_vm1, %v540_v41, %v541_v56 }
  0x28   : > { %v545_v1 = vsel %vm534_vm1, %v543_v47, %v544_v57  ;;  %v548_v3 = vsel %vm534_vm1, %v546_v51, %v547_v61  ;;  %v553_v4 = vrot.slane %v2850_v50, 1  ;;  %v556_v5 = vrot.slane %v2862_v55, 1 }
  0x29   : > { %2458 = vrot.lane.b32.xlu0 %v2457_v60, %s2671_s28  ;;  %v2462_v2 = vpack.i.bf16 %v545_v1, %v542_v0  ;;  %v549_v6 = vrot.slane %v2796_v27, 1  ;;  %v2884_v7 = vsel %vm489_vm0, %v480_v35, 0.0  ;;  %v550_v8 = vrot.slane %v2867_v58, 1 }
  0x2a   : > { %v608_v9 = vrot.slane %v2857_v53, 1  ;;  %v2472_v10 = vpack.i.bf16 %v548_v3, %v545_v1  ;;  %v2467_v11 = vpack.i.bf16 %v542_v0, %v539_v54  ;;  %v554_v12 = vsel %vm534_vm1, %v552_v59, %v553_v4 }
  0x2b   : > { %2453 = vrot.lane.b32.xlu1 %v2452_v62, %s2669_s21  ;;  %v557_v13 = vsel %vm534_vm1, %v555_v63, %v556_v5  ;;  %v609_v14 = vrot.slane %v2884_v7, 1  ;;  %v551_v15 = vsel %vm534_vm1, %v549_v6, %v550_v8  ;;  %v2502_v21 = vpack.i.bf16 %v544_v57, %v541_v56 }
  0x2c   : > { %v2482_v16 = vpack.i.bf16 %v557_v13, %v554_v12  ;;  %v2477_v17 = vpack.i.bf16 %v551_v15, %v548_v3  ;;  %v2487_v20 = vpack.i.bf16 %v554_v12, %v551_v15  ;;  %v2497_v22 = vpack.i.bf16 %v2844_v48, %v2834_v44 }
  0x2d   : > { %2463 = vrot.lane.b32.xlu0 %v2462_v2, %s2671_s28  ;;  %v610_v18 = vsel %vm534_vm1, %v608_v9, %v609_v14  ;;  %v2512_v23 = vpack.i.bf16 %v2838_v45, %v2831_v42  ;;  %v2507_v24 = vpack.i.bf16 %v2827_v40, %v2813_v33  ;;  %v2522_v25 = vpack.i.bf16 %v547_v61, %v544_v57 }
  0x2e   : > { %v2492_v19 = vpack.i.bf16 %v610_v18, %v557_v13  ;;  %v2517_v26 = vpack.i.bf16 %v541_v56, %v2844_v48  ;;  %v2532_v29 = vpack.i.bf16 %v556_v5, %v553_v4  ;;  %v2527_v31 = vpack.i.bf16 %v550_v8, %v547_v61 }
  0x2f   : > { %2473 = vrot.lane.b32.xlu1 %v2472_v10, %s2672_s29  ;;  %v2542_v34 = vpack.i.bf16 %v2884_v7, %v2862_v55  ;;  %v2537_v35 = vpack.i.bf16 %v2850_v50, %v2867_v58  ;;  %v2552_v36 = vpack.i.bf16 %v609_v14, %v556_v5  ;;  %v2547_v37 = vpack.i.bf16 %v553_v4, %v550_v8 }
  0x31   : > { %2468 = vrot.lane.b32.xlu0 %v2467_v11, %s2672_s29 }
  0x33   : > { %2483 = vrot.lane.b32.xlu1 %v2482_v16, %s2671_s28 }
  0x35   : > { %2478 = vrot.lane.b32.xlu0 %v2477_v17, %s2671_s28 }
  0x37   : > { %2493 = vrot.lane.b32.xlu1 %v2492_v19, %s2672_s29 }
  0x39   : > { %2488 = vrot.lane.b32.xlu0 %v2487_v20, %s2672_s29 }
  0x3b   : > { %2503 = vrot.lane.b32.xlu1 %v2502_v21, %s2671_s28 }
  0x3d   : > { %2498 = vrot.lane.b32.xlu0 %v2497_v22, %s2671_s28 }
  0x3f   : > { %2513 = vrot.lane.b32.xlu1 %v2512_v23, %s2669_s21 }
  0x41   : > { %2508 = vrot.lane.b32.xlu0 %v2507_v24, %s2669_s21 }
  0x43   : > { %2523 = vrot.lane.b32.xlu1 %v2522_v25, %s2672_s29 }
  0x45   : > { %2518 = vrot.lane.b32.xlu0 %v2517_v26, %s2672_s29 }
  0x47   : > { %2533 = vrot.lane.b32.xlu1 %v2532_v29, %s2671_s28 }
  0x49   : > { %2528 = vrot.lane.b32.xlu0 %v2527_v31, %s2671_s28 }
  0x4b   : > { %2543 = vrot.lane.b32.xlu1 %v2542_v34, %s2669_s21 }
  0x4d   : > { %2538 = vrot.lane.b32.xlu0 %v2537_v35, %s2669_s21 }
  0x4f   : > { %2553 = vrot.lane.b32.xlu1 %v2552_v36, %s2672_s29 }
  0x51   : > { %2548 = vrot.lane.b32.xlu0 %v2547_v37, %s2672_s29 }
  0x53   : > { %1390 = vrot.lane.b32.xlu1 %v2670_v43, %s2669_s21  ;;  %s3392_s21 = scalar_lea.vmem [#allocation2], %s2166_s20  ;;  %s2238_s20 = sshll.u32 %s2754_s17, 10 }
  0x54   : > { %s3548_s17 = scalar_lea.sflag [#allocation3], %s399_s18 }
  0x55   : > { %1387 = vrot.lane.b32.xlu0 %v610_v18, %s2671_s28 }
  0x57   : > { %1634 = vrot.lane.b32.xlu1 %v609_v14, %s2671_s28 }
  0x59   : > { %1393 = vrot.lane.b32.xlu0 %v2834_v44, %s2672_s29 }
  0x5d   : > { %1637 = vrot.lane.b32.xlu0 %v2834_v44, %s2672_s29 }
  0x95   : > { %v2932_v41 = vpop.permute.xlu0 %2448  ;;  %v2439_v46 = vpop.permute.xlu1 %2438 }
  0x96   : > { %v2441_v59 = vunpack.i.h.bf16 %v2439_v46  ;;  %v2440_v1 = vunpack.i.l.bf16 %v2439_v46  ;;  %v2451_v22 = vunpack.i.h.bf16 %v2932_v41  ;;  %v2450_v23 = vunpack.i.l.bf16 %v2932_v41 }
  0x99   : > { %v2444_v47 = vpop.permute.xlu1 %2443 }
  0x9a   : > { %v2445_v60 = vunpack.i.l.bf16 %v2444_v47  ;;  %v2446_v2 = vunpack.i.h.bf16 %v2444_v47 }
  0x9b   : > { %v2459_v48 = vpop.permute.xlu0 %2458 }
  0x9c   : > { %v2461_v49 = vunpack.i.h.bf16 %v2459_v48  ;;  %v2460_v51 = vunpack.i.l.bf16 %v2459_v48 }
  0x9d   : > { %v2454_v54 = vpop.permute.xlu1 %2453 }
  0x9e   : > { %v637_v61 = vsel %vm635_vm2, %v2804_v30, %v2461_v49  ;;  %v636_v44 = vsel %vm635_vm2, 0.0, %v2460_v51  ;;  %v2456_v35 = vunpack.i.h.bf16 %v2454_v54  ;;  %v2455_v36 = vunpack.i.l.bf16 %v2454_v54 }
  0x9f   : > { %v2464_v43 = vpop.permute.xlu0 %2463  ;;  %v646_v11 = vsel %vm644_vm3, %v637_v61, %v2441_v59 }
  0xa0   : > { %v2466_v56 = vunpack.i.h.bf16 %v2464_v43  ;;  %v2465_v57 = vunpack.i.l.bf16 %v2464_v43 }
  0xa1   : > { %v2474_v0 = vpop.permute.xlu1 %2473 }
  0xa2   : > { %v639_v62 = vsel %vm635_vm2, %v2821_v38, %v2466_v56  ;;  %v638_v63 = vsel %vm635_vm2, %v2810_v32, %v2465_v57  ;;  %v2476_v3 = vunpack.i.h.bf16 %v2474_v0  ;;  %v2475_v4 = vunpack.i.l.bf16 %v2474_v0 }
  0xa3   : > { %v2469_v5 = vpop.permute.xlu0 %2468  ;;  %v647_v6 = vsel %vm644_vm3, %v638_v63, %v2445_v60  ;;  %v648_v30 = vsel %vm644_vm3, %v639_v62, %v2446_v2  ;;  %v645_v38 = vsel %vm644_vm3, %v636_v44, %v2440_v1 }
  0xa4   : > { %v2471_v8 = vunpack.i.h.bf16 %v2469_v5  ;;  %v2470_v9 = vunpack.i.l.bf16 %v2469_v5  ;;  %v2944_v10 = vsel %vm653_vm4, %v647_v6, %v2475_v4  ;;  %v2949_v32 = vsel %vm653_vm4, %v648_v30, %v2476_v3 }
  0xa5   : > { %v2484_v12 = vpop.permute.xlu1 %2483  ;;  %v663_v24 = vpack.c.bf16 %v2949_v32, %v2944_v10 }
  0xa6   : > { %v2952_v13 = vsel %vm653_vm4, %v645_v38, %v2470_v9  ;;  %v2955_v14 = vsel %vm653_vm4, %v646_v11, %v2471_v8  ;;  %v2486_v15 = vunpack.i.h.bf16 %v2484_v12  ;;  %v2485_v16 = vunpack.i.l.bf16 %v2484_v12 }
  0xa7   : > { %v2479_v17 = vpop.permute.xlu0 %2478  ;;  %v662_v18 = vpack.c.bf16 %v2955_v14, %v2952_v13  ;;  %v1399_v21 = vpack.c.bf16 %v2944_v10, %v2955_v14 }
  0xa8   : > { %v2481_v19 = vunpack.i.h.bf16 %v2479_v17  ;;  %v2480_v20 = vunpack.i.l.bf16 %v2479_v17  ;;  %v643_v25 = vsel %vm635_vm2, %v2854_v52, %v2486_v15  ;;  %v642_v26 = vsel %vm635_vm2, %v2799_v28, %v2485_v16 }
  0xa9   : > { %2306 = vmatprep.mubr.msk.bf16.mxu0 %vm682_vm5, %v662_v18  ;;  %v2494_v34 = vpop.permute.xlu1 %2493  ;;  %v651_v52 = vsel %vm644_vm3, %v642_v26, %v2455_v36  ;;  %v652_v28 = vsel %vm644_vm3, %v643_v25, %v2456_v35  ;;  %v1043_v25 = vrot.slane %v2955_v14, 1 }
  0xaa   : > { %v641_v29 = vsel %vm635_vm2, %v2796_v27, %v2481_v19  ;;  %v640_v31 = vsel %vm635_vm2, %v2824_v39, %v2480_v20  ;;  %2307 = vmatmul.mubr.msk.bf16.vlgmr.msra.gmra.mrb[0].mxu0 %vm682_vm5, %v663_v24  ;;  %v2496_v37 = vunpack.i.h.bf16 %v2494_v34  ;;  %v2495_v41 = vunpack.i.l.bf16 %v2494_v34 }
  0xab   : > { %v2489_v46 = vpop.permute.xlu0 %2488  ;;  %v649_v49 = vsel %vm644_vm3, %v640_v31, %v2450_v23  ;;  %v650_v27 = vsel %vm644_vm3, %v641_v29, %v2451_v22  ;;  %v1046_v19 = vrot.slane %v2944_v10, 1  ;;  %v1049_v20 = vrot.slane %v2949_v32, 1 }
  0xac   : > { %v2491_v47 = vunpack.i.h.bf16 %v2489_v46  ;;  %v2490_v48 = vunpack.i.l.bf16 %v2489_v46  ;;  %v2980_v39 = vsel %vm653_vm4, %v651_v52, %v2495_v41  ;;  %v2983_v51 = vsel %vm653_vm4, %v652_v28, %v2496_v37 }
  0xad   : > { %v2504_v56 = vpop.permute.xlu1 %2503  ;;  %v665_v0 = vpack.c.bf16 %v2983_v51, %v2980_v39  ;;  %v1040_v24 = vrot.slane %v2952_v13, 1 }
  0xae   : > { %v2986_v54 = vsel %vm653_vm4, %v649_v49, %v2490_v48  ;;  %v2989_v43 = vsel %vm653_vm4, %v650_v27, %v2491_v47  ;;  %v2506_v59 = vunpack.i.h.bf16 %v2504_v56  ;;  %v2505_v61 = vunpack.i.l.bf16 %v2504_v56 }
  0xaf   : > { %v1400_v57 = vpack.c.bf16 %v2986_v54, %v2949_v32  ;;  %v2499_v60 = vpop.permute.xlu0 %2498  ;;  %v664_v63 = vpack.c.bf16 %v2989_v43, %v2986_v54  ;;  %v1401_v1 = vpack.c.bf16 %v2980_v39, %v2989_v43 }
  0xb0   : > { %v2501_v44 = vunpack.i.h.bf16 %v2499_v60  ;;  %v2500_v62 = vunpack.i.l.bf16 %v2499_v60  ;;  %v1003_v2 = vsel %vm635_vm2, %v2831_v42, %v2506_v59  ;;  %v1002_v3 = vsel %vm635_vm2, %v2827_v40, %v2505_v61 }
  0xb1   : > { %2310 = vmatprep.mubr.msk.bf16.mxu0 %vm682_vm5, %v664_v63  ;;  %v2514_v4 = vpop.permute.xlu1 %2513 }
  0xb2   : > { %v1001_v5 = vsel %vm635_vm2, %v2813_v33, %v2501_v44  ;;  %v1000_v6 = vsel %vm635_vm2, 0.0, %v2500_v62  ;;  %2311 = vmatmul.mubr.msk.bf16.gmra.mrb[4].mxu0 %vm682_vm5, %v665_v0  ;;  %v2516_v8 = vunpack.i.h.bf16 %v2514_v4  ;;  %v2515_v9 = vunpack.i.l.bf16 %v2514_v4 }
  0xb3   : > { %v2509_v30 = vpop.permute.xlu0 %2508 }
  0xb4   : > { %v2511_v38 = vunpack.i.h.bf16 %v2509_v30  ;;  %v2510_v11 = vunpack.i.l.bf16 %v2509_v30  ;;  %v1010_v42 = vsel %vm644_vm3, %v1002_v3, %v2515_v9  ;;  %v1011_v12 = vsel %vm644_vm3, %v1003_v2, %v2516_v8 }
  0xb5   : > { %v2524_v16 = vpop.permute.xlu1 %2523 }
  0xb6   : > { %v1008_v40 = vsel %vm644_vm3, %v1000_v6, %v2510_v11  ;;  %v1009_v15 = vsel %vm644_vm3, %v1001_v5, %v2511_v38  ;;  %v2526_v17 = vunpack.i.h.bf16 %v2524_v16  ;;  %v2525_v33 = vunpack.i.l.bf16 %v2524_v16 }
  0xb7   : > { %v2519_v18 = vpop.permute.xlu0 %2518  ;;  %v1061_v16 = vrot.slane %v2983_v51, 1 }
  0xb8   : > { %v2521_v22 = vunpack.i.h.bf16 %v2519_v18  ;;  %v2520_v23 = vunpack.i.l.bf16 %v2519_v18  ;;  %v1018_v26 = vsel %vm653_vm4, %v1010_v42, %v2525_v33  ;;  %v1019_v29 = vsel %vm653_vm4, %v1011_v12, %v2526_v17 }
  0xb9   : > { %v1047_v31 = vrot.slane %v1018_v26, 1  ;;  %v1050_v34 = vrot.slane %v1019_v29, 1  ;;  %v2534_v37 = vpop.permute.xlu1 %2533 }
  0xba   : > { %v1016_v35 = vsel %vm653_vm4, %v1008_v40, %v2520_v23  ;;  %v1017_v36 = vsel %vm653_vm4, %v1009_v15, %v2521_v22  ;;  %v2536_v47 = vunpack.i.h.bf16 %v2534_v37  ;;  %v2535_v48 = vunpack.i.l.bf16 %v2534_v37 }
  0xbb   : > { %v1041_v41 = vrot.slane %v1016_v35, 1  ;;  %v1044_v46 = vrot.slane %v1017_v36, 1  ;;  %v2529_v52 = vpop.permute.xlu0 %2528  ;;  %v3021_v13 = vsel %vm534_vm1, %v1046_v19, %v1047_v31  ;;  %v3024_v28 = vsel %vm534_vm1, %v1049_v20, %v1050_v34 }
  0xbc   : > { %v2531_v49 = vunpack.i.h.bf16 %v2529_v52  ;;  %v2530_v27 = vunpack.i.l.bf16 %v2529_v52  ;;  %v1073_v56 = vpack.c.bf16 %v3024_v28, %v3021_v13  ;;  %v1007_v59 = vsel %vm635_vm2, %v2862_v55, %v2536_v47 }
  0xbd   : > { %v3031_v60 = vsel %vm534_vm1, %v1040_v24, %v1041_v41  ;;  %v1006_v61 = vsel %vm635_vm2, %v2850_v50, %v2535_v48  ;;  %v2544_v63 = vpop.permute.xlu1 %2543  ;;  %v3040_v0 = vsel %vm534_vm1, %v1043_v25, %v1044_v46  ;;  %v1058_v15 = vrot.slane %v2980_v39, 1 }
  0xbe   : > { %v1005_v44 = vsel %vm635_vm2, %v2867_v58, %v2531_v49  ;;  %v1004_v62 = vsel %vm635_vm2, %v2838_v45, %v2530_v27  ;;  %v2546_v2 = vunpack.i.h.bf16 %v2544_v63  ;;  %v2545_v3 = vunpack.i.l.bf16 %v2544_v63 }
  0xbf   : > { %v2539_v4 = vpop.permute.xlu0 %2538  ;;  %v1072_v55 = vpack.c.bf16 %v3040_v0, %v3031_v60  ;;  %v1649_v5 = vpack.c.bf16 %v3021_v13, %v3040_v0  ;;  %v1052_v24 = vrot.slane %v2986_v54, 1  ;;  %v1055_v25 = vrot.slane %v2989_v43, 1  ;;  %v2603_v60 = vld [vmem:[%s3707_s4 + $0x30] sm:$0xff]  }
  0xc0   : > { %v2541_v50 = vunpack.i.h.bf16 %v2539_v4  ;;  %v2540_v6 = vunpack.i.l.bf16 %v2539_v4  ;;  %v1014_v58 = vsel %vm644_vm3, %v1006_v61, %v2545_v3  ;;  %v1015_v8 = vsel %vm644_vm3, %v1007_v59, %v2546_v2 }
  0xc1   : > { %v2554_v30 = vpop.permute.xlu1 %2553 }
  0xc2   : > { %v1012_v45 = vsel %vm644_vm3, %v1004_v62, %v2540_v6  ;;  %v1013_v9 = vsel %vm644_vm3, %v1005_v44, %v2541_v50  ;;  %v2556_v38 = vunpack.i.h.bf16 %v2554_v30  ;;  %v2555_v11 = vunpack.i.l.bf16 %v2554_v30  ;;  %v3110_v30 = vld [vmem:[%s3707_s4 + $0x10] sm:$0xff]  }
  0xc3   : > { %v2549_v42 = vpop.permute.xlu0 %2548  ;;  %v2673_v6 = vmov 65535  }
  0xc4   : > { %v2551_v12 = vunpack.i.h.bf16 %v2549_v42  ;;  %v2550_v40 = vunpack.i.l.bf16 %v2549_v42  ;;  %v1022_v17 = vsel %vm653_vm4, %v1014_v58, %v2555_v11  ;;  %v1023_v33 = vsel %vm653_vm4, %v1015_v8, %v2556_v38  ;;  %v509_v8 = vld [vmem:[%s3709_s6] sm:$0x3] }
  0xc5   : > { %v1059_v18 = vrot.slane %v1022_v17, 1  ;;  %v1062_v19 = vrot.slane %v1023_v33, 1  ;;  %v1391_v23 = vpop.permute.xlu1 %1390  ;;  %v850_v58 = vsel %vm489_vm0, 4294967295, %v2673_v6  ;;  %v3117_v38 = vld [vmem:[%s419_s26] ss:$0 sm:$0xff]  ;;  %s2236_s26 = sshll.u32 %s2783_s25, 6 }
  0xc6   : > { %v1020_v20 = vsel %vm653_vm4, %v1012_v45, %v2550_v40  ;;  %v1021_v22 = vsel %vm653_vm4, %v1013_v9, %v2551_v12  ;;  %v851_v45 = vsel %vm849_vm6, %v850_v58, 0  ;;  %v3122_v11 = vld [vmem:[%s3708_s5] ss:$0 sm:$0xff]  ;;  %s3454_s29 = scalar_lea.vmem %s3711_s8, %s2236_s26  ;;  %s2033_s26 = sshll.u32 %s3392_s21, 4  ;;  %s3541_s26 = int_to_ptr.vmem [resolvable:$true] %s2033_s26 }
  0xc7   : > { %v1053_v26 = vrot.slane %v1020_v20, 1  ;;  %v1056_v29 = vrot.slane %v1021_v22, 1  ;;  %v1388_v31 = vpop.permute.xlu0 %1387  ;;  %v3061_v35 = vsel %vm534_vm1, %v1058_v15, %v1059_v18  ;;  %v3064_v36 = vsel %vm534_vm1, %v1061_v16, %v1062_v19 }
  0xc8   : > { %v1396_v34 = vsel %vm635_vm2, %v2857_v53, %v1388_v31  ;;  %v1075_v47 = vpack.c.bf16 %v3064_v36, %v3061_v35  ;;  %v3100_v9 = vand.u32 %v851_v45, %v509_v8 }
  0xc9   : > { %v1397_v37 = vsel %vm644_vm3, %v1396_v34, %v1391_v23  ;;  %v3068_v41 = vsel %vm534_vm1, %v1052_v24, %v1053_v26  ;;  %v3071_v46 = vsel %vm534_vm1, %v1055_v25, %v1056_v29  ;;  %v1635_v48 = vpop.permute.xlu1 %1634  ;;  %v3136_v26 = vld [vmem:[%s422_s11] ss:$0 sm:$0xff]  ;;  %s2609_s11 = sshll.u32 %s2675_s30, 4  ;;  %s2610_s11 = int_to_ptr.vmem [resolvable:$false] %s2609_s11 }
  0xca   : > { %v1074_v53 = vpack.c.bf16 %v3071_v46, %v3068_v41  ;;  %v1650_v52 = vpack.c.bf16 %v3068_v41, %v3024_v28  ;;  %v1651_v49 = vpack.c.bf16 %v3061_v35, %v3071_v46  ;;  %v1640_v59 = vsel %vm635_vm2, %v2884_v7, %v1635_v48  ;;  %2314 = vmatprep.subr.bf16.mxu1 %v3100_v9  ;;  %p2612_p0 = scmp.lt.s32.totalorder %s3541_s26, %s2610_s11 }
  0xcb   : > { %v1394_v27 = vpop.permute.xlu0 %1393  ;;  %v1641_v44 = vsel %vm644_vm3, %v1640_v59, %v1391_v23  ;;  %2336 = vmatprep.subr.bf16.mxu0 %v3100_v9  ;;  %2315 = vmatpush3.bf16.msra.mxu1 %v3100_v9 }
  0xcc   : > { %v3084_v61 = vsel %vm653_vm4, %v1397_v37, %v1394_v27  ;;  %2337 = vmatpush3.bf16.msra.mxu0 %v3100_v9  ;;  %2324 = vmatprep.subr.bf16.mxu1 %v3110_v30 }
  0xcd   : > { %v1402_v62 = vpack.c.bf16 %v3084_v61, %v2983_v51  ;;  %v1645_v63 = vrot.slane %v3084_v61, 1  ;;  %2358 = vmatprep.subr.bf16.mxu0 %v3100_v9 }
  0xcf   : > { %v1638_v2 = vpop.permute.xlu0 %1637 }
  0xd0   : > { %v1642_v3 = vsel %vm653_vm4, %v1641_v44, %v1638_v2 }
  0xd1   : > { %v1646_v4 = vrot.slane %v1642_v3, 1 }
  0xd3   : > { %v3092_v50 = vsel %vm534_vm1, %v1645_v63, %v1646_v4 }
  0xd4   : > { %v1652_v7 = vpack.c.bf16 %v3092_v50, %v3064_v36 }
 0x17d   : > { %v2308_v42 = vpop.f32.mrb[0].mxu0 }
 0x17e   : > { %v768_v12 = vmul.f32 %v2308_v42, %v3117_v38  ;;  %v729_v40 = vpop.f32.mrb[1].mxu0 }
 0x17f   : > { %v766_v15 = vmul.f32 %v3117_v38, %v729_v40  ;;  %v2309_v16 = vpop.f32.mrb[2].mxu0 }
 0x180   : > { %v782_v17 = vadd.f32 %v3122_v11, %v768_v12  ;;  %v769_v33 = vmul.f32 %v2309_v16, %v3117_v38  ;;  %v732_v18 = vpop.f32.mrb[3].mxu0 }
 0x181   : > { %v780_v19 = vadd.f32 %v3122_v11, %v766_v15  ;;  %v767_v20 = vmul.f32 %v3117_v38, %v732_v18 }
 0x182   : > { %vm790_vm7 = vcmp.ge.f32.partialorder %v782_v17, 0.0  ;;  %v798_v22 = vmul.f32 0.2, %v782_v17  ;;  %v783_v23 = vadd.f32 %v3122_v11, %v769_v33 }
 0x183   : > { %v796_v24 = vmul.f32 0.2, %v780_v19  ;;  %v781_v25 = vadd.f32 %v3122_v11, %v767_v20  ;;  %vm788_vm8 = vcmp.ge.f32.partialorder %v780_v19, 0.0 }
 0x184   : > { %v3138_v29 = vsel %vm790_vm7, %v782_v17, %v798_v22  ;;  %vm791_vm9 = vcmp.ge.f32.partialorder %v783_v23, 0.0  ;;  %v799_v31 = vmul.f32 0.2, %v783_v23  ;;  %v2600_v22 = vld [vmem:[%s3707_s4 + $0x18] sm:$0xff]  }
 0x185   : > { %v797_v34 = vmul.f32 0.2, %v781_v25  ;;  %v2312_v37 = vpop.f32.mrb[4].mxu0  ;;  %vm789_vm10 = vcmp.ge.f32.partialorder %v781_v25, 0.0  ;;  %v3140_v48 = vsel %vm788_vm8, %v780_v19, %v796_v24  ;;  %v820_v63 = vmul.f32 %v3136_v26, %v3138_v29 }
 0x186   : > { %v3142_v27 = vsel %vm791_vm9, %v783_v23, %v799_v31  ;;  %v772_v59 = vmul.f32 %v2312_v37, %v3117_v38  ;;  %v745_v44 = vpop.f32.mrb[5].mxu0  ;;  %v818_v42 = vmul.f32 %v3136_v26, %v3140_v48 }
 0x187   : > { %v821_v2 = vmul.f32 %v3136_v26, %v3142_v27  ;;  %v770_v3 = vmul.f32 %v3117_v38, %v745_v44  ;;  %v2313_v4 = vpop.f32.mrb[6].mxu0  ;;  %v3150_v6 = vsel %vm789_vm10, %v781_v25, %v797_v34  ;;  %v2601_v44 = vld [vmem:[%s3707_s4 + $0x20] sm:$0xff]  }
 0x188   : > { %v786_v58 = vadd.f32 %v3122_v11, %v772_v59  ;;  %v773_v8 = vmul.f32 %v2313_v4, %v3117_v38  ;;  %v748_v45 = vpop.f32.mrb[7].mxu0  ;;  %v819_v12 = vmul.f32 %v3136_v26, %v3150_v6 }
 0x189   : > { %v784_v40 = vadd.f32 %v3122_v11, %v770_v3  ;;  %v771_v15 = vmul.f32 %v3117_v38, %v748_v45  ;;  %v827_v18 = vpack.c.bf16 %v821_v2, %v820_v63 }
 0x18a   : > { %v802_v16 = vmul.f32 0.2, %v786_v58  ;;  %v787_v17 = vadd.f32 %v3122_v11, %v773_v8  ;;  %v826_v33 = vpack.c.bf16 %v819_v12, %v818_v42  ;;  %vm794_vm12 = vcmp.ge.f32.partialorder %v786_v58, 0.0 }
 0x18b   : > { %vm792_vm13 = vcmp.ge.f32.partialorder %v784_v40, 0.0  ;;  %v800_v19 = vmul.f32 0.2, %v784_v40  ;;  %v785_v20 = vadd.f32 %v3122_v11, %v771_v15 }
 0x18c   : > { %vm795_vm14 = vcmp.ge.f32.partialorder %v787_v17, 0.0  ;;  %v803_v23 = vmul.f32 0.2, %v787_v17  ;;  %2316 = vmatprep.mubr.msk.bf16.mxu1 %vm836_vm11, %v826_v33  ;;  %v3169_v31 = vsel %vm794_vm12, %v786_v58, %v802_v16  ;;  %v2602_v58 = vld [vmem:[%s3707_s4 + $0x28] sm:$0xff]  }
 0x18d   : > { %v3166_v24 = vsel %vm792_vm13, %v784_v40, %v800_v19  ;;  %vm793_vm15 = vcmp.ge.f32.partialorder %v785_v20, 0.0  ;;  %v801_v25 = vmul.f32 0.2, %v785_v20  ;;  %2317 = vmatmul.mubr.msk.bf16.vlgmr.msra.gmra.mrb[0].mxu1 %vm836_vm11, %v827_v18  ;;  %v824_v3 = vmul.f32 %v3136_v26, %v3169_v31 }
 0x18e   : > { %v3171_v34 = vsel %vm795_vm14, %v787_v17, %v803_v23  ;;  %2325 = vmatpush3.bf16.msra.mxu1 %v3110_v30  ;;  %v822_v63 = vmul.f32 %v3136_v26, %v3166_v24 }
 0x18f   : > { %v825_v37 = vmul.f32 %v3136_v26, %v3171_v34  ;;  %v3176_v59 = vsel %vm793_vm15, %v785_v20, %v801_v25  ;;  %2326 = vmatprep.subr.bf16.mxu1 %v2600_v22 }
 0x190   : > { %v823_v2 = vmul.f32 %v3136_v26, %v3176_v59 }
 0x191   : > { %v829_v4 = vpack.c.bf16 %v825_v37, %v824_v3 }
 0x192   : > { %v828_v30 = vpack.c.bf16 %v823_v2, %v822_v63  ;;  %2327 = vmatpush3.bf16.msra.mxu1 %v2600_v22 }
 0x193   : > { %2346 = vmatprep.subr.bf16.mxu1 %v2601_v44 }
 0x194   : > { %2320 = vmatprep.mubr.msk.bf16.mxu1 %vm836_vm11, %v828_v30 }
 0x195   : > { %2321 = vmatmul.mubr.msk.bf16.gmra.mrb[4].mxu1 %vm836_vm11, %v829_v4 }
 0x196   : > { %2328 = vmatprep.mubr.msk.bf16.mxu1 %vm682_vm5, %v1072_v55 }
 0x19d   : > { %2329 = vmatmul.mubr.msk.bf16.vlgmr.msra.gmra.mrb[8].mxu1 %vm682_vm5, %v1073_v56  ;;  %v2604_v56 = vld [vmem:[%s3707_s4 + $0x38] sm:$0xff]  }
 0x19e   : > { %2347 = vmatpush3.bf16.msra.mxu1 %v2601_v44  ;;  %2332 = vmatprep.mubr.msk.bf16.mxu1 %vm682_vm5, %v1074_v53 }
 0x19f   : > { %2348 = vmatprep.subr.bf16.mxu1 %v2602_v58 }
 0x1a2   : > { %2349 = vmatpush3.bf16.msra.mxu1 %v2602_v58 }
 0x1a3   : > { %2368 = vmatprep.subr.bf16.mxu1 %v2603_v60 }
 0x1a5   : > { %2333 = vmatmul.mubr.msk.bf16.gmra.mrb[12].mxu1 %vm682_vm5, %v1075_v47 }
 0x1a6   : > { %2350 = vmatprep.mubr.msk.bf16.mxu1 %vm682_vm5, %v1399_v21 }
 0x1ad   : > { %2351 = vmatmul.mubr.msk.bf16.vlgmr.msra.gmra.mrb[16].mxu1 %vm682_vm5, %v1400_v57 }
 0x1ae   : > { %2369 = vmatpush3.bf16.msra.mxu1 %v2603_v60  ;;  %2354 = vmatprep.mubr.msk.bf16.mxu1 %vm682_vm5, %v1401_v1 }
 0x1af   : > { %2370 = vmatprep.subr.bf16.mxu1 %v2604_v56 }
 0x1b2   : > { %2371 = vmatpush3.bf16.msra.mxu1 %v2604_v56 }
 0x1b5   : > { %2355 = vmatmul.mubr.msk.bf16.gmra.mrb[20].mxu1 %vm682_vm5, %v1402_v62 }
 0x1b6   : > { %2372 = vmatprep.mubr.msk.bf16.mxu1 %vm682_vm5, %v1649_v5 }
 0x1bd   : > { %2373 = vmatmul.mubr.msk.bf16.vlgmr.msra.gmra.mrb[24].mxu1 %vm682_vm5, %v1650_v52 }
 0x1be   : > { %2376 = vmatprep.mubr.msk.bf16.mxu1 %vm682_vm5, %v1651_v49 }
 0x1c5   : > { %2377 = vmatmul.mubr.msk.bf16.gmra.mrb[28].mxu1 %vm682_vm5, %v1652_v7 }
 0x260   : > { %v3246_v10 = vpop.f32.mrb[0].mxu1 }
 0x261   : > { %v3248_v32 = vpop.f32.mrb[1].mxu1 }
 0x262   : > { %v3250_v14 = vpop.f32.mrb[2].mxu1 }
 0x263   : > { %v3252_v21 = vpop.f32.mrb[3].mxu1 }
 0x268   : > { %v3254_v39 = vpop.f32.mrb[4].mxu1 }
 0x269   : > { %v3256_v51 = vpop.f32.mrb[5].mxu1 }
 0x26a   : > { %v3258_v54 = vpop.f32.mrb[6].mxu1 }
 0x26b   : > { %v3260_v43 = vpop.f32.mrb[7].mxu1 }
 0x270   : > { %v2330_v57 = vpop.f32.mrb[8].mxu1 }
 0x271   : > { %v1172_v1 = vmul.f32 %v2330_v57, %v3117_v38  ;;  %v1139_v13 = vpop.f32.mrb[9].mxu1 }
 0x272   : > { %v1170_v28 = vmul.f32 %v3117_v38, %v1139_v13  ;;  %v2331_v0 = vpop.f32.mrb[10].mxu1 }
 0x273   : > { %v1180_v55 = vadd.f32 %v3122_v11, %v1172_v1  ;;  %v1173_v5 = vmul.f32 %v2331_v0, %v3117_v38  ;;  %v1142_v35 = vpop.f32.mrb[11].mxu1 }
 0x274   : > { %v1178_v36 = vadd.f32 %v3122_v11, %v1170_v28  ;;  %v1171_v41 = vmul.f32 %v3117_v38, %v1142_v35 }
 0x275   : > { %vm1188_vm0 = vcmp.ge.f32.partialorder %v1180_v55, 0.0  ;;  %v1196_v46 = vmul.f32 0.2, %v1180_v55  ;;  %v1181_v47 = vadd.f32 %v3122_v11, %v1173_v5 }
 0x276   : > { %vm1186_vm1 = vcmp.ge.f32.partialorder %v1178_v36, 0.0  ;;  %v1194_v53 = vmul.f32 0.2, %v1178_v36  ;;  %v1179_v52 = vadd.f32 %v3122_v11, %v1171_v41 }
 0x277   : > { %vm1189_vm2 = vcmp.ge.f32.partialorder %v1181_v47, 0.0  ;;  %v1197_v49 = vmul.f32 0.2, %v1181_v47  ;;  %v1204_v61 = vsel %vm1188_vm0, %v1180_v55, %v1196_v46 }
 0x278   : > { %vm1187_vm3 = vcmp.ge.f32.partialorder %v1179_v52, 0.0  ;;  %v1195_v62 = vmul.f32 0.2, %v1179_v52  ;;  %v2334_v50 = vpop.f32.mrb[12].mxu1  ;;  %v1202_v7 = vsel %vm1186_vm1, %v1178_v36, %v1194_v53  ;;  %v1212_v12 = vmul.f32 %v3136_v26, %v1204_v61 }
 0x279   : > { %v1176_v8 = vmul.f32 %v2334_v50, %v3117_v38  ;;  %v1155_v45 = vpop.f32.mrb[13].mxu1  ;;  %v1205_v42 = vsel %vm1189_vm2, %v1181_v47, %v1197_v49  ;;  %v1210_v40 = vmul.f32 %v3136_v26, %v1202_v7 }
 0x27a   : > { %v1174_v15 = vmul.f32 %v3117_v38, %v1155_v45  ;;  %v2335_v16 = vpop.f32.mrb[14].mxu1  ;;  %v2557_v17 = vpack.i.bf16 %v1205_v42, %v1204_v61  ;;  %v1213_v33 = vmul.f32 %v3136_v26, %v1205_v42  ;;  %v1203_v18 = vsel %vm1187_vm3, %v1179_v52, %v1195_v62 }
 0x27b   : > { %v1184_v19 = vadd.f32 %v3122_v11, %v1176_v8  ;;  %v1177_v20 = vmul.f32 %v2335_v16, %v3117_v38  ;;  %v1158_v22 = vpop.f32.mrb[15].mxu1  ;;  %v2562_v23 = vpack.i.bf16 %v1203_v18, %v1202_v7  ;;  %v1211_v25 = vmul.f32 %v3136_v26, %v1203_v18 }
 0x27c   : > { %v1182_v37 = vadd.f32 %v3122_v11, %v1174_v15  ;;  %v1175_v44 = vmul.f32 %v3117_v38, %v1158_v22  ;;  %2558 = vrot.lane.b32.xlu0 %v2557_v17, %s3714_s12  ;;  %v1219_v63 = vpack.c.bf16 %v1213_v33, %v1212_v12 }
 0x27d   : > { %vm1192_vm4 = vcmp.ge.f32.partialorder %v1184_v19, 0.0  ;;  %v1200_v2 = vmul.f32 0.2, %v1184_v19  ;;  %v1185_v3 = vadd.f32 %v3122_v11, %v1177_v20  ;;  %2563 = vrot.lane.b32.xlu1 %v2562_v23, %s3714_s12  ;;  %v1218_v30 = vpack.c.bf16 %v1211_v25, %v1210_v40 }
 0x27e   : > { %vm1190_vm5 = vcmp.ge.f32.partialorder %v1182_v37, 0.0  ;;  %v1198_v4 = vmul.f32 0.2, %v1182_v37  ;;  %v1183_v58 = vadd.f32 %v3122_v11, %v1175_v44 }
 0x27f   : > { %vm1193_vm6 = vcmp.ge.f32.partialorder %v1185_v3, 0.0  ;;  %v1201_v60 = vmul.f32 0.2, %v1185_v3  ;;  %2338 = vmatprep.mubr.msk.bf16.mxu0 %vm836_vm11, %v1218_v30  ;;  %v1208_v56 = vsel %vm1192_vm4, %v1184_v19, %v1200_v2 }
 0x280   : > { %vm1191_vm7 = vcmp.ge.f32.partialorder %v1183_v58, 0.0  ;;  %v1199_v57 = vmul.f32 0.2, %v1183_v58  ;;  %2339 = vmatmul.mubr.msk.bf16.vlgmr.msra.gmra.mrb[8].mxu0 %vm836_vm11, %v1219_v63  ;;  %v2352_v1 = vpop.f32.mrb[16].mxu1  ;;  %v1206_v13 = vsel %vm1190_vm5, %v1182_v37, %v1198_v4  ;;  %v1216_v5 = vmul.f32 %v3136_v26, %v1208_v56 }
 0x281   : > { %v1499_v28 = vmul.f32 %v2352_v1, %v3117_v38  ;;  %2359 = vmatpush3.bf16.msra.mxu0 %v3100_v9  ;;  %v1466_v0 = vpop.f32.mrb[17].mxu1  ;;  %v1209_v55 = vsel %vm1193_vm6, %v1185_v3, %v1201_v60  ;;  %v1214_v35 = vmul.f32 %v3136_v26, %v1206_v13 }
 0x282   : > { %v1497_v36 = vmul.f32 %v3117_v38, %v1466_v0  ;;  %v2353_v41 = vpop.f32.mrb[18].mxu1  ;;  %v2567_v46 = vpack.i.bf16 %v1209_v55, %v1208_v56  ;;  %v1217_v47 = vmul.f32 %v3136_v26, %v1209_v55  ;;  %v1207_v53 = vsel %vm1191_vm7, %v1183_v58, %v1199_v57  ;;  %2380 = vmatprep.subr.bf16.mxu0 %v3100_v9 }
 0x283   : > { %v1507_v52 = vadd.f32 %v3122_v11, %v1499_v28  ;;  %v1500_v49 = vmul.f32 %v2353_v41, %v3117_v38  ;;  %v1469_v61 = vpop.f32.mrb[19].mxu1  ;;  %v2572_v62 = vpack.i.bf16 %v1207_v53, %v1206_v13  ;;  %v1215_v50 = vmul.f32 %v3136_v26, %v1207_v53 }
 0x284   : > { %v1505_v7 = vadd.f32 %v3122_v11, %v1497_v36  ;;  %v1498_v8 = vmul.f32 %v3117_v38, %v1469_v61  ;;  %2568 = vrot.lane.b32.xlu0 %v2567_v46, %s3714_s12  ;;  %v1221_v45 = vpack.c.bf16 %v1217_v47, %v1216_v5 }
 0x285   : > { %vm1515_vm8 = vcmp.ge.f32.partialorder %v1507_v52, 0.0  ;;  %v1523_v42 = vmul.f32 0.2, %v1507_v52  ;;  %v1508_v12 = vadd.f32 %v3122_v11, %v1500_v49  ;;  %2573 = vrot.lane.b32.xlu1 %v2572_v62, %s3714_s12  ;;  %v1220_v40 = vpack.c.bf16 %v1215_v50, %v1214_v35 }
 0x286   : > { %vm1513_vm9 = vcmp.ge.f32.partialorder %v1505_v7, 0.0  ;;  %v1521_v15 = vmul.f32 0.2, %v1505_v7  ;;  %v1506_v16 = vadd.f32 %v3122_v11, %v1498_v8 }
 0x287   : > { %v3302_v17 = vsel %vm1515_vm8, %v1507_v52, %v1523_v42  ;;  %vm1516_vm10 = vcmp.ge.f32.partialorder %v1508_v12, 0.0  ;;  %v1524_v33 = vmul.f32 0.2, %v1508_v12  ;;  %2342 = vmatprep.mubr.msk.bf16.mxu0 %vm836_vm11, %v1220_v40 }
 0x288   : > { %v3305_v18 = vsel %vm1513_vm9, %v1505_v7, %v1521_v15  ;;  %vm1514_vm12 = vcmp.ge.f32.partialorder %v1506_v16, 0.0  ;;  %v1522_v19 = vmul.f32 0.2, %v1506_v16  ;;  %2343 = vmatmul.mubr.msk.bf16.gmra.mrb[12].mxu0 %vm836_vm11, %v1221_v45  ;;  %v2356_v20 = vpop.f32.mrb[20].mxu1  ;;  %v1539_v37 = vmul.f32 %v3136_v26, %v3302_v17 }
 0x289   : > { %v3308_v22 = vsel %vm1516_vm10, %v1508_v12, %v1524_v33  ;;  %v1503_v23 = vmul.f32 %v2356_v20, %v3117_v38  ;;  %v1482_v25 = vpop.f32.mrb[21].mxu1  ;;  %v1537_v30 = vmul.f32 %v3136_v26, %v3305_v18  ;;  %vm1980_vm9 = vcmask 44032  }
 0x28a   : > { %v1540_v44 = vmul.f32 %v3136_v26, %v3308_v22  ;;  %v3315_v63 = vsel %vm1514_vm12, %v1506_v16, %v1522_v19  ;;  %v1501_v2 = vmul.f32 %v3117_v38, %v1482_v25  ;;  %v2357_v3 = vpop.f32.mrb[22].mxu1 }
 0x28b   : > { %v1538_v4 = vmul.f32 %v3136_v26, %v3315_v63  ;;  %v1511_v58 = vadd.f32 %v3122_v11, %v1503_v23  ;;  %v1504_v60 = vmul.f32 %v2357_v3, %v3117_v38  ;;  %v1485_v56 = vpop.f32.mrb[23].mxu1 }
 0x28c   : > { %v1509_v57 = vadd.f32 %v3122_v11, %v1501_v2  ;;  %v1502_v1 = vmul.f32 %v3117_v38, %v1485_v56  ;;  %v1546_v13 = vpack.c.bf16 %v1540_v44, %v1539_v37 }
 0x28d   : > { %v1527_v28 = vmul.f32 0.2, %v1511_v58  ;;  %v1512_v0 = vadd.f32 %v3122_v11, %v1504_v60  ;;  %v1545_v55 = vpack.c.bf16 %v1538_v4, %v1537_v30  ;;  %vm1519_vm13 = vcmp.ge.f32.partialorder %v1511_v58, 0.0 }
 0x28e   : > { %vm1517_vm14 = vcmp.ge.f32.partialorder %v1509_v57, 0.0  ;;  %v1525_v5 = vmul.f32 0.2, %v1509_v57  ;;  %v1510_v35 = vadd.f32 %v3122_v11, %v1502_v1 }
 0x28f   : > { %vm1520_vm15 = vcmp.ge.f32.partialorder %v1512_v0, 0.0  ;;  %v1528_v36 = vmul.f32 0.2, %v1512_v0  ;;  %2360 = vmatprep.mubr.msk.bf16.mxu0 %vm836_vm11, %v1545_v55  ;;  %v3332_v53 = vsel %vm1519_vm13, %v1511_v58, %v1527_v28 }
 0x290   : > { %v3329_v41 = vsel %vm1517_vm14, %v1509_v57, %v1525_v5  ;;  %vm1518_vm0 = vcmp.ge.f32.partialorder %v1510_v35, 0.0  ;;  %v1526_v46 = vmul.f32 0.2, %v1510_v35  ;;  %2361 = vmatmul.mubr.msk.bf16.vlgmr.msra.gmra.mrb[16].mxu0 %vm836_vm11, %v1546_v13  ;;  %v2374_v47 = vpop.f32.mrb[24].mxu1  ;;  %v1543_v15 = vmul.f32 %v3136_v26, %v3332_v53 }
 0x291   : > { %v3334_v52 = vsel %vm1520_vm15, %v1512_v0, %v1528_v36  ;;  %v1749_v49 = vmul.f32 %v2374_v47, %v3117_v38  ;;  %2381 = vmatpush3.bf16.msra.mxu0 %v3100_v9  ;;  %v1716_v61 = vpop.f32.mrb[25].mxu1  ;;  %v1541_v45 = vmul.f32 %v3136_v26, %v3329_v41 }
 0x292   : > { %v1544_v62 = vmul.f32 %v3136_v26, %v3334_v52  ;;  %v3340_v50 = vsel %vm1518_vm0, %v1510_v35, %v1526_v46  ;;  %v1747_v7 = vmul.f32 %v3117_v38, %v1716_v61  ;;  %v2375_v8 = vpop.f32.mrb[26].mxu1 }
 0x293   : > { %v1542_v42 = vmul.f32 %v3136_v26, %v3340_v50  ;;  %v1757_v12 = vadd.f32 %v3122_v11, %v1749_v49  ;;  %v1750_v40 = vmul.f32 %v2375_v8, %v3117_v38  ;;  %v1719_v9 = vpop.f32.mrb[27].mxu1 }
 0x294   : > { %v1755_v16 = vadd.f32 %v3122_v11, %v1747_v7  ;;  %v1748_v33 = vmul.f32 %v3117_v38, %v1719_v9  ;;  %v1548_v44 = vpack.c.bf16 %v1544_v62, %v1543_v15 }
 0x295   : > { %vm1765_vm1 = vcmp.ge.f32.partialorder %v1757_v12, 0.0  ;;  %v1773_v19 = vmul.f32 0.2, %v1757_v12  ;;  %v1758_v20 = vadd.f32 %v3122_v11, %v1750_v40  ;;  %v1547_v23 = vpack.c.bf16 %v1542_v42, %v1541_v45 }
 0x296   : > { %vm1763_vm2 = vcmp.ge.f32.partialorder %v1755_v16, 0.0  ;;  %v1771_v25 = vmul.f32 0.2, %v1755_v16  ;;  %v1756_v37 = vadd.f32 %v3122_v11, %v1748_v33 }
 0x297   : > { %vm1766_vm3 = vcmp.ge.f32.partialorder %v1758_v20, 0.0  ;;  %v1774_v2 = vmul.f32 0.2, %v1758_v20  ;;  %2364 = vmatprep.mubr.msk.bf16.mxu0 %vm836_vm11, %v1547_v23  ;;  %v1781_v3 = vsel %vm1765_vm1, %v1757_v12, %v1773_v19 }
 0x298   : > { %vm1764_vm4 = vcmp.ge.f32.partialorder %v1756_v37, 0.0  ;;  %v1772_v30 = vmul.f32 0.2, %v1756_v37  ;;  %2365 = vmatmul.mubr.msk.bf16.gmra.mrb[20].mxu0 %vm836_vm11, %v1548_v44  ;;  %v2378_v4 = vpop.f32.mrb[28].mxu1  ;;  %v1779_v58 = vsel %vm1763_vm2, %v1755_v16, %v1771_v25  ;;  %v1789_v1 = vmul.f32 %v3136_v26, %v1781_v3 }
 0x299   : > { %v1753_v60 = vmul.f32 %v2378_v4, %v3117_v38  ;;  %v1732_v56 = vpop.f32.mrb[29].mxu1  ;;  %v1782_v57 = vsel %vm1766_vm3, %v1758_v20, %v1774_v2  ;;  %v1787_v13 = vmul.f32 %v3136_v26, %v1779_v58 }
 0x29a   : > { %v1751_v28 = vmul.f32 %v3117_v38, %v1732_v56  ;;  %v2379_v0 = vpop.f32.mrb[30].mxu1  ;;  %v2577_v55 = vpack.i.bf16 %v1782_v57, %v1781_v3  ;;  %v1790_v5 = vmul.f32 %v3136_v26, %v1782_v57  ;;  %v1780_v35 = vsel %vm1764_vm4, %v1756_v37, %v1772_v30 }
 0x29b   : > { %v1761_v36 = vadd.f32 %v3122_v11, %v1753_v60  ;;  %v1754_v46 = vmul.f32 %v2379_v0, %v3117_v38  ;;  %v1735_v47 = vpop.f32.mrb[31].mxu1  ;;  %v2582_v49 = vpack.i.bf16 %v1780_v35, %v1779_v58  ;;  %v1788_v61 = vmul.f32 %v3136_v26, %v1780_v35 }
 0x29c   : > { %v1759_v62 = vadd.f32 %v3122_v11, %v1751_v28  ;;  %v1752_v7 = vmul.f32 %v3117_v38, %v1735_v47  ;;  %2578 = vrot.lane.b32.xlu0 %v2577_v55, %s3714_s12  ;;  %v1796_v8 = vpack.c.bf16 %v1790_v5, %v1789_v1 }
 0x29d   : > { %vm1769_vm5 = vcmp.ge.f32.partialorder %v1761_v36, 0.0  ;;  %v1777_v45 = vmul.f32 0.2, %v1761_v36  ;;  %v1762_v42 = vadd.f32 %v3122_v11, %v1754_v46  ;;  %2583 = vrot.lane.b32.xlu1 %v2582_v49, %s3714_s12  ;;  %v1795_v12 = vpack.c.bf16 %v1788_v61, %v1787_v13 }
 0x29e   : > { %vm1767_vm6 = vcmp.ge.f32.partialorder %v1759_v62, 0.0  ;;  %v1775_v40 = vmul.f32 0.2, %v1759_v62  ;;  %v1760_v9 = vadd.f32 %v3122_v11, %v1752_v7 }
 0x29f   : > { %vm1770_vm7 = vcmp.ge.f32.partialorder %v1762_v42, 0.0  ;;  %v1778_v15 = vmul.f32 0.2, %v1762_v42  ;;  %2382 = vmatprep.mubr.msk.bf16.mxu0 %vm836_vm11, %v1795_v12  ;;  %v1785_v16 = vsel %vm1769_vm5, %v1761_v36, %v1777_v45 }
 0x2a0   : > { %vm1768_vm8 = vcmp.ge.f32.partialorder %v1760_v9, 0.0  ;;  %v1776_v38 = vmul.f32 0.2, %v1760_v9  ;;  %2383 = vmatmul.mubr.msk.bf16.vlgmr.msra.gmra.mrb[24].mxu0 %vm836_vm11, %v1796_v8  ;;  %v1783_v33 = vsel %vm1767_vm6, %v1759_v62, %v1775_v40  ;;  %v1793_v20 = vmul.f32 %v3136_v26, %v1785_v16 }
 0x2a1   : > { %v1786_v19 = vsel %vm1770_vm7, %v1762_v42, %v1778_v15  ;;  %v1791_v11 = vmul.f32 %v3136_v26, %v1783_v33 }
 0x2a2   : > { %v2587_v23 = vpack.i.bf16 %v1786_v19, %v1785_v16  ;;  %v1794_v25 = vmul.f32 %v3136_v26, %v1786_v19  ;;  %v1784_v37 = vsel %vm1768_vm8, %v1760_v9, %v1776_v38 }
 0x2a3   : > { %v2592_v44 = vpack.i.bf16 %v1784_v37, %v1783_v33  ;;  %v1792_v2 = vmul.f32 %v3136_v26, %v1784_v37 }
 0x2a4   : > { %2588 = vrot.lane.b32.xlu0 %v2587_v23, %s3714_s12  ;;  %v1798_v3 = vpack.c.bf16 %v1794_v25, %v1793_v20 }
 0x2a5   : > { %2593 = vrot.lane.b32.xlu1 %v2592_v44, %s3714_s12  ;;  %v1797_v30 = vpack.c.bf16 %v1792_v2, %v1791_v11 }
 0x2a7   : > { %2386 = vmatprep.mubr.msk.bf16.mxu0 %vm836_vm11, %v1797_v30 }
 0x2a8   : > { %2387 = vmatmul.mubr.msk.bf16.gmra.mrb[28].mxu0 %vm836_vm11, %v1798_v3 }
 0x2ee   : > { %v2559_v4 = vpop.permute.xlu0 %2558 }
 0x2ef   : > { %v2561_v58 = vunpack.i.h.bf16 %v2559_v4  ;;  %v2560_v60 = vunpack.i.l.bf16 %v2559_v4  ;;  %v2564_v56 = vpop.permute.xlu1 %2563 }
 0x2f0   : > { %v2566_v57 = vunpack.i.h.bf16 %v2564_v56  ;;  %v2565_v1 = vunpack.i.l.bf16 %v2564_v56 }
 0x2f1   : > { %v1342_v26 = vsel %vm836_vm11, %v3142_v27, %v2561_v58  ;;  %v1341_v13 = vsel %vm836_vm11, %v3138_v29, %v2560_v60 }
 0x2f2   : > { %v1970_v28 = vpack.c.bf16 %v1342_v26, %v1342_v26  ;;  %v1968_v0 = vpack.c.bf16 %v1341_v13, %v1341_v13  ;;  %v1340_v55 = vsel %vm836_vm11, %v3150_v6, %v2566_v57  ;;  %v1339_v5 = vsel %vm836_vm11, %v3140_v48, %v2565_v1  ;;  %v3463_v57 = vld [vmem:[%s3454_s29 + $0x10] sm:$0xff] }
 0x2f3   : > { %v1966_v35 = vpack.c.bf16 %v1340_v55, %v1340_v55  ;;  %v1964_v36 = vpack.c.bf16 %v1339_v5, %v1339_v5  ;;  %v3469_v55 = vld [vmem:[%s3454_s29 + $0x18] sm:$0xff] }
 0x2f4   : > { %1985 = vst.msk [vmem:[%s3392_s21 + $0x10] sm:$0xf] %vm1980_vm9, %v1968_v0  ;;  %1987 = vst.msk [vmem:[%s3392_s21 + $0x18] sm:$0xf] %vm1980_vm9, %v1970_v28 }
 0x2f5   : > { %1981 = vst.msk [vmem:[%s3392_s21] sm:$0xf] %vm1980_vm9, %v1964_v36  ;;  %1983 = vst.msk [vmem:[%s3392_s21 + $0x8] sm:$0xf] %vm1980_vm9, %v1966_v35  ;;  %v3475_v36 = vld [vmem:[%s3454_s29] sm:$0xff] }
 0x2f6   : > { %v2569_v29 = vpop.permute.xlu0 %2568 }
 0x2f7   : > { %v2571_v48 = vunpack.i.h.bf16 %v2569_v29  ;;  %v2570_v27 = vunpack.i.l.bf16 %v2569_v29  ;;  %v2574_v6 = vpop.permute.xlu1 %2573 }
 0x2f8   : > { %v2576_v46 = vunpack.i.h.bf16 %v2574_v6  ;;  %v2575_v47 = vunpack.i.l.bf16 %v2574_v6 }
 0x2f9   : > { %v1346_v49 = vsel %vm836_vm11, %v3171_v34, %v2571_v48  ;;  %v1345_v61 = vsel %vm836_vm11, %v3169_v31, %v2570_v27  ;;  %v3480_v48 = vld [vmem:[%s3454_s29 + $0x8] sm:$0xff] }
 0x2fa   : > { %v1978_v62 = vpack.c.bf16 %v1346_v49, %v1346_v49  ;;  %v1976_v7 = vpack.c.bf16 %v1345_v61, %v1345_v61  ;;  %v1344_v8 = vsel %vm836_vm11, %v3176_v59, %v2576_v46  ;;  %v1343_v45 = vsel %vm836_vm11, %v3166_v24, %v2575_v47  ;;  %v3486_v49 = vld [vmem:[%s3454_s29 + $0x30] sm:$0xff] }
 0x2fb   : > { %v1974_v42 = vpack.c.bf16 %v1344_v8, %v1344_v8  ;;  %v1972_v12 = vpack.c.bf16 %v1343_v45, %v1343_v45 }
 0x2fc   : > { %1993 = vst.msk [vmem:[%s3392_s21 + $0x30] sm:$0xf] %vm1980_vm9, %v1976_v7  ;;  %1995 = vst.msk [vmem:[%s3392_s21 + $0x38] sm:$0xf] %vm1980_vm9, %v1978_v62 }
 0x2fd   : > { %1989 = vst.msk [vmem:[%s3392_s21 + $0x20] sm:$0xf] %vm1980_vm9, %v1972_v12  ;;  %1991 = vst.msk [vmem:[%s3392_s21 + $0x28] sm:$0xf] %vm1980_vm9, %v1974_v42  ;;  %v3493_v42 = vld [vmem:[%s3454_s29 + $0x38] sm:$0xff] }
 0x30e   : > { %v2579_v31 = vpop.permute.xlu0 %2578 }
 0x30f   : > { %v2581_v34 = vunpack.i.h.bf16 %v2579_v31  ;;  %v2580_v59 = vunpack.i.l.bf16 %v2579_v31  ;;  %v2584_v40 = vpop.permute.xlu1 %2583 }
 0x310   : > { %v2586_v9 = vunpack.i.h.bf16 %v2584_v40  ;;  %v2585_v24 = vunpack.i.l.bf16 %v2584_v40  ;;  %v3504_v40 = vld [vmem:[%s3454_s29 + $0x28] sm:$0xff] }
 0x311   : > { %v1919_v15 = vsel %vm836_vm11, %v3308_v22, %v2581_v34  ;;  %v1918_v16 = vsel %vm836_vm11, %v3302_v17, %v2580_v59  ;;  %v3499_v34 = vld [vmem:[%s3454_s29 + $0x20] sm:$0xff]  ;;  %s3539_s29 = scalar_lea.hbm %s3712_s9, %s2238_s20  ;;  %s2611_s20 = scalar_lea.vmem %s2610_s11, 2048 }
 0x312   : > { %v1971_v38 = vpack.c.bf16 %v1919_v15, %v1919_v15  ;;  %v1969_v33 = vpack.c.bf16 %v1918_v16, %v1918_v16  ;;  %v1917_v19 = vsel %vm836_vm11, %v3315_v63, %v2586_v9  ;;  %v1916_v20 = vsel %vm836_vm11, %v3305_v18, %v2585_v24 }
 0x313   : > { %v1967_v23 = vpack.c.bf16 %v1917_v19, %v1917_v19  ;;  %v1965_v25 = vpack.c.bf16 %v1916_v20, %v1916_v20 }
 0x314   : > { %1986 = vst.msk [vmem:[%s3392_s21 + $0x14] sm:$0xf] %vm1980_vm9, %v1969_v33  ;;  %1988 = vst.msk [vmem:[%s3392_s21 + $0x1c] sm:$0xf] %vm1980_vm9, %v1971_v38 }
 0x315   : > { %1982 = vst.msk [vmem:[%s3392_s21 + $0x4] sm:$0xf] %vm1980_vm9, %v1965_v25  ;;  %1984 = vst.msk [vmem:[%s3392_s21 + $0xc] sm:$0xf] %vm1980_vm9, %v1967_v23 }
 0x316   : > { %v2589_v17 = vpop.permute.xlu0 %2588 }
 0x317   : > { %v2591_v22 = vunpack.i.h.bf16 %v2589_v17  ;;  %v2590_v63 = vunpack.i.l.bf16 %v2589_v17  ;;  %v2594_v37 = vpop.permute.xlu1 %2593 }
 0x318   : > { %v2596_v18 = vunpack.i.h.bf16 %v2594_v37  ;;  %v2595_v11 = vunpack.i.l.bf16 %v2594_v37 }
 0x319   : > { %v1923_v44 = vsel %vm836_vm11, %v3334_v52, %v2591_v22  ;;  %v1922_v2 = vsel %vm836_vm11, %v3332_v53, %v2590_v63 }
 0x31a   : > { %v1979_v3 = vpack.c.bf16 %v1923_v44, %v1923_v44  ;;  %v1977_v30 = vpack.c.bf16 %v1922_v2, %v1922_v2  ;;  %v1921_v4 = vsel %vm836_vm11, %v3340_v50, %v2596_v18  ;;  %v1920_v58 = vsel %vm836_vm11, %v3329_v41, %v2595_v11  ;;  %v3459_v41 = vld [vmem:[%s3710_s7] ss:$0 sm:$0xff] }
 0x31b   : > { %v1975_v60 = vpack.c.bf16 %v1921_v4, %v1921_v4  ;;  %v1973_v56 = vpack.c.bf16 %v1920_v58, %v1920_v58 }
 0x31c   : > { %1994 = vst.msk [vmem:[%s3392_s21 + $0x34] sm:$0xf] %vm1980_vm9, %v1977_v30  ;;  %1996 = vst.msk [vmem:[%s3392_s21 + $0x3c] sm:$0xf] %vm1980_vm9, %v1979_v3 }
 0x31d   : > { %1990 = vst.msk [vmem:[%s3392_s21 + $0x24] sm:$0xf] %vm1980_vm9, %v1973_v56  ;;  %1992 = vst.msk [vmem:[%s3392_s21 + $0x2c] sm:$0xf] %vm1980_vm9, %v1975_v60  ;;  %s2605_s21 = scalar_lea.vmem %s3541_s26, 1024 }
 0x31e   : > { %p2606_p11 = scmp.ne.s32.totalorder %s3541_s26, %s2605_s21  ;;  %p2613_p1 = scmp.lt.s32.totalorder %s2611_s20, %s2605_s21 }
 0x320   : > { %p2607_p12 = pnand %p2606_p11, %p2771_p5  ;;  %p2614_p2 = por %p2613_p1, %p2612_p0 }
 0x322   : > { %p2608_p13 = pneg %p2607_p12 }
 0x324   : > { %p2615_p3 = pnand %p2614_p2, %p2608_p13 }
 0x353   : > { %v2340_v53 = vpop.f32.mrb[8].mxu0 }
 0x354   : > { %v1277_v52 = vadd.f32 %v2340_v53, %v3459_v41  ;;  %v1268_v50 = vpop.f32.mrb[9].mxu0 }
 0x355   : > { %v2341_v1 = vpop.f32.mrb[10].mxu0  ;;  %v1269_v13 = vadd.f32 %v3459_v41, %v1268_v50 }
 0x356   : > { %v1301_v26 = vadd.f32 %v1277_v52, %v3463_v57  ;;  %v1280_v28 = vadd.f32 %v2341_v1, %v3459_v41  ;;  %v1271_v0 = vpop.f32.mrb[11].mxu0 }
 0x357   : > { %v1272_v35 = vadd.f32 %v3459_v41, %v1271_v0  ;;  %v1299_v29 = vadd.f32 %v1269_v13, %v3475_v36 }
 0x358   : > { %v1302_v5 = vadd.f32 %v1280_v28, %v3469_v55  ;;  %1359 = vrot.lane.b32.xlu1 %v1301_v26, %s3714_s12 }
 0x359   : > { %v1300_v6 = vadd.f32 %v1272_v35, %v3480_v48 }
 0x35a   : > { %1361 = vrot.lane.b32.xlu0 %v1302_v5, %s3714_s12 }
 0x35b   : > { %v2344_v27 = vpop.f32.mrb[12].mxu0 }
 0x35c   : > { %v1293_v46 = vadd.f32 %v2344_v27, %v3459_v41  ;;  %1355 = vrot.lane.b32.xlu1 %v1299_v29, %s3714_s12  ;;  %v1284_v47 = vpop.f32.mrb[13].mxu0 }
 0x35d   : > { %v2345_v61 = vpop.f32.mrb[14].mxu0  ;;  %v1285_v7 = vadd.f32 %v3459_v41, %v1284_v47 }
 0x35e   : > { %v1305_v62 = vadd.f32 %v1293_v46, %v3486_v49  ;;  %v1296_v8 = vadd.f32 %v2345_v61, %v3459_v41  ;;  %1357 = vrot.lane.b32.xlu0 %v1300_v6, %s3714_s12  ;;  %v1287_v45 = vpop.f32.mrb[15].mxu0 }
 0x35f   : > { %v1288_v31 = vadd.f32 %v3459_v41, %v1287_v45  ;;  %v1303_v59 = vadd.f32 %v1285_v7, %v3499_v34 }
 0x360   : > { %v1306_v12 = vadd.f32 %v1296_v8, %v3493_v42  ;;  %1367 = vrot.lane.b32.xlu1 %v1305_v62, %s3714_s12 }
 0x361   : > { %v1304_v24 = vadd.f32 %v1288_v31, %v3504_v40 }
 0x362   : > { %1369 = vrot.lane.b32.xlu0 %v1306_v12, %s3714_s12 }
 0x363   : > { %v3506_v9 = vpop.f32.mrb[16].mxu0 }
 0x364   : > { %v3509_v15 = vpop.f32.mrb[17].mxu0  ;;  %1363 = vrot.lane.b32.xlu1 %v1303_v59, %s3714_s12 }
 0x365   : > { %v3512_v16 = vpop.f32.mrb[18].mxu0 }
 0x366   : > { %v3514_v38 = vpop.f32.mrb[19].mxu0  ;;  %1365 = vrot.lane.b32.xlu0 %v1304_v24, %s3714_s12 }
 0x36b   : > { %v3517_v33 = vpop.f32.mrb[20].mxu0 }
 0x36c   : > { %v3519_v19 = vpop.f32.mrb[21].mxu0 }
 0x36d   : > { %v3521_v20 = vpop.f32.mrb[22].mxu0 }
 0x36e   : > { %v3523_v23 = vpop.f32.mrb[23].mxu0 }
 0x373   : > { %v2384_v25 = vpop.f32.mrb[24].mxu0 }
 0x374   : > { %v1854_v17 = vadd.f32 %v2384_v25, %v3459_v41  ;;  %v1845_v22 = vpop.f32.mrb[25].mxu0 }
 0x375   : > { %v2385_v63 = vpop.f32.mrb[26].mxu0  ;;  %v1846_v18 = vadd.f32 %v3459_v41, %v1845_v22 }
 0x376   : > { %v1878_v37 = vadd.f32 %v1854_v17, %v3463_v57  ;;  %v1857_v11 = vadd.f32 %v2385_v63, %v3459_v41  ;;  %v1848_v44 = vpop.f32.mrb[27].mxu0 }
 0x377   : > { %v1849_v3 = vadd.f32 %v3459_v41, %v1848_v44  ;;  %v1876_v30 = vadd.f32 %v1846_v18, %v3475_v36 }
 0x378   : > { %v1879_v2 = vadd.f32 %v1857_v11, %v3469_v55  ;;  %1936 = vrot.lane.b32.xlu1 %v1878_v37, %s3714_s12 }
 0x379   : > { %v1877_v58 = vadd.f32 %v1849_v3, %v3480_v48 }
 0x37a   : > { %1938 = vrot.lane.b32.xlu0 %v1879_v2, %s3714_s12 }
 0x37b   : > { %v2388_v4 = vpop.f32.mrb[28].mxu0 }
 0x37c   : > { %v1861_v60 = vpop.f32.mrb[29].mxu0  ;;  %1932 = vrot.lane.b32.xlu1 %v1876_v30, %s3714_s12 }
 0x37d   : > { %v1862_v56 = vadd.f32 %v3459_v41, %v1861_v60  ;;  %v2389_v53 = vpop.f32.mrb[30].mxu0 }
 0x37e   : > { %2618 = shalt.err (!%p2615_p3)
}
 0x37f   : > { %s2619_s18 = scalar_lea.hbm %s3539_s29, 1024  ;;  %s2623_s30 = scalar_lea.hbm %s3712_s9, 2048 }
 0x380   : > { %p2620_p4 = scmp.ne.s32.totalorder %s3539_s29, %s2619_s18  ;;  %p2624_p9 = scmp.lt.u32.totalorder %s3539_s29, %s3712_s9 }
 0x381   : > { %p2625_p10 = scmp.lt.u32.totalorder %s2623_s30, %s2619_s18  ;;  %p2627_p12 = scmp.lt.u32.totalorder %s2619_s18, %s3539_s29 }
 0x382   : > { %p2621_p7 = pnand %p2620_p4, %p2771_p5 }
 0x383   : > { %p2626_p11 = por %p2625_p10, %p2624_p9 }
 0x384   : > { %p2622_p8 = pneg %p2621_p7 }
 0x385   : > { %p2628_p13 = por %p2627_p12, %p2626_p11 }
 0x387   : > { %p2629_p0 = pnand %p2628_p13, %p2622_p8 }
 0x389   : > { %2632 = shalt.err (!%p2629_p0)
}
 0x38a   : > { %s2676_s21 = smov 64   ;;  %s2677_s20 = smov 4   ;;  %v1864_v52 = vpop.f32.mrb[31].mxu0  ;;  %v1870_v50 = vadd.f32 %v2388_v4, %v3459_v41  ;;  %v1880_v1 = vadd.f32 %v1862_v56, %v3499_v34  ;;  %v1873_v13 = vadd.f32 %v2389_v53, %v3459_v41  ;;  %v898_v35 = vadd.f32 %v3246_v10, %v3459_v41 }
 0x38b   : > { %2390 = dma.vmem_to_hbm [thread:$0]  (%p2771_p5), %s3541_s26, 1024, %s3539_s29, %s3548_s17, %s2676_s21, %s2676_s21, %s2677_s20   ;;  %v1865_v26 = vadd.f32 %v3459_v41, %v1864_v52  ;;  %v901_v29 = vadd.f32 %v3250_v14, %v3459_v41  ;;  %v890_v6 = vadd.f32 %v3459_v41, %v3248_v32  ;;  %vm1997_vm10 = vcmask 48128  }
 0x38c   : > { %s3718_s27 = smov 3   ;;  %v1882_v0 = vadd.f32 %v1870_v50, %v3486_v49  ;;  %v1883_v5 = vadd.f32 %v1873_v13, %v3493_v42  ;;  %s2237_s23 = sshll.u32 %s2783_s25, 7  ;;  %v922_v27 = vadd.f32 %v898_v35, %v3463_v57  ;;  %v893_v14 = vadd.f32 %v3459_v41, %v3252_v21 }
 0x38d   : > { %1934 = vrot.lane.b32.xlu0 %v1877_v58, %s3718_s27  ;;  %v1881_v28 = vadd.f32 %v1865_v26, %v3504_v40  ;;  %1940 = vrot.lane.b32.xlu1 %v1880_v1, %s3718_s27  ;;  %s3592_s29 = scalar_lea.vmem %s3713_s10, %s2237_s23  ;;  %v923_v10 = vadd.f32 %v901_v29, %v3469_v55  ;;  %v920_v62 = vadd.f32 %v890_v6, %v3475_v36 }
 0x38e   : > { %v914_v7 = vadd.f32 %v3254_v39, %v3459_v41  ;;  %v921_v45 = vadd.f32 %v893_v14, %v3480_v48  ;;  %v917_v21 = vadd.f32 %v3258_v54, %v3459_v41  ;;  %v906_v39 = vadd.f32 %v3459_v41, %v3256_v51 }
 0x38f   : > { %v909_v17 = vadd.f32 %v3459_v41, %v3260_v43  ;;  %v1604_v3 = vadd.f32 %v3506_v9, %v3459_v41  ;;  %v1607_v30 = vadd.f32 %v3512_v16, %v3459_v41  ;;  %v1596_v58 = vadd.f32 %v3459_v41, %v3509_v15 }
 0x390   : > { %v926_v59 = vadd.f32 %v914_v7, %v3486_v49  ;;  %v927_v54 = vadd.f32 %v917_v21, %v3493_v42  ;;  %v924_v37 = vadd.f32 %v906_v39, %v3499_v34  ;;  %v1599_v53 = vadd.f32 %v3459_v41, %v3514_v38 }
 0x391   : > { %1942 = vrot.lane.b32.xlu0 %v1881_v28, %s3718_s27  ;;  %1944 = vrot.lane.b32.xlu1 %v1882_v0, %s3718_s27  ;;  %v925_v11 = vadd.f32 %v909_v17, %v3504_v40  ;;  %v1628_v4 = vadd.f32 %v1604_v3, %v3463_v57  ;;  %v1629_v56 = vadd.f32 %v1607_v30, %v3469_v55 }
 0x392   : > { %v1626_v16 = vadd.f32 %v1596_v58, %v3475_v36  ;;  %v1612_v50 = vadd.f32 %v3459_v41, %v3519_v19  ;;  %v1627_v15 = vadd.f32 %v1599_v53, %v3480_v48  ;;  %v1615_v1 = vadd.f32 %v3459_v41, %v3523_v23 }
 0x393   : > { %v1620_v19 = vadd.f32 %v3517_v33, %v3459_v41  ;;  %v1623_v28 = vadd.f32 %v3521_v20, %v3459_v41 }
 0x394   : > { %v1630_v13 = vadd.f32 %v1612_v50, %v3499_v34  ;;  %v1631_v23 = vadd.f32 %v1615_v1, %v3504_v40 }
 0x395   : > { %1946 = vrot.lane.b32.xlu0 %v1883_v5, %s3718_s27  ;;  %v1632_v35 = vadd.f32 %v1620_v19, %v3486_v49  ;;  %v1633_v29 = vadd.f32 %v1623_v28, %v3493_v42 }
 0x3ca   : > { %v1360_v46 = vpop.permute.xlu1 %1359 }
 0x3cb   : > { %v1381_v47 = vsel %vm836_vm11, %v922_v27, %v1360_v46 }
 0x3cc   : > { %2002 = vst.msk [vmem:[%s3592_s29 + $0x20] sm:$0xff] %vm1997_vm10, %v1381_v47  ;;  %v1362_v61 = vpop.permute.xlu0 %1361 }
 0x3cd   : > { %v1382_v32 = vsel %vm836_vm11, %v923_v10, %v1362_v61 }
 0x3ce   : > { %2004 = vst.msk [vmem:[%s3592_s29 + $0x30] sm:$0xff] %vm1997_vm10, %v1382_v32  ;;  %v1356_v8 = vpop.permute.xlu1 %1355 }
 0x3cf   : > { %v1379_v12 = vsel %vm836_vm11, %v920_v62, %v1356_v8 }
 0x3d0   : > { %1998 = vst.msk [vmem:[%s3592_s29] sm:$0xff] %vm1997_vm10, %v1379_v12  ;;  %v1358_v31 = vpop.permute.xlu0 %1357 }
 0x3d1   : > { %v1380_v24 = vsel %vm836_vm11, %v921_v45, %v1358_v31 }
 0x3d2   : > { %2000 = vst.msk [vmem:[%s3592_s29 + $0x10] sm:$0xff] %vm1997_vm10, %v1380_v24  ;;  %v1368_v25 = vpop.permute.xlu1 %1367 }
 0x3d3   : > { %v1385_v22 = vsel %vm836_vm11, %v926_v59, %v1368_v25 }
 0x3d4   : > { %2010 = vst.msk [vmem:[%s3592_s29 + $0x60] sm:$0xff] %vm1997_vm10, %v1385_v22  ;;  %v1370_v63 = vpop.permute.xlu0 %1369 }
 0x3d5   : > { %v1386_v51 = vsel %vm836_vm11, %v927_v54, %v1370_v63 }
 0x3d6   : > { %2012 = vst.msk [vmem:[%s3592_s29 + $0x70] sm:$0xff] %vm1997_vm10, %v1386_v51  ;;  %v1364_v18 = vpop.permute.xlu1 %1363 }
 0x3d7   : > { %v1383_v44 = vsel %vm836_vm11, %v924_v37, %v1364_v18 }
 0x3d8   : > { %2006 = vst.msk [vmem:[%s3592_s29 + $0x40] sm:$0xff] %vm1997_vm10, %v1383_v44  ;;  %v1366_v43 = vpop.permute.xlu0 %1365 }
 0x3d9   : > { %v1384_v2 = vsel %vm836_vm11, %v925_v11, %v1366_v43 }
 0x3da   : > { %2008 = vst.msk [vmem:[%s3592_s29 + $0x50] sm:$0xff] %vm1997_vm10, %v1384_v2 }
 0x3ea   : > { %v1937_v60 = vpop.permute.xlu1 %1936 }
 0x3eb   : > { %v1958_v52 = vsel %vm836_vm11, %v1628_v4, %v1937_v60 }
 0x3ec   : > { %2003 = vst.msk [vmem:[%s3592_s29 + $0x28] sm:$0xff] %vm1997_vm10, %v1958_v52  ;;  %v1939_v9 = vpop.permute.xlu0 %1938 }
 0x3ed   : > { %v1959_v57 = vsel %vm836_vm11, %v1629_v56, %v1939_v9 }
 0x3ee   : > { %2005 = vst.msk [vmem:[%s3592_s29 + $0x38] sm:$0xff] %vm1997_vm10, %v1959_v57  ;;  %v1933_v55 = vpop.permute.xlu1 %1932 }
 0x3ef   : > { %v1956_v38 = vsel %vm836_vm11, %v1626_v16, %v1933_v55 }
 0x3f0   : > { %1999 = vst.msk [vmem:[%s3592_s29 + $0x8] sm:$0xff] %vm1997_vm10, %v1956_v38 }
 0x3ff   : > { %v1935_v36 = vpop.permute.xlu0 %1934  ;;  %v1941_v48 = vpop.permute.xlu1 %1940 }
 0x400   : > { %v1957_v26 = vsel %vm836_vm11, %v1627_v15, %v1935_v36  ;;  %v1960_v0 = vsel %vm836_vm11, %v1630_v13, %v1941_v48 }
 0x401   : > { %2001 = vst.msk [vmem:[%s3592_s29 + $0x18] sm:$0xff] %vm1997_vm10, %v1957_v26  ;;  %2007 = vst.msk [vmem:[%s3592_s29 + $0x48] sm:$0xff] %vm1997_vm10, %v1960_v0 }
 0x403   : > { %v1943_v5 = vpop.permute.xlu0 %1942  ;;  %v1945_v34 = vpop.permute.xlu1 %1944 }
 0x404   : > { %v1961_v33 = vsel %vm836_vm11, %v1631_v23, %v1943_v5  ;;  %v1962_v27 = vsel %vm836_vm11, %v1632_v35, %v1945_v34 }
 0x405   : > { %2009 = vst.msk [vmem:[%s3592_s29 + $0x58] sm:$0xff] %vm1997_vm10, %v1961_v33  ;;  %2011 = vst.msk [vmem:[%s3592_s29 + $0x68] sm:$0xff] %vm1997_vm10, %v1962_v27 }
 0x407   : > { %v1947_v41 = vpop.permute.xlu0 %1946 }
 0x408   : > { %v1963_v40 = vsel %vm836_vm11, %v1633_v29, %v1947_v41 }
 0x409   : > { %2013 = vst.msk [vmem:[%s3592_s29 + $0x78] sm:$0xff] %vm1997_vm10, %v1963_v40 }
 0x40a PF: > { %p2396_p5 = scmp.ge.s32.totalorder %s2667_s16, 2  ;;  %s2051_s25 = sand.u32 1, %s2655_s13  }
 0x40b   : > { %s2052_s17 = scalar_lea.sflag [#allocation3], %s2051_s25 }
 0x40c   : > { %p2393_p1 = pnand %p2396_p5, %p2775_p6 }
 0x40e   : > { %2650 = dma.done.wait (!%p2393_p1), %s2052_s17, 1024  }
 0x40f   : > { %2652 = vsyncadd (!%p2393_p1), %s2052_s17, 4294966272  ;;  %p21_p2 = scmp.ge.s32.totalorder %s2758_s19, 4   ;;  %s3719_s13 = smov %s2659_s14 }
 0x410   : > { %s3720_s14 = smov %s2663_s15  ;;  %s3721_s15 = smov %s2769_s22 }
 0x411   : > { %s3722_s16 = smov %s2758_s19  ;;  %23 = sbr.rel (!%p21_p2) target bundleno = 3 (0x3), region = 118 }
 0x418   :  { %2065 = vsyncpa [#allocation3], 1 }
 0x419   :  { %2067 = vsyncpa [#allocation3 + $0x1], 1 }

</bundles_post_ra>
